<compile_context>
chip_gen: v7x
topology: tpu7x:2x2x1
jax: 0.10.0
libtpu: 0.0.40
codegen_flags: <defaults>
</compile_context>

<pallas_src>
import jax
import jax.numpy as jnp
from jax.experimental import pallas as pl
from jax.experimental.pallas import tpu as pltpu

M = 4                      # nChannel (number of Gabor orientations)
BN_EPS = 1e-5
COMPUTE_DTYPE = jnp.bfloat16   # MXU-native operand dtype; accumulation stays f32
P_TILE_TARGET = 512            # rows per grid step; double-buffers fit v5e/v6e/v7x VMEM


def _round_up(a, b):
    return (a + b - 1) // b * b


def _choose_p_tile(P, target=P_TILE_TARGET):
    """Pick a P-tile (multiple of 8, <= target) that minimizes padding waste."""
    n_tiles = max(1, -(-P // target))
    tp = _round_up(-(-P // n_tiles), 8)
    return tp, tp * n_tiles, n_tiles


# ----------------------------- Pallas kernel --------------------------------
def _make_fused_kernel(apply_relu, has_residual):
    """Fused (im2col-matmul conv) + folded-BN bias [+ residual] [+ ReLU] kernel."""
    def kernel(*refs):
        if has_residual:
            x_ref, w_ref, b_ref, r_ref, o_ref = refs
        else:
            x_ref, w_ref, b_ref, o_ref = refs
        # x_ref block: (1, TP, Kp) bf16; w_ref: (Kp, Cout) bf16 (BN scale folded);
        # b_ref: (1, Cout) f32; r_ref: (1, TP, Cout) bf16.
        y = jnp.dot(x_ref[0], w_ref[...], preferred_element_type=jnp.float32)
        y = y + b_ref[...]
        if has_residual:
            y = y + r_ref[0].astype(jnp.float32)
        if apply_relu:
            y = jnp.maximum(y, 0.0)
        o_ref[0] = y.astype(o_ref.dtype)
    return kernel


def conv_bn(x, p, *, stride=1, padding=0, dilation=1, relu=False,
            residual=None, out_dtype=COMPUTE_DTYPE):
    """Bias-free Conv2d + folded BatchNorm [+ residual add] [+ ReLU].

    x: (N, H, W, Cin) NHWC.  p['w']: (KH, KW, Cin, Cout) HWIO.
    Padding / patch extraction is plain-JAX glue; the matmul hot path, bias,
    residual add and ReLU run inside the Pallas kernel, tiled over (N, P-tiles).
    """
    N, H, W, Cin = x.shape
    KH, KW, _, Cout = p['w'].shape
    Ho = (H + 2 * padding - dilation * (KH - 1) - 1) // stride + 1
    Wo = (W + 2 * padding - dilation * (KW - 1) - 1) // stride + 1
    P = Ho * Wo
    K = KH * KW * Cin

    # ---- XLA-side glue: pad + im2col in bf16 ----
    x = x.astype(COMPUTE_DTYPE)
    xp = jnp.pad(x, ((0, 0), (padding, padding), (padding, padding), (0, 0)))
    cols = []
    for kh in range(KH):
        for kw in range(KW):
            hs, ws = kh * dilation, kw * dilation
            cols.append(xp[:, hs:hs + (Ho - 1) * stride + 1:stride,
                              ws:ws + (Wo - 1) * stride + 1:stride, :])
    if len(cols) == 1:
        x2 = cols[0].reshape(N, P, K)
    else:
        x2 = jnp.concatenate(cols, axis=-1).reshape(N, P, K)

    # Fold the BN scale into the weights; only a bias add remains in-kernel.
    w2 = (p['w'].reshape(K, Cout).astype(jnp.float32)
          * p['scale'].astype(jnp.float32)[None, :]).astype(COMPUTE_DTYPE)
    b2 = p['bias'].reshape(1, Cout).astype(jnp.float32)

    # Pad small contraction dims (firstconv K=75, 1x1 downsamples) to 128 lanes.
    Kp = 128 if K < 128 else K
    if Kp != K:
        x2 = jnp.pad(x2, ((0, 0), (0, 0), (0, Kp - K)))
        w2 = jnp.pad(w2, ((0, Kp - K), (0, 0)))

    # Tile the P (spatial) axis: VMEM use becomes image-size independent and the
    # grid has enough steps to pipeline DMA against compute.
    TP, Pp, n_ptiles = _choose_p_tile(P)
    if Pp != P:
        x2 = jnp.pad(x2, ((0, 0), (0, Pp - P), (0, 0)))

    has_res = residual is not None
    in_specs = [
        pl.BlockSpec((1, TP, Kp), lambda n, pt: (n, pt, 0)),
        pl.BlockSpec((Kp, Cout), lambda n, pt: (0, 0)),    # weight stays VMEM-resident
        pl.BlockSpec((1, Cout), lambda n, pt: (0, 0)),
    ]
    args = [x2, w2, b2]
    if has_res:
        r2 = residual.astype(COMPUTE_DTYPE).reshape(N, P, Cout)
        if Pp != P:
            r2 = jnp.pad(r2, ((0, 0), (0, Pp - P), (0, 0)))
        in_specs.append(pl.BlockSpec((1, TP, Cout), lambda n, pt: (n, pt, 0)))
        args.append(r2)

    out_bytes = N * Pp * Cout * jnp.dtype(out_dtype).itemsize
    bytes_accessed = (x2.size * 2 + w2.size * 2 + b2.size * 4 + out_bytes
                      + (N * Pp * Cout * 2 if has_res else 0))
    cost = pl.CostEstimate(flops=2 * N * Pp * Kp * Cout,
                           transcendentals=0,
                           bytes_accessed=bytes_accessed)

    out = pl.pallas_call(
        _make_fused_kernel(relu, has_res),
        out_shape=jax.ShapeDtypeStruct((N, Pp, Cout), out_dtype),
        grid=(N, n_ptiles),
        in_specs=in_specs,
        out_specs=pl.BlockSpec((1, TP, Cout), lambda n, pt: (n, pt, 0)),
        compiler_params=pltpu.CompilerParams(
            dimension_semantics=("parallel", "parallel"),
            vmem_limit_bytes=32 * 1024 * 1024),
        cost_estimate=cost,
    )(*args)
    if Pp != P:
        out = out[:, :P, :]
    return out.reshape(N, Ho, Wo, Cout)


# ----------------------------- parameters ------------------------------------
def _conv_params(key, cin, cout, k, with_bn=True):
    kw_, kb = jax.random.split(key)
    fan_in = cin * k * k
    w = jax.random.normal(kw_, (k, k, cin, cout), jnp.float32) / jnp.sqrt(fan_in)
    if with_bn:
        kg, kbe, km, kv = jax.random.split(kb, 4)
        gamma = 1.0 + 0.1 * jax.random.normal(kg, (cout,), jnp.float32)
        beta = 0.1 * jax.random.normal(kbe, (cout,), jnp.float32)
        mean = 0.1 * jax.random.normal(km, (cout,), jnp.float32)
        var = 1.0 + 0.1 * jax.random.uniform(kv, (cout,), jnp.float32)
        scale = gamma / jnp.sqrt(var + BN_EPS)
        bias = beta - mean * scale
    else:
        scale = jnp.ones((cout,), jnp.float32)
        bias = jnp.zeros((cout,), jnp.float32)
    return {'w': w, 'scale': scale, 'bias': bias}


def init_params(key):
    ctr = [0]

    def nk():
        ctr[0] += 1
        return jax.random.fold_in(key, ctr[0])

    def block(cin, cout, k_down=None):
        b = {'conv1': _conv_params(nk(), cin, cout, 3),
             'conv2': _conv_params(nk(), cout, cout, 3)}
        if k_down is not None:
            b['down'] = _conv_params(nk(), cin, cout, k_down)
        return b

    params = {}
    # firstconv: GConv(3 -> 8, k=5, M=4, expand=True) => conv 3 -> 8*M, BN(8*M), ReLU
    params['firstconv'] = _conv_params(nk(), 3, 8 * M, 5)
    # layer1: 3 blocks @ 8*M, stride 1, no downsample
    params['layer1'] = [block(8 * M, 8 * M) for _ in range(3)]
    # layer2: 8 blocks @ 16*M, first has stride 2 + 1x1 downsample
    params['layer2'] = ([block(8 * M, 16 * M, k_down=1)] +
                        [block(16 * M, 16 * M) for _ in range(7)])
    # layer3: 3 blocks @ 32*M, dilation 2, first has 1x1 downsample (stride 1)
    params['layer3'] = ([block(16 * M, 32 * M, k_down=1)] +
                        [block(32 * M, 32 * M) for _ in range(2)])
    # lastconv: plain Conv2d(128 -> 32, k=3, pad=1), no BN / ReLU
    params['lastconv'] = _conv_params(nk(), 32 * M, 32, 3, with_bn=False)
    return params


# ----------------------------- forward pass ----------------------------------
def basic_block(x, p, *, stride, pad, dilation):
    padding = dilation if dilation > 1 else pad
    out = conv_bn(x, p['conv1'], stride=stride, padding=padding,
                  dilation=dilation, relu=True)
    if 'down' in p:
        res = conv_bn(x, p['down'], stride=stride, padding=0, dilation=1, relu=False)
    else:
        res = x
    # conv2 + BN, residual add fused into the same kernel (out += x)
    out = conv_bn(out, p['conv2'], stride=1, padding=padding,
                  dilation=dilation, relu=False, residual=res)
    return out


def feature_extraction_forward(params, x_nchw):
    x = jnp.transpose(x_nchw.astype(jnp.float32), (0, 2, 3, 1))  # NCHW -> NHWC
    out = conv_bn(x, params['firstconv'], stride=2, padding=2, dilation=1, relu=True)
    for blk in params['layer1']:
        out = basic_block(out, blk, stride=1, pad=1, dilation=1)
    out = basic_block(out, params['layer2'][0], stride=2, pad=1, dilation=1)
    for blk in params['layer2'][1:]:
        out = basic_block(out, blk, stride=1, pad=1, dilation=1)
    for blk in params['layer3']:
        out = basic_block(out, blk, stride=1, pad=1, dilation=2)
    out = conv_bn(out, params['lastconv'], stride=1, padding=1, dilation=1,
                  relu=False, out_dtype=jnp.float32)
    return jnp.transpose(out, (0, 3, 1, 2))                      # NHWC -> NCHW


if __name__ == "__main__":
    key = jax.random.PRNGKey(0)
    params = init_params(jax.random.fold_in(key, 123))
    x = jax.random.normal(jax.random.fold_in(key, 7), (2, 3, 16, 16), jnp.float32)

    fwd = jax.jit(feature_extraction_forward)
    out = jax.block_until_ready(fwd(params, x))

    assert out.shape == (2, 32, 4, 4), out.shape
    assert bool(jnp.all(jnp.isfinite(out)))
    print("KERNEL_OK")
</pallas_src>

<mosaic_0001>
module attributes {stable_mosaic.version = 11 : i64} {
  func.func @kernel(%arg0: i32, %arg1: i32, %arg2: memref<1x64x128xbf16, #tpu.memory_space<vmem>>, %arg3: memref<128x32xbf16, #tpu.memory_space<vmem>>, %arg4: memref<1x32xf32, #tpu.memory_space<vmem>>, %arg5: memref<1x64x32xbf16, #tpu.memory_space<vmem>>) attributes {dimension_semantics = [#tpu.dimension_semantics<parallel>, #tpu.dimension_semantics<parallel>], iteration_bounds = array<i64: 2, 1>, scalar_prefetch = 0 : i64, scratch_operands = 0 : i64, tpu.core_type = #tpu.core_type<tc>, window_params = [{transform_indices = @transform_0, window_bounds = array<i64: 1, 64, 128>}, {pipeline_mode = #tpu.pipeline_mode<synchronous>, transform_indices = @transform_1, window_bounds = array<i64: 128, 32>}, {pipeline_mode = #tpu.pipeline_mode<synchronous>, transform_indices = @transform_2, window_bounds = array<i64: 1, 32>}, {transform_indices = @transform_3, window_bounds = array<i64: 1, 64, 32>}]} {
    %c0 = arith.constant 0 : index
    %c0_0 = arith.constant 0 : index
    %c0_1 = arith.constant 0 : index
    %0 = vector.load %arg2[%c0, %c0_0, %c0_1] : memref<1x64x128xbf16, #tpu.memory_space<vmem>>, vector<1x64x128xbf16>
    %1 = vector.shape_cast %0 : vector<1x64x128xbf16> to vector<64x128xbf16>
    %c0_2 = arith.constant 0 : index
    %c0_3 = arith.constant 0 : index
    %2 = vector.load %arg3[%c0_2, %c0_3] : memref<128x32xbf16, #tpu.memory_space<vmem>>, vector<128x32xbf16>
    %cst = arith.constant dense<0.000000e+00> : vector<64x32xf32>
    %3 = tpu.matmul %1, %2, %cst {dimension_numbers = #tpu.dot_dimension_numbers<[1], [0], [0], [1], [0, 0, 1, 1], [], []>} : vector<64x128xbf16>, vector<128x32xbf16>, vector<64x32xf32> -> vector<64x32xf32>
    %c0_4 = arith.constant 0 : index
    %c0_5 = arith.constant 0 : index
    %4 = vector.load %arg4[%c0_4, %c0_5] : memref<1x32xf32, #tpu.memory_space<vmem>>, vector<1x32xf32>
    %5 = vector.broadcast %4 : vector<1x32xf32> to vector<64x32xf32>
    %6 = arith.addf %3, %5 : vector<64x32xf32>
    %cst_6 = arith.constant 0.000000e+00 : f32
    %7 = vector.broadcast %cst_6 : f32 to vector<64x32xf32>
    %8 = arith.maximumf %6, %7 : vector<64x32xf32>
    %9 = arith.truncf %8 : vector<64x32xf32> to vector<64x32xbf16>
    %c0_7 = arith.constant 0 : index
    %c0_8 = arith.constant 0 : index
    %c0_9 = arith.constant 0 : index
    %10 = vector.load %arg5[%c0_7, %c0_8, %c0_9] : memref<1x64x32xbf16, #tpu.memory_space<vmem>>, vector<1x64x32xbf16>
    %11 = vector.shape_cast %10 : vector<1x64x32xbf16> to vector<64x32xbf16>
    %12 = vector.shape_cast %9 : vector<64x32xbf16> to vector<1x64x32xbf16>
    tpu.vector_store %arg5[%c0_7, %c0_8, %c0_9], %12 {strides = array<i32>} : memref<1x64x32xbf16, #tpu.memory_space<vmem>>, vector<1x64x32xbf16>,
    return
  }
  func.func @transform_0(%arg0: i32, %arg1: i32) -> (i32, i32, i32) {
    %c0_i32 = arith.constant 0 : i32
    %c0_i32_0 = arith.constant 0 : i32
    return %arg0, %arg1, %c0_i32 : i32, i32, i32
  }
  func.func @transform_1(%arg0: i32, %arg1: i32) -> (i32, i32) {
    %c0_i32 = arith.constant 0 : i32
    %c0_i32_0 = arith.constant 0 : i32
    %c0_i32_1 = arith.constant 0 : i32
    return %c0_i32, %c0_i32_0 : i32, i32
  }
  func.func @transform_2(%arg0: i32, %arg1: i32) -> (i32, i32) {
    %c0_i32 = arith.constant 0 : i32
    %c0_i32_0 = arith.constant 0 : i32
    %c0_i32_1 = arith.constant 0 : i32
    return %c0_i32, %c0_i32_0 : i32, i32
  }
  func.func @transform_3(%arg0: i32, %arg1: i32) -> (i32, i32, i32) {
    %c0_i32 = arith.constant 0 : i32
    %c0_i32_0 = arith.constant 0 : i32
    return %arg0, %arg1, %c0_i32 : i32, i32, i32
  }
}

module attributes {stable_mosaic.version = 11 : i64} {
  func.func @kernel(%arg0: i32, %arg1: i32, %arg2: memref<1x64x288xbf16, #tpu.memory_space<vmem>>, %arg3: memref<288x32xbf16, #tpu.memory_space<vmem>>, %arg4: memref<1x32xf32, #tpu.memory_space<vmem>>, %arg5: memref<1x64x32xbf16, #tpu.memory_space<vmem>>) attributes {dimension_semantics = [#tpu.dimension_semantics<parallel>, #tpu.dimension_semantics<parallel>], iteration_bounds = array<i64: 2, 1>, scalar_prefetch = 0 : i64, scratch_operands = 0 : i64, tpu.core_type = #tpu.core_type<tc>, window_params = [{transform_indices = @transform_0, window_bounds = array<i64: 1, 64, 288>}, {pipeline_mode = #tpu.pipeline_mode<synchronous>, transform_indices = @transform_1, window_bounds = array<i64: 288, 32>}, {pipeline_mode = #tpu.pipeline_mode<synchronous>, transform_indices = @transform_2, window_bounds = array<i64: 1, 32>}, {transform_indices = @transform_3, window_bounds = array<i64: 1, 64, 32>}]} {
    %c0 = arith.constant 0 : index
    %c0_0 = arith.constant 0 : index
    %c0_1 = arith.constant 0 : index
    %0 = vector.load %arg2[%c0, %c0_0, %c0_1] : memref<1x64x288xbf16, #tpu.memory_space<vmem>>, vector<1x64x288xbf16>
    %1 = vector.shape_cast %0 : vector<1x64x288xbf16> to vector<64x288xbf16>
    %c0_2 = arith.constant 0 : index
    %c0_3 = arith.constant 0 : index
    %2 = vector.load %arg3[%c0_2, %c0_3] : memref<288x32xbf16, #tpu.memory_space<vmem>>, vector<288x32xbf16>
    %cst = arith.constant dense<0.000000e+00> : vector<64x32xf32>
    %3 = tpu.matmul %1, %2, %cst {dimension_numbers = #tpu.dot_dimension_numbers<[1], [0], [0], [1], [0, 0, 1, 1], [], []>} : vector<64x288xbf16>, vector<288x32xbf16>, vector<64x32xf32> -> vector<64x32xf32>
    %c0_4 = arith.constant 0 : index
    %c0_5 = arith.constant 0 : index
    %4 = vector.load %arg4[%c0_4, %c0_5] : memref<1x32xf32, #tpu.memory_space<vmem>>, vector<1x32xf32>
    %5 = vector.broadcast %4 : vector<1x32xf32> to vector<64x32xf32>
    %6 = arith.addf %3, %5 : vector<64x32xf32>
    %cst_6 = arith.constant 0.000000e+00 : f32
    %7 = vector.broadcast %cst_6 : f32 to vector<64x32xf32>
    %8 = arith.maximumf %6, %7 : vector<64x32xf32>
    %9 = arith.truncf %8 : vector<64x32xf32> to vector<64x32xbf16>
    %c0_7 = arith.constant 0 : index
    %c0_8 = arith.constant 0 : index
    %c0_9 = arith.constant 0 : index
    %10 = vector.load %arg5[%c0_7, %c0_8, %c0_9] : memref<1x64x32xbf16, #tpu.memory_space<vmem>>, vector<1x64x32xbf16>
    %11 = vector.shape_cast %10 : vector<1x64x32xbf16> to vector<64x32xbf16>
    %12 = vector.shape_cast %9 : vector<64x32xbf16> to vector<1x64x32xbf16>
    tpu.vector_store %arg5[%c0_7, %c0_8, %c0_9], %12 {strides = array<i32>} : memref<1x64x32xbf16, #tpu.memory_space<vmem>>, vector<1x64x32xbf16>,
    return
  }
  func.func @transform_0(%arg0: i32, %arg1: i32) -> (i32, i32, i32) {
    %c0_i32 = arith.constant 0 : i32
    %c0_i32_0 = arith.constant 0 : i32
    return %arg0, %arg1, %c0_i32 : i32, i32, i32
  }
  func.func @transform_1(%arg0: i32, %arg1: i32) -> (i32, i32) {
    %c0_i32 = arith.constant 0 : i32
    %c0_i32_0 = arith.constant 0 : i32
    %c0_i32_1 = arith.constant 0 : i32
    return %c0_i32, %c0_i32_0 : i32, i32
  }
  func.func @transform_2(%arg0: i32, %arg1: i32) -> (i32, i32) {
    %c0_i32 = arith.constant 0 : i32
    %c0_i32_0 = arith.constant 0 : i32
    %c0_i32_1 = arith.constant 0 : i32
    return %c0_i32, %c0_i32_0 : i32, i32
  }
  func.func @transform_3(%arg0: i32, %arg1: i32) -> (i32, i32, i32) {
    %c0_i32 = arith.constant 0 : i32
    %c0_i32_0 = arith.constant 0 : i32
    return %arg0, %arg1, %c0_i32 : i32, i32, i32
  }
}

module attributes {stable_mosaic.version = 11 : i64} {
  func.func @kernel(%arg0: i32, %arg1: i32, %arg2: memref<1x64x288xbf16, #tpu.memory_space<vmem>>, %arg3: memref<288x32xbf16, #tpu.memory_space<vmem>>, %arg4: memref<1x32xf32, #tpu.memory_space<vmem>>, %arg5: memref<1x64x32xbf16, #tpu.memory_space<vmem>>, %arg6: memref<1x64x32xbf16, #tpu.memory_space<vmem>>) attributes {dimension_semantics = [#tpu.dimension_semantics<parallel>, #tpu.dimension_semantics<parallel>], iteration_bounds = array<i64: 2, 1>, scalar_prefetch = 0 : i64, scratch_operands = 0 : i64, tpu.core_type = #tpu.core_type<tc>, window_params = [{transform_indices = @transform_0, window_bounds = array<i64: 1, 64, 288>}, {pipeline_mode = #tpu.pipeline_mode<synchronous>, transform_indices = @transform_1, window_bounds = array<i64: 288, 32>}, {pipeline_mode = #tpu.pipeline_mode<synchronous>, transform_indices = @transform_2, window_bounds = array<i64: 1, 32>}, {transform_indices = @transform_3, window_bounds = array<i64: 1, 64, 32>}, {transform_indices = @transform_4, window_bounds = array<i64: 1, 64, 32>}]} {
    %c0 = arith.constant 0 : index
    %c0_0 = arith.constant 0 : index
    %c0_1 = arith.constant 0 : index
    %0 = vector.load %arg2[%c0, %c0_0, %c0_1] : memref<1x64x288xbf16, #tpu.memory_space<vmem>>, vector<1x64x288xbf16>
    %1 = vector.shape_cast %0 : vector<1x64x288xbf16> to vector<64x288xbf16>
    %c0_2 = arith.constant 0 : index
    %c0_3 = arith.constant 0 : index
    %2 = vector.load %arg3[%c0_2, %c0_3] : memref<288x32xbf16, #tpu.memory_space<vmem>>, vector<288x32xbf16>
    %cst = arith.constant dense<0.000000e+00> : vector<64x32xf32>
    %3 = tpu.matmul %1, %2, %cst {dimension_numbers = #tpu.dot_dimension_numbers<[1], [0], [0], [1], [0, 0, 1, 1], [], []>} : vector<64x288xbf16>, vector<288x32xbf16>, vector<64x32xf32> -> vector<64x32xf32>
    %c0_4 = arith.constant 0 : index
    %c0_5 = arith.constant 0 : index
    %4 = vector.load %arg4[%c0_4, %c0_5] : memref<1x32xf32, #tpu.memory_space<vmem>>, vector<1x32xf32>
    %5 = vector.broadcast %4 : vector<1x32xf32> to vector<64x32xf32>
    %6 = arith.addf %3, %5 : vector<64x32xf32>
    %c0_6 = arith.constant 0 : index
    %c0_7 = arith.constant 0 : index
    %c0_8 = arith.constant 0 : index
    %7 = vector.load %arg5[%c0_6, %c0_7, %c0_8] : memref<1x64x32xbf16, #tpu.memory_space<vmem>>, vector<1x64x32xbf16>
    %8 = vector.shape_cast %7 : vector<1x64x32xbf16> to vector<64x32xbf16>
    %9 = arith.extf %8 : vector<64x32xbf16> to vector<64x32xf32>
    %10 = arith.addf %6, %9 : vector<64x32xf32>
    %11 = arith.truncf %10 : vector<64x32xf32> to vector<64x32xbf16>
    %c0_9 = arith.constant 0 : index
    %c0_10 = arith.constant 0 : index
    %c0_11 = arith.constant 0 : index
    %12 = vector.load %arg6[%c0_9, %c0_10, %c0_11] : memref<1x64x32xbf16, #tpu.memory_space<vmem>>, vector<1x64x32xbf16>
    %13 = vector.shape_cast %12 : vector<1x64x32xbf16> to vector<64x32xbf16>
    %14 = vector.shape_cast %11 : vector<64x32xbf16> to vector<1x64x32xbf16>
    tpu.vector_store %arg6[%c0_9, %c0_10, %c0_11], %14 {strides = array<i32>} : memref<1x64x32xbf16, #tpu.memory_space<vmem>>, vector<1x64x32xbf16>,
    return
  }
  func.func @transform_0(%arg0: i32, %arg1: i32) -> (i32, i32, i32) {
    %c0_i32 = arith.constant 0 : i32
    %c0_i32_0 = arith.constant 0 : i32
    return %arg0, %arg1, %c0_i32 : i32, i32, i32
  }
  func.func @transform_1(%arg0: i32, %arg1: i32) -> (i32, i32) {
    %c0_i32 = arith.constant 0 : i32
    %c0_i32_0 = arith.constant 0 : i32
    %c0_i32_1 = arith.constant 0 : i32
    return %c0_i32, %c0_i32_0 : i32, i32
  }
  func.func @transform_2(%arg0: i32, %arg1: i32) -> (i32, i32) {
    %c0_i32 = arith.constant 0 : i32
    %c0_i32_0 = arith.constant 0 : i32
    %c0_i32_1 = arith.constant 0 : i32
    return %c0_i32, %c0_i32_0 : i32, i32
  }
  func.func @transform_3(%arg0: i32, %arg1: i32) -> (i32, i32, i32) {
    %c0_i32 = arith.constant 0 : i32
    %c0_i32_0 = arith.constant 0 : i32
    return %arg0, %arg1, %c0_i32 : i32, i32, i32
  }
  func.func @transform_4(%arg0: i32, %arg1: i32) -> (i32, i32, i32) {
    %c0_i32 = arith.constant 0 : i32
    %c0_i32_0 = arith.constant 0 : i32
    return %arg0, %arg1, %c0_i32 : i32, i32, i32
  }
}

module attributes {stable_mosaic.version = 11 : i64} {
  func.func @kernel(%arg0: i32, %arg1: i32, %arg2: memref<1x16x288xbf16, #tpu.memory_space<vmem>>, %arg3: memref<288x64xbf16, #tpu.memory_space<vmem>>, %arg4: memref<1x64xf32, #tpu.memory_space<vmem>>, %arg5: memref<1x16x64xbf16, #tpu.memory_space<vmem>>) attributes {dimension_semantics = [#tpu.dimension_semantics<parallel>, #tpu.dimension_semantics<parallel>], iteration_bounds = array<i64: 2, 1>, scalar_prefetch = 0 : i64, scratch_operands = 0 : i64, tpu.core_type = #tpu.core_type<tc>, window_params = [{transform_indices = @transform_0, window_bounds = array<i64: 1, 16, 288>}, {pipeline_mode = #tpu.pipeline_mode<synchronous>, transform_indices = @transform_1, window_bounds = array<i64: 288, 64>}, {pipeline_mode = #tpu.pipeline_mode<synchronous>, transform_indices = @transform_2, window_bounds = array<i64: 1, 64>}, {transform_indices = @transform_3, window_bounds = array<i64: 1, 16, 64>}]} {
    %c0 = arith.constant 0 : index
    %c0_0 = arith.constant 0 : index
    %c0_1 = arith.constant 0 : index
    %0 = vector.load %arg2[%c0, %c0_0, %c0_1] : memref<1x16x288xbf16, #tpu.memory_space<vmem>>, vector<1x16x288xbf16>
    %1 = vector.shape_cast %0 : vector<1x16x288xbf16> to vector<16x288xbf16>
    %c0_2 = arith.constant 0 : index
    %c0_3 = arith.constant 0 : index
    %2 = vector.load %arg3[%c0_2, %c0_3] : memref<288x64xbf16, #tpu.memory_space<vmem>>, vector<288x64xbf16>
    %cst = arith.constant dense<0.000000e+00> : vector<16x64xf32>
    %3 = tpu.matmul %1, %2, %cst {dimension_numbers = #tpu.dot_dimension_numbers<[1], [0], [0], [1], [0, 0, 1, 1], [], []>} : vector<16x288xbf16>, vector<288x64xbf16>, vector<16x64xf32> -> vector<16x64xf32>
    %c0_4 = arith.constant 0 : index
    %c0_5 = arith.constant 0 : index
    %4 = vector.load %arg4[%c0_4, %c0_5] : memref<1x64xf32, #tpu.memory_space<vmem>>, vector<1x64xf32>
    %5 = vector.broadcast %4 : vector<1x64xf32> to vector<16x64xf32>
    %6 = arith.addf %3, %5 : vector<16x64xf32>
    %cst_6 = arith.constant 0.000000e+00 : f32
    %7 = vector.broadcast %cst_6 : f32 to vector<16x64xf32>
    %8 = arith.maximumf %6, %7 : vector<16x64xf32>
    %9 = arith.truncf %8 : vector<16x64xf32> to vector<16x64xbf16>
    %c0_7 = arith.constant 0 : index
    %c0_8 = arith.constant 0 : index
    %c0_9 = arith.constant 0 : index
    %10 = vector.load %arg5[%c0_7, %c0_8, %c0_9] : memref<1x16x64xbf16, #tpu.memory_space<vmem>>, vector<1x16x64xbf16>
    %11 = vector.shape_cast %10 : vector<1x16x64xbf16> to vector<16x64xbf16>
    %12 = vector.shape_cast %9 : vector<16x64xbf16> to vector<1x16x64xbf16>
    tpu.vector_store %arg5[%c0_7, %c0_8, %c0_9], %12 {strides = array<i32>} : memref<1x16x64xbf16, #tpu.memory_space<vmem>>, vector<1x16x64xbf16>,
    return
  }
  func.func @transform_0(%arg0: i32, %arg1: i32) -> (i32, i32, i32) {
    %c0_i32 = arith.constant 0 : i32
    %c0_i32_0 = arith.constant 0 : i32
    return %arg0, %arg1, %c0_i32 : i32, i32, i32
  }
  func.func @transform_1(%arg0: i32, %arg1: i32) -> (i32, i32) {
    %c0_i32 = arith.constant 0 : i32
    %c0_i32_0 = arith.constant 0 : i32
    %c0_i32_1 = arith.constant 0 : i32
    return %c0_i32, %c0_i32_0 : i32, i32
  }
  func.func @transform_2(%arg0: i32, %arg1: i32) -> (i32, i32) {
    %c0_i32 = arith.constant 0 : i32
    %c0_i32_0 = arith.constant 0 : i32
    %c0_i32_1 = arith.constant 0 : i32
    return %c0_i32, %c0_i32_0 : i32, i32
  }
  func.func @transform_3(%arg0: i32, %arg1: i32) -> (i32, i32, i32) {
    %c0_i32 = arith.constant 0 : i32
    %c0_i32_0 = arith.constant 0 : i32
    return %arg0, %arg1, %c0_i32 : i32, i32, i32
  }
}

module attributes {stable_mosaic.version = 11 : i64} {
  func.func @kernel(%arg0: i32, %arg1: i32, %arg2: memref<1x16x576xbf16, #tpu.memory_space<vmem>>, %arg3: memref<576x64xbf16, #tpu.memory_space<vmem>>, %arg4: memref<1x64xf32, #tpu.memory_space<vmem>>, %arg5: memref<1x16x64xbf16, #tpu.memory_space<vmem>>, %arg6: memref<1x16x64xbf16, #tpu.memory_space<vmem>>) attributes {dimension_semantics = [#tpu.dimension_semantics<parallel>, #tpu.dimension_semantics<parallel>], iteration_bounds = array<i64: 2, 1>, scalar_prefetch = 0 : i64, scratch_operands = 0 : i64, tpu.core_type = #tpu.core_type<tc>, window_params = [{transform_indices = @transform_0, window_bounds = array<i64: 1, 16, 576>}, {pipeline_mode = #tpu.pipeline_mode<synchronous>, transform_indices = @transform_1, window_bounds = array<i64: 576, 64>}, {pipeline_mode = #tpu.pipeline_mode<synchronous>, transform_indices = @transform_2, window_bounds = array<i64: 1, 64>}, {transform_indices = @transform_3, window_bounds = array<i64: 1, 16, 64>}, {transform_indices = @transform_4, window_bounds = array<i64: 1, 16, 64>}]} {
    %c0 = arith.constant 0 : index
    %c0_0 = arith.constant 0 : index
    %c0_1 = arith.constant 0 : index
    %0 = vector.load %arg2[%c0, %c0_0, %c0_1] : memref<1x16x576xbf16, #tpu.memory_space<vmem>>, vector<1x16x576xbf16>
    %1 = vector.shape_cast %0 : vector<1x16x576xbf16> to vector<16x576xbf16>
    %c0_2 = arith.constant 0 : index
    %c0_3 = arith.constant 0 : index
    %2 = vector.load %arg3[%c0_2, %c0_3] : memref<576x64xbf16, #tpu.memory_space<vmem>>, vector<576x64xbf16>
    %cst = arith.constant dense<0.000000e+00> : vector<16x64xf32>
    %3 = tpu.matmul %1, %2, %cst {dimension_numbers = #tpu.dot_dimension_numbers<[1], [0], [0], [1], [0, 0, 1, 1], [], []>} : vector<16x576xbf16>, vector<576x64xbf16>, vector<16x64xf32> -> vector<16x64xf32>
    %c0_4 = arith.constant 0 : index
    %c0_5 = arith.constant 0 : index
    %4 = vector.load %arg4[%c0_4, %c0_5] : memref<1x64xf32, #tpu.memory_space<vmem>>, vector<1x64xf32>
    %5 = vector.broadcast %4 : vector<1x64xf32> to vector<16x64xf32>
    %6 = arith.addf %3, %5 : vector<16x64xf32>
    %c0_6 = arith.constant 0 : index
    %c0_7 = arith.constant 0 : index
    %c0_8 = arith.constant 0 : index
    %7 = vector.load %arg5[%c0_6, %c0_7, %c0_8] : memref<1x16x64xbf16, #tpu.memory_space<vmem>>, vector<1x16x64xbf16>
    %8 = vector.shape_cast %7 : vector<1x16x64xbf16> to vector<16x64xbf16>
    %9 = arith.extf %8 : vector<16x64xbf16> to vector<16x64xf32>
    %10 = arith.addf %6, %9 : vector<16x64xf32>
    %11 = arith.truncf %10 : vector<16x64xf32> to vector<16x64xbf16>
    %c0_9 = arith.constant 0 : index
    %c0_10 = arith.constant 0 : index
    %c0_11 = arith.constant 0 : index
    %12 = vector.load %arg6[%c0_9, %c0_10, %c0_11] : memref<1x16x64xbf16, #tpu.memory_space<vmem>>, vector<1x16x64xbf16>
    %13 = vector.shape_cast %12 : vector<1x16x64xbf16> to vector<16x64xbf16>
    %14 = vector.shape_cast %11 : vector<16x64xbf16> to vector<1x16x64xbf16>
    tpu.vector_store %arg6[%c0_9, %c0_10, %c0_11], %14 {strides = array<i32>} : memref<1x16x64xbf16, #tpu.memory_space<vmem>>, vector<1x16x64xbf16>,
    return
  }
  func.func @transform_0(%arg0: i32, %arg1: i32) -> (i32, i32, i32) {
    %c0_i32 = arith.constant 0 : i32
    %c0_i32_0 = arith.constant 0 : i32
    return %arg0, %arg1, %c0_i32 : i32, i32, i32
  }
  func.func @transform_1(%arg0: i32, %arg1: i32) -> (i32, i32) {
    %c0_i32 = arith.constant 0 : i32
    %c0_i32_0 = arith.constant 0 : i32
    %c0_i32_1 = arith.constant 0 : i32
    return %c0_i32, %c0_i32_0 : i32, i32
  }
  func.func @transform_2(%arg0: i32, %arg1: i32) -> (i32, i32) {
    %c0_i32 = arith.constant 0 : i32
    %c0_i32_0 = arith.constant 0 : i32
    %c0_i32_1 = arith.constant 0 : i32
    return %c0_i32, %c0_i32_0 : i32, i32
  }
  func.func @transform_3(%arg0: i32, %arg1: i32) -> (i32, i32, i32) {
    %c0_i32 = arith.constant 0 : i32
    %c0_i32_0 = arith.constant 0 : i32
    return %arg0, %arg1, %c0_i32 : i32, i32, i32
  }
  func.func @transform_4(%arg0: i32, %arg1: i32) -> (i32, i32, i32) {
    %c0_i32 = arith.constant 0 : i32
    %c0_i32_0 = arith.constant 0 : i32
    return %arg0, %arg1, %c0_i32 : i32, i32, i32
  }
}

module attributes {stable_mosaic.version = 11 : i64} {
  func.func @kernel(%arg0: i32, %arg1: i32, %arg2: memref<1x16x128xbf16, #tpu.memory_space<vmem>>, %arg3: memref<128x64xbf16, #tpu.memory_space<vmem>>, %arg4: memref<1x64xf32, #tpu.memory_space<vmem>>, %arg5: memref<1x16x64xbf16, #tpu.memory_space<vmem>>) attributes {dimension_semantics = [#tpu.dimension_semantics<parallel>, #tpu.dimension_semantics<parallel>], iteration_bounds = array<i64: 2, 1>, scalar_prefetch = 0 : i64, scratch_operands = 0 : i64, tpu.core_type = #tpu.core_type<tc>, window_params = [{transform_indices = @transform_0, window_bounds = array<i64: 1, 16, 128>}, {pipeline_mode = #tpu.pipeline_mode<synchronous>, transform_indices = @transform_1, window_bounds = array<i64: 128, 64>}, {pipeline_mode = #tpu.pipeline_mode<synchronous>, transform_indices = @transform_2, window_bounds = array<i64: 1, 64>}, {transform_indices = @transform_3, window_bounds = array<i64: 1, 16, 64>}]} {
    %c0 = arith.constant 0 : index
    %c0_0 = arith.constant 0 : index
    %c0_1 = arith.constant 0 : index
    %0 = vector.load %arg2[%c0, %c0_0, %c0_1] : memref<1x16x128xbf16, #tpu.memory_space<vmem>>, vector<1x16x128xbf16>
    %1 = vector.shape_cast %0 : vector<1x16x128xbf16> to vector<16x128xbf16>
    %c0_2 = arith.constant 0 : index
    %c0_3 = arith.constant 0 : index
    %2 = vector.load %arg3[%c0_2, %c0_3] : memref<128x64xbf16, #tpu.memory_space<vmem>>, vector<128x64xbf16>
    %cst = arith.constant dense<0.000000e+00> : vector<16x64xf32>
    %3 = tpu.matmul %1, %2, %cst {dimension_numbers = #tpu.dot_dimension_numbers<[1], [0], [0], [1], [0, 0, 1, 1], [], []>} : vector<16x128xbf16>, vector<128x64xbf16>, vector<16x64xf32> -> vector<16x64xf32>
    %c0_4 = arith.constant 0 : index
    %c0_5 = arith.constant 0 : index
    %4 = vector.load %arg4[%c0_4, %c0_5] : memref<1x64xf32, #tpu.memory_space<vmem>>, vector<1x64xf32>
    %5 = vector.broadcast %4 : vector<1x64xf32> to vector<16x64xf32>
    %6 = arith.addf %3, %5 : vector<16x64xf32>
    %7 = arith.truncf %6 : vector<16x64xf32> to vector<16x64xbf16>
    %c0_6 = arith.constant 0 : index
    %c0_7 = arith.constant 0 : index
    %c0_8 = arith.constant 0 : index
    %8 = vector.load %arg5[%c0_6, %c0_7, %c0_8] : memref<1x16x64xbf16, #tpu.memory_space<vmem>>, vector<1x16x64xbf16>
    %9 = vector.shape_cast %8 : vector<1x16x64xbf16> to vector<16x64xbf16>
    %10 = vector.shape_cast %7 : vector<16x64xbf16> to vector<1x16x64xbf16>
    tpu.vector_store %arg5[%c0_6, %c0_7, %c0_8], %10 {strides = array<i32>} : memref<1x16x64xbf16, #tpu.memory_space<vmem>>, vector<1x16x64xbf16>,
    return
  }
  func.func @transform_0(%arg0: i32, %arg1: i32) -> (i32, i32, i32) {
    %c0_i32 = arith.constant 0 : i32
    %c0_i32_0 = arith.constant 0 : i32
    return %arg0, %arg1, %c0_i32 : i32, i32, i32
  }
  func.func @transform_1(%arg0: i32, %arg1: i32) -> (i32, i32) {
    %c0_i32 = arith.constant 0 : i32
    %c0_i32_0 = arith.constant 0 : i32
    %c0_i32_1 = arith.constant 0 : i32
    return %c0_i32, %c0_i32_0 : i32, i32
  }
  func.func @transform_2(%arg0: i32, %arg1: i32) -> (i32, i32) {
    %c0_i32 = arith.constant 0 : i32
    %c0_i32_0 = arith.constant 0 : i32
    %c0_i32_1 = arith.constant 0 : i32
    return %c0_i32, %c0_i32_0 : i32, i32
  }
  func.func @transform_3(%arg0: i32, %arg1: i32) -> (i32, i32, i32) {
    %c0_i32 = arith.constant 0 : i32
    %c0_i32_0 = arith.constant 0 : i32
    return %arg0, %arg1, %c0_i32 : i32, i32, i32
  }
}

module attributes {stable_mosaic.version = 11 : i64} {
  func.func @kernel(%arg0: i32, %arg1: i32, %arg2: memref<1x16x576xbf16, #tpu.memory_space<vmem>>, %arg3: memref<576x64xbf16, #tpu.memory_space<vmem>>, %arg4: memref<1x64xf32, #tpu.memory_space<vmem>>, %arg5: memref<1x16x64xbf16, #tpu.memory_space<vmem>>) attributes {dimension_semantics = [#tpu.dimension_semantics<parallel>, #tpu.dimension_semantics<parallel>], iteration_bounds = array<i64: 2, 1>, scalar_prefetch = 0 : i64, scratch_operands = 0 : i64, tpu.core_type = #tpu.core_type<tc>, window_params = [{transform_indices = @transform_0, window_bounds = array<i64: 1, 16, 576>}, {pipeline_mode = #tpu.pipeline_mode<synchronous>, transform_indices = @transform_1, window_bounds = array<i64: 576, 64>}, {pipeline_mode = #tpu.pipeline_mode<synchronous>, transform_indices = @transform_2, window_bounds = array<i64: 1, 64>}, {transform_indices = @transform_3, window_bounds = array<i64: 1, 16, 64>}]} {
    %c0 = arith.constant 0 : index
    %c0_0 = arith.constant 0 : index
    %c0_1 = arith.constant 0 : index
    %0 = vector.load %arg2[%c0, %c0_0, %c0_1] : memref<1x16x576xbf16, #tpu.memory_space<vmem>>, vector<1x16x576xbf16>
    %1 = vector.shape_cast %0 : vector<1x16x576xbf16> to vector<16x576xbf16>
    %c0_2 = arith.constant 0 : index
    %c0_3 = arith.constant 0 : index
    %2 = vector.load %arg3[%c0_2, %c0_3] : memref<576x64xbf16, #tpu.memory_space<vmem>>, vector<576x64xbf16>
    %cst = arith.constant dense<0.000000e+00> : vector<16x64xf32>
    %3 = tpu.matmul %1, %2, %cst {dimension_numbers = #tpu.dot_dimension_numbers<[1], [0], [0], [1], [0, 0, 1, 1], [], []>} : vector<16x576xbf16>, vector<576x64xbf16>, vector<16x64xf32> -> vector<16x64xf32>
    %c0_4 = arith.constant 0 : index
    %c0_5 = arith.constant 0 : index
    %4 = vector.load %arg4[%c0_4, %c0_5] : memref<1x64xf32, #tpu.memory_space<vmem>>, vector<1x64xf32>
    %5 = vector.broadcast %4 : vector<1x64xf32> to vector<16x64xf32>
    %6 = arith.addf %3, %5 : vector<16x64xf32>
    %cst_6 = arith.constant 0.000000e+00 : f32
    %7 = vector.broadcast %cst_6 : f32 to vector<16x64xf32>
    %8 = arith.maximumf %6, %7 : vector<16x64xf32>
    %9 = arith.truncf %8 : vector<16x64xf32> to vector<16x64xbf16>
    %c0_7 = arith.constant 0 : index
    %c0_8 = arith.constant 0 : index
    %c0_9 = arith.constant 0 : index
    %10 = vector.load %arg5[%c0_7, %c0_8, %c0_9] : memref<1x16x64xbf16, #tpu.memory_space<vmem>>, vector<1x16x64xbf16>
    %11 = vector.shape_cast %10 : vector<1x16x64xbf16> to vector<16x64xbf16>
    %12 = vector.shape_cast %9 : vector<16x64xbf16> to vector<1x16x64xbf16>
    tpu.vector_store %arg5[%c0_7, %c0_8, %c0_9], %12 {strides = array<i32>} : memref<1x16x64xbf16, #tpu.memory_space<vmem>>, vector<1x16x64xbf16>,
    return
  }
  func.func @transform_0(%arg0: i32, %arg1: i32) -> (i32, i32, i32) {
    %c0_i32 = arith.constant 0 : i32
    %c0_i32_0 = arith.constant 0 : i32
    return %arg0, %arg1, %c0_i32 : i32, i32, i32
  }
  func.func @transform_1(%arg0: i32, %arg1: i32) -> (i32, i32) {
    %c0_i32 = arith.constant 0 : i32
    %c0_i32_0 = arith.constant 0 : i32
    %c0_i32_1 = arith.constant 0 : i32
    return %c0_i32, %c0_i32_0 : i32, i32
  }
  func.func @transform_2(%arg0: i32, %arg1: i32) -> (i32, i32) {
    %c0_i32 = arith.constant 0 : i32
    %c0_i32_0 = arith.constant 0 : i32
    %c0_i32_1 = arith.constant 0 : i32
    return %c0_i32, %c0_i32_0 : i32, i32
  }
  func.func @transform_3(%arg0: i32, %arg1: i32) -> (i32, i32, i32) {
    %c0_i32 = arith.constant 0 : i32
    %c0_i32_0 = arith.constant 0 : i32
    return %arg0, %arg1, %c0_i32 : i32, i32, i32
  }
}

module attributes {stable_mosaic.version = 11 : i64} {
  func.func @kernel(%arg0: i32, %arg1: i32, %arg2: memref<1x16x576xbf16, #tpu.memory_space<vmem>>, %arg3: memref<576x128xbf16, #tpu.memory_space<vmem>>, %arg4: memref<1x128xf32, #tpu.memory_space<vmem>>, %arg5: memref<1x16x128xbf16, #tpu.memory_space<vmem>>) attributes {dimension_semantics = [#tpu.dimension_semantics<parallel>, #tpu.dimension_semantics<parallel>], iteration_bounds = array<i64: 2, 1>, scalar_prefetch = 0 : i64, scratch_operands = 0 : i64, tpu.core_type = #tpu.core_type<tc>, window_params = [{transform_indices = @transform_0, window_bounds = array<i64: 1, 16, 576>}, {pipeline_mode = #tpu.pipeline_mode<synchronous>, transform_indices = @transform_1, window_bounds = array<i64: 576, 128>}, {pipeline_mode = #tpu.pipeline_mode<synchronous>, transform_indices = @transform_2, window_bounds = array<i64: 1, 128>}, {transform_indices = @transform_3, window_bounds = array<i64: 1, 16, 128>}]} {
    %c0 = arith.constant 0 : index
    %c0_0 = arith.constant 0 : index
    %c0_1 = arith.constant 0 : index
    %0 = vector.load %arg2[%c0, %c0_0, %c0_1] : memref<1x16x576xbf16, #tpu.memory_space<vmem>>, vector<1x16x576xbf16>
    %1 = vector.shape_cast %0 : vector<1x16x576xbf16> to vector<16x576xbf16>
    %c0_2 = arith.constant 0 : index
    %c0_3 = arith.constant 0 : index
    %2 = vector.load %arg3[%c0_2, %c0_3] : memref<576x128xbf16, #tpu.memory_space<vmem>>, vector<576x128xbf16>
    %cst = arith.constant dense<0.000000e+00> : vector<16x128xf32>
    %3 = tpu.matmul %1, %2, %cst {dimension_numbers = #tpu.dot_dimension_numbers<[1], [0], [0], [1], [0, 0, 1, 1], [], []>} : vector<16x576xbf16>, vector<576x128xbf16>, vector<16x128xf32> -> vector<16x128xf32>
    %c0_4 = arith.constant 0 : index
    %c0_5 = arith.constant 0 : index
    %4 = vector.load %arg4[%c0_4, %c0_5] : memref<1x128xf32, #tpu.memory_space<vmem>>, vector<1x128xf32>
    %5 = vector.broadcast %4 : vector<1x128xf32> to vector<16x128xf32>
    %6 = arith.addf %3, %5 : vector<16x128xf32>
    %cst_6 = arith.constant 0.000000e+00 : f32
    %7 = vector.broadcast %cst_6 : f32 to vector<16x128xf32>
    %8 = arith.maximumf %6, %7 : vector<16x128xf32>
    %9 = arith.truncf %8 : vector<16x128xf32> to vector<16x128xbf16>
    %c0_7 = arith.constant 0 : index
    %c0_8 = arith.constant 0 : index
    %c0_9 = arith.constant 0 : index
    %10 = vector.load %arg5[%c0_7, %c0_8, %c0_9] : memref<1x16x128xbf16, #tpu.memory_space<vmem>>, vector<1x16x128xbf16>
    %11 = vector.shape_cast %10 : vector<1x16x128xbf16> to vector<16x128xbf16>
    %12 = vector.shape_cast %9 : vector<16x128xbf16> to vector<1x16x128xbf16>
    tpu.vector_store %arg5[%c0_7, %c0_8, %c0_9], %12 {strides = array<i32>} : memref<1x16x128xbf16, #tpu.memory_space<vmem>>, vector<1x16x128xbf16>,
    return
  }
  func.func @transform_0(%arg0: i32, %arg1: i32) -> (i32, i32, i32) {
    %c0_i32 = arith.constant 0 : i32
    %c0_i32_0 = arith.constant 0 : i32
    return %arg0, %arg1, %c0_i32 : i32, i32, i32
  }
  func.func @transform_1(%arg0: i32, %arg1: i32) -> (i32, i32) {
    %c0_i32 = arith.constant 0 : i32
    %c0_i32_0 = arith.constant 0 : i32
    %c0_i32_1 = arith.constant 0 : i32
    return %c0_i32, %c0_i32_0 : i32, i32
  }
  func.func @transform_2(%arg0: i32, %arg1: i32) -> (i32, i32) {
    %c0_i32 = arith.constant 0 : i32
    %c0_i32_0 = arith.constant 0 : i32
    %c0_i32_1 = arith.constant 0 : i32
    return %c0_i32, %c0_i32_0 : i32, i32
  }
  func.func @transform_3(%arg0: i32, %arg1: i32) -> (i32, i32, i32) {
    %c0_i32 = arith.constant 0 : i32
    %c0_i32_0 = arith.constant 0 : i32
    return %arg0, %arg1, %c0_i32 : i32, i32, i32
  }
}

module attributes {stable_mosaic.version = 11 : i64} {
  func.func @kernel(%arg0: i32, %arg1: i32, %arg2: memref<1x16x128xbf16, #tpu.memory_space<vmem>>, %arg3: memref<128x128xbf16, #tpu.memory_space<vmem>>, %arg4: memref<1x128xf32, #tpu.memory_space<vmem>>, %arg5: memref<1x16x128xbf16, #tpu.memory_space<vmem>>) attributes {dimension_semantics = [#tpu.dimension_semantics<parallel>, #tpu.dimension_semantics<parallel>], iteration_bounds = array<i64: 2, 1>, scalar_prefetch = 0 : i64, scratch_operands = 0 : i64, tpu.core_type = #tpu.core_type<tc>, window_params = [{transform_indices = @transform_0, window_bounds = array<i64: 1, 16, 128>}, {pipeline_mode = #tpu.pipeline_mode<synchronous>, transform_indices = @transform_1, window_bounds = array<i64: 128, 128>}, {pipeline_mode = #tpu.pipeline_mode<synchronous>, transform_indices = @transform_2, window_bounds = array<i64: 1, 128>}, {transform_indices = @transform_3, window_bounds = array<i64: 1, 16, 128>}]} {
    %c0 = arith.constant 0 : index
    %c0_0 = arith.constant 0 : index
    %c0_1 = arith.constant 0 : index
    %0 = vector.load %arg2[%c0, %c0_0, %c0_1] : memref<1x16x128xbf16, #tpu.memory_space<vmem>>, vector<1x16x128xbf16>
    %1 = vector.shape_cast %0 : vector<1x16x128xbf16> to vector<16x128xbf16>
    %c0_2 = arith.constant 0 : index
    %c0_3 = arith.constant 0 : index
    %2 = vector.load %arg3[%c0_2, %c0_3] : memref<128x128xbf16, #tpu.memory_space<vmem>>, vector<128x128xbf16>
    %cst = arith.constant dense<0.000000e+00> : vector<16x128xf32>
    %3 = tpu.matmul %1, %2, %cst {dimension_numbers = #tpu.dot_dimension_numbers<[1], [0], [0], [1], [0, 0, 1, 1], [], []>} : vector<16x128xbf16>, vector<128x128xbf16>, vector<16x128xf32> -> vector<16x128xf32>
    %c0_4 = arith.constant 0 : index
    %c0_5 = arith.constant 0 : index
    %4 = vector.load %arg4[%c0_4, %c0_5] : memref<1x128xf32, #tpu.memory_space<vmem>>, vector<1x128xf32>
    %5 = vector.broadcast %4 : vector<1x128xf32> to vector<16x128xf32>
    %6 = arith.addf %3, %5 : vector<16x128xf32>
    %7 = arith.truncf %6 : vector<16x128xf32> to vector<16x128xbf16>
    %c0_6 = arith.constant 0 : index
    %c0_7 = arith.constant 0 : index
    %c0_8 = arith.constant 0 : index
    %8 = vector.load %arg5[%c0_6, %c0_7, %c0_8] : memref<1x16x128xbf16, #tpu.memory_space<vmem>>, vector<1x16x128xbf16>
    %9 = vector.shape_cast %8 : vector<1x16x128xbf16> to vector<16x128xbf16>
    %10 = vector.shape_cast %7 : vector<16x128xbf16> to vector<1x16x128xbf16>
    tpu.vector_store %arg5[%c0_6, %c0_7, %c0_8], %10 {strides = array<i32>} : memref<1x16x128xbf16, #tpu.memory_space<vmem>>, vector<1x16x128xbf16>,
    return
  }
  func.func @transform_0(%arg0: i32, %arg1: i32) -> (i32, i32, i32) {
    %c0_i32 = arith.constant 0 : i32
    %c0_i32_0 = arith.constant 0 : i32
    return %arg0, %arg1, %c0_i32 : i32, i32, i32
  }
  func.func @transform_1(%arg0: i32, %arg1: i32) -> (i32, i32) {
    %c0_i32 = arith.constant 0 : i32
    %c0_i32_0 = arith.constant 0 : i32
    %c0_i32_1 = arith.constant 0 : i32
    return %c0_i32, %c0_i32_0 : i32, i32
  }
  func.func @transform_2(%arg0: i32, %arg1: i32) -> (i32, i32) {
    %c0_i32 = arith.constant 0 : i32
    %c0_i32_0 = arith.constant 0 : i32
    %c0_i32_1 = arith.constant 0 : i32
    return %c0_i32, %c0_i32_0 : i32, i32
  }
  func.func @transform_3(%arg0: i32, %arg1: i32) -> (i32, i32, i32) {
    %c0_i32 = arith.constant 0 : i32
    %c0_i32_0 = arith.constant 0 : i32
    return %arg0, %arg1, %c0_i32 : i32, i32, i32
  }
}

module attributes {stable_mosaic.version = 11 : i64} {
  func.func @kernel(%arg0: i32, %arg1: i32, %arg2: memref<1x16x1152xbf16, #tpu.memory_space<vmem>>, %arg3: memref<1152x128xbf16, #tpu.memory_space<vmem>>, %arg4: memref<1x128xf32, #tpu.memory_space<vmem>>, %arg5: memref<1x16x128xbf16, #tpu.memory_space<vmem>>, %arg6: memref<1x16x128xbf16, #tpu.memory_space<vmem>>) attributes {dimension_semantics = [#tpu.dimension_semantics<parallel>, #tpu.dimension_semantics<parallel>], iteration_bounds = array<i64: 2, 1>, scalar_prefetch = 0 : i64, scratch_operands = 0 : i64, tpu.core_type = #tpu.core_type<tc>, window_params = [{transform_indices = @transform_0, window_bounds = array<i64: 1, 16, 1152>}, {pipeline_mode = #tpu.pipeline_mode<synchronous>, transform_indices = @transform_1, window_bounds = array<i64: 1152, 128>}, {pipeline_mode = #tpu.pipeline_mode<synchronous>, transform_indices = @transform_2, window_bounds = array<i64: 1, 128>}, {transform_indices = @transform_3, window_bounds = array<i64: 1, 16, 128>}, {transform_indices = @transform_4, window_bounds = array<i64: 1, 16, 128>}]} {
    %c0 = arith.constant 0 : index
    %c0_0 = arith.constant 0 : index
    %c0_1 = arith.constant 0 : index
    %0 = vector.load %arg2[%c0, %c0_0, %c0_1] : memref<1x16x1152xbf16, #tpu.memory_space<vmem>>, vector<1x16x1152xbf16>
    %1 = vector.shape_cast %0 : vector<1x16x1152xbf16> to vector<16x1152xbf16>
    %c0_2 = arith.constant 0 : index
    %c0_3 = arith.constant 0 : index
    %2 = vector.load %arg3[%c0_2, %c0_3] : memref<1152x128xbf16, #tpu.memory_space<vmem>>, vector<1152x128xbf16>
    %cst = arith.constant dense<0.000000e+00> : vector<16x128xf32>
    %3 = tpu.matmul %1, %2, %cst {dimension_numbers = #tpu.dot_dimension_numbers<[1], [0], [0], [1], [0, 0, 1, 1], [], []>} : vector<16x1152xbf16>, vector<1152x128xbf16>, vector<16x128xf32> -> vector<16x128xf32>
    %c0_4 = arith.constant 0 : index
    %c0_5 = arith.constant 0 : index
    %4 = vector.load %arg4[%c0_4, %c0_5] : memref<1x128xf32, #tpu.memory_space<vmem>>, vector<1x128xf32>
    %5 = vector.broadcast %4 : vector<1x128xf32> to vector<16x128xf32>
    %6 = arith.addf %3, %5 : vector<16x128xf32>
    %c0_6 = arith.constant 0 : index
    %c0_7 = arith.constant 0 : index
    %c0_8 = arith.constant 0 : index
    %7 = vector.load %arg5[%c0_6, %c0_7, %c0_8] : memref<1x16x128xbf16, #tpu.memory_space<vmem>>, vector<1x16x128xbf16>
    %8 = vector.shape_cast %7 : vector<1x16x128xbf16> to vector<16x128xbf16>
    %9 = arith.extf %8 : vector<16x128xbf16> to vector<16x128xf32>
    %10 = arith.addf %6, %9 : vector<16x128xf32>
    %11 = arith.truncf %10 : vector<16x128xf32> to vector<16x128xbf16>
    %c0_9 = arith.constant 0 : index
    %c0_10 = arith.constant 0 : index
    %c0_11 = arith.constant 0 : index
    %12 = vector.load %arg6[%c0_9, %c0_10, %c0_11] : memref<1x16x128xbf16, #tpu.memory_space<vmem>>, vector<1x16x128xbf16>
    %13 = vector.shape_cast %12 : vector<1x16x128xbf16> to vector<16x128xbf16>
    %14 = vector.shape_cast %11 : vector<16x128xbf16> to vector<1x16x128xbf16>
    tpu.vector_store %arg6[%c0_9, %c0_10, %c0_11], %14 {strides = array<i32>} : memref<1x16x128xbf16, #tpu.memory_space<vmem>>, vector<1x16x128xbf16>,
    return
  }
  func.func @transform_0(%arg0: i32, %arg1: i32) -> (i32, i32, i32) {
    %c0_i32 = arith.constant 0 : i32
    %c0_i32_0 = arith.constant 0 : i32
    return %arg0, %arg1, %c0_i32 : i32, i32, i32
  }
  func.func @transform_1(%arg0: i32, %arg1: i32) -> (i32, i32) {
    %c0_i32 = arith.constant 0 : i32
    %c0_i32_0 = arith.constant 0 : i32
    %c0_i32_1 = arith.constant 0 : i32
    return %c0_i32, %c0_i32_0 : i32, i32
  }
  func.func @transform_2(%arg0: i32, %arg1: i32) -> (i32, i32) {
    %c0_i32 = arith.constant 0 : i32
    %c0_i32_0 = arith.constant 0 : i32
    %c0_i32_1 = arith.constant 0 : i32
    return %c0_i32, %c0_i32_0 : i32, i32
  }
  func.func @transform_3(%arg0: i32, %arg1: i32) -> (i32, i32, i32) {
    %c0_i32 = arith.constant 0 : i32
    %c0_i32_0 = arith.constant 0 : i32
    return %arg0, %arg1, %c0_i32 : i32, i32, i32
  }
  func.func @transform_4(%arg0: i32, %arg1: i32) -> (i32, i32, i32) {
    %c0_i32 = arith.constant 0 : i32
    %c0_i32_0 = arith.constant 0 : i32
    return %arg0, %arg1, %c0_i32 : i32, i32, i32
  }
}

module attributes {stable_mosaic.version = 11 : i64} {
  func.func @kernel(%arg0: i32, %arg1: i32, %arg2: memref<1x16x1152xbf16, #tpu.memory_space<vmem>>, %arg3: memref<1152x128xbf16, #tpu.memory_space<vmem>>, %arg4: memref<1x128xf32, #tpu.memory_space<vmem>>, %arg5: memref<1x16x128xbf16, #tpu.memory_space<vmem>>) attributes {dimension_semantics = [#tpu.dimension_semantics<parallel>, #tpu.dimension_semantics<parallel>], iteration_bounds = array<i64: 2, 1>, scalar_prefetch = 0 : i64, scratch_operands = 0 : i64, tpu.core_type = #tpu.core_type<tc>, window_params = [{transform_indices = @transform_0, window_bounds = array<i64: 1, 16, 1152>}, {pipeline_mode = #tpu.pipeline_mode<synchronous>, transform_indices = @transform_1, window_bounds = array<i64: 1152, 128>}, {pipeline_mode = #tpu.pipeline_mode<synchronous>, transform_indices = @transform_2, window_bounds = array<i64: 1, 128>}, {transform_indices = @transform_3, window_bounds = array<i64: 1, 16, 128>}]} {
    %c0 = arith.constant 0 : index
    %c0_0 = arith.constant 0 : index
    %c0_1 = arith.constant 0 : index
    %0 = vector.load %arg2[%c0, %c0_0, %c0_1] : memref<1x16x1152xbf16, #tpu.memory_space<vmem>>, vector<1x16x1152xbf16>
    %1 = vector.shape_cast %0 : vector<1x16x1152xbf16> to vector<16x1152xbf16>
    %c0_2 = arith.constant 0 : index
    %c0_3 = arith.constant 0 : index
    %2 = vector.load %arg3[%c0_2, %c0_3] : memref<1152x128xbf16, #tpu.memory_space<vmem>>, vector<1152x128xbf16>
    %cst = arith.constant dense<0.000000e+00> : vector<16x128xf32>
    %3 = tpu.matmul %1, %2, %cst {dimension_numbers = #tpu.dot_dimension_numbers<[1], [0], [0], [1], [0, 0, 1, 1], [], []>} : vector<16x1152xbf16>, vector<1152x128xbf16>, vector<16x128xf32> -> vector<16x128xf32>
    %c0_4 = arith.constant 0 : index
    %c0_5 = arith.constant 0 : index
    %4 = vector.load %arg4[%c0_4, %c0_5] : memref<1x128xf32, #tpu.memory_space<vmem>>, vector<1x128xf32>
    %5 = vector.broadcast %4 : vector<1x128xf32> to vector<16x128xf32>
    %6 = arith.addf %3, %5 : vector<16x128xf32>
    %cst_6 = arith.constant 0.000000e+00 : f32
    %7 = vector.broadcast %cst_6 : f32 to vector<16x128xf32>
    %8 = arith.maximumf %6, %7 : vector<16x128xf32>
    %9 = arith.truncf %8 : vector<16x128xf32> to vector<16x128xbf16>
    %c0_7 = arith.constant 0 : index
    %c0_8 = arith.constant 0 : index
    %c0_9 = arith.constant 0 : index
    %10 = vector.load %arg5[%c0_7, %c0_8, %c0_9] : memref<1x16x128xbf16, #tpu.memory_space<vmem>>, vector<1x16x128xbf16>
    %11 = vector.shape_cast %10 : vector<1x16x128xbf16> to vector<16x128xbf16>
    %12 = vector.shape_cast %9 : vector<16x128xbf16> to vector<1x16x128xbf16>
    tpu.vector_store %arg5[%c0_7, %c0_8, %c0_9], %12 {strides = array<i32>} : memref<1x16x128xbf16, #tpu.memory_space<vmem>>, vector<1x16x128xbf16>,
    return
  }
  func.func @transform_0(%arg0: i32, %arg1: i32) -> (i32, i32, i32) {
    %c0_i32 = arith.constant 0 : i32
    %c0_i32_0 = arith.constant 0 : i32
    return %arg0, %arg1, %c0_i32 : i32, i32, i32
  }
  func.func @transform_1(%arg0: i32, %arg1: i32) -> (i32, i32) {
    %c0_i32 = arith.constant 0 : i32
    %c0_i32_0 = arith.constant 0 : i32
    %c0_i32_1 = arith.constant 0 : i32
    return %c0_i32, %c0_i32_0 : i32, i32
  }
  func.func @transform_2(%arg0: i32, %arg1: i32) -> (i32, i32) {
    %c0_i32 = arith.constant 0 : i32
    %c0_i32_0 = arith.constant 0 : i32
    %c0_i32_1 = arith.constant 0 : i32
    return %c0_i32, %c0_i32_0 : i32, i32
  }
  func.func @transform_3(%arg0: i32, %arg1: i32) -> (i32, i32, i32) {
    %c0_i32 = arith.constant 0 : i32
    %c0_i32_0 = arith.constant 0 : i32
    return %arg0, %arg1, %c0_i32 : i32, i32, i32
  }
}

module attributes {stable_mosaic.version = 11 : i64} {
  func.func @kernel(%arg0: i32, %arg1: i32, %arg2: memref<1x16x1152xbf16, #tpu.memory_space<vmem>>, %arg3: memref<1152x32xbf16, #tpu.memory_space<vmem>>, %arg4: memref<1x32xf32, #tpu.memory_space<vmem>>, %arg5: memref<1x16x32xf32, #tpu.memory_space<vmem>>) attributes {dimension_semantics = [#tpu.dimension_semantics<parallel>, #tpu.dimension_semantics<parallel>], iteration_bounds = array<i64: 2, 1>, scalar_prefetch = 0 : i64, scratch_operands = 0 : i64, tpu.core_type = #tpu.core_type<tc>, window_params = [{transform_indices = @transform_0, window_bounds = array<i64: 1, 16, 1152>}, {pipeline_mode = #tpu.pipeline_mode<synchronous>, transform_indices = @transform_1, window_bounds = array<i64: 1152, 32>}, {pipeline_mode = #tpu.pipeline_mode<synchronous>, transform_indices = @transform_2, window_bounds = array<i64: 1, 32>}, {transform_indices = @transform_3, window_bounds = array<i64: 1, 16, 32>}]} {
    %c0 = arith.constant 0 : index
    %c0_0 = arith.constant 0 : index
    %c0_1 = arith.constant 0 : index
    %0 = vector.load %arg2[%c0, %c0_0, %c0_1] : memref<1x16x1152xbf16, #tpu.memory_space<vmem>>, vector<1x16x1152xbf16>
    %1 = vector.shape_cast %0 : vector<1x16x1152xbf16> to vector<16x1152xbf16>
    %c0_2 = arith.constant 0 : index
    %c0_3 = arith.constant 0 : index
    %2 = vector.load %arg3[%c0_2, %c0_3] : memref<1152x32xbf16, #tpu.memory_space<vmem>>, vector<1152x32xbf16>
    %cst = arith.constant dense<0.000000e+00> : vector<16x32xf32>
    %3 = tpu.matmul %1, %2, %cst {dimension_numbers = #tpu.dot_dimension_numbers<[1], [0], [0], [1], [0, 0, 1, 1], [], []>} : vector<16x1152xbf16>, vector<1152x32xbf16>, vector<16x32xf32> -> vector<16x32xf32>
    %c0_4 = arith.constant 0 : index
    %c0_5 = arith.constant 0 : index
    %4 = vector.load %arg4[%c0_4, %c0_5] : memref<1x32xf32, #tpu.memory_space<vmem>>, vector<1x32xf32>
    %5 = vector.broadcast %4 : vector<1x32xf32> to vector<16x32xf32>
    %6 = arith.addf %3, %5 : vector<16x32xf32>
    %c0_6 = arith.constant 0 : index
    %c0_7 = arith.constant 0 : index
    %c0_8 = arith.constant 0 : index
    %7 = vector.load %arg5[%c0_6, %c0_7, %c0_8] : memref<1x16x32xf32, #tpu.memory_space<vmem>>, vector<1x16x32xf32>
    %8 = vector.shape_cast %7 : vector<1x16x32xf32> to vector<16x32xf32>
    %9 = vector.shape_cast %6 : vector<16x32xf32> to vector<1x16x32xf32>
    tpu.vector_store %arg5[%c0_6, %c0_7, %c0_8], %9 {strides = array<i32>} : memref<1x16x32xf32, #tpu.memory_space<vmem>>, vector<1x16x32xf32>,
    return
  }
  func.func @transform_0(%arg0: i32, %arg1: i32) -> (i32, i32, i32) {
    %c0_i32 = arith.constant 0 : i32
    %c0_i32_0 = arith.constant 0 : i32
    return %arg0, %arg1, %c0_i32 : i32, i32, i32
  }
  func.func @transform_1(%arg0: i32, %arg1: i32) -> (i32, i32) {
    %c0_i32 = arith.constant 0 : i32
    %c0_i32_0 = arith.constant 0 : i32
    %c0_i32_1 = arith.constant 0 : i32
    return %c0_i32, %c0_i32_0 : i32, i32
  }
  func.func @transform_2(%arg0: i32, %arg1: i32) -> (i32, i32) {
    %c0_i32 = arith.constant 0 : i32
    %c0_i32_0 = arith.constant 0 : i32
    %c0_i32_1 = arith.constant 0 : i32
    return %c0_i32, %c0_i32_0 : i32, i32
  }
  func.func @transform_3(%arg0: i32, %arg1: i32) -> (i32, i32, i32) {
    %c0_i32 = arith.constant 0 : i32
    %c0_i32_0 = arith.constant 0 : i32
    return %arg0, %arg1, %c0_i32 : i32, i32, i32
  }
}

</mosaic_0001>

<bundles_post_ra>
// kernel: feature_extraction_forward.32
= control target key start
LH: loop header
LB: loop body
LE: loop exit
PB: predicated region body
PF: predicated region fallthrough
CT: control target
= control target key end

     0   :  { %s689_s12 = smov 0   ;;  %s691_s13 = smov 0   ;;  %s770_s0 = inlined_call_operand.vmem [shape: bf16[2,64,128], index: 0, kind: input, shape index: {}]   ;;  %s771_s1 = inlined_call_operand.vmem [shape: bf16[128,32], index: 1, kind: input, shape index: {}]   ;;  %s772_s2 = inlined_call_operand.vmem [shape: f32[1,32], index: 2, kind: input, shape index: {}]   ;;  %s773_s3 = inlined_call_operand.vmem [shape: bf16[2,64,32], index: 3, kind: output, shape index: {}]  }
   0x1   :  { %s693_s14 = smov 0  }
   0x2 LB: > { %s25_s15 = sadd.s32 1, %s663_s13  ;;  %p519_p0 = scmp.ge.s32.totalorder %s667_s14, 1  ;;  %s667_s14 = sphi %s693_s14, %s13_s14   ;;  %s663_s13 = sphi %s691_s13, %s775_s13   ;;  %s659_s12 = sphi %s689_s12, %s774_s12  }
   0x3   : > { %p27_p1 = scmp.ge.s32.totalorder %s25_s15, 2  ;;  %p158_p2 = scmp.lt.s32.totalorder %s667_s14, 3 }
   0x5   : > { %s777_s15 = smov (%p27_p1, %s25_s15), 0  ;;  %p159_p3 = pnand %p519_p0, %p158_p2 }
   0x6   : > { %v633_v0 = vld [vmem:[%s771_s1] sm:$0xff] (!%p159_p3)   ;;  %p191_p4 = scmp.lt.s32.totalorder (!%p159_p3), %s659_s12, 1  ;;  %v634_v1 = vld [vmem:[%s771_s1 + $0x8] sm:$0xff] (!%p159_p3)   ;;  %v635_v2 = vld [vmem:[%s771_s1 + $0x10] sm:$0xff] (!%p159_p3)   ;;  %vm419_vm0 = vcmask (!%p159_p3), 257024  }
   0x7   : > { %162 = sbr.rel (%p159_p3) target bundleno = 261 (0x105), region = 32  ;;  %569 = vmatprep.subr.bf16.mxu0 (!%p159_p3), %v633_v0  ;;  %593 = vmatprep.subr.bf16.mxu1 (!%p159_p3), %v633_v0  ;;  %v636_v3 = vld [vmem:[%s771_s1 + $0x18] sm:$0xff] (!%p159_p3)   ;;  %v637_v6 = vld [vmem:[%s771_s1 + $0x20] sm:$0xff] (!%p159_p3)   ;;  %v638_v7 = vld [vmem:[%s771_s1 + $0x28] sm:$0xff] (!%p159_p3)  }
   0x8   : > { %570 = vmatpush3.bf16.msra.mxu0 (!%p159_p3), %v633_v0  ;;  %601 = vmatpush3.bf16.msra.mxu1 (!%p159_p3), %v633_v0  ;;  %v639_v8 = vld [vmem:[%s771_s1 + $0x30] sm:$0xff] (!%p159_p3)   ;;  %v640_v9 = vld [vmem:[%s771_s1 + $0x38] sm:$0xff] (!%p159_p3)   ;;  %v524_v12 = vld [vmem:[%s772_s2] ss:$0 sm:$0xff] (!%p159_p3) }
   0x9   : > { %571 = vmatprep.subr.bf16.mxu0 (!%p159_p3), %v634_v1  ;;  %594 = vmatprep.subr.bf16.mxu1 (!%p159_p3), %v634_v1 }
   0xc   : > { %572 = vmatpush3.bf16.msra.mxu0 (!%p159_p3), %v634_v1  ;;  %602 = vmatpush3.bf16.msra.mxu1 (!%p159_p3), %v634_v1 }
   0xd   : > { %573 = vmatprep.subr.bf16.mxu0 (!%p159_p3), %v635_v2  ;;  %595 = vmatprep.subr.bf16.mxu1 (!%p159_p3), %v635_v2 }
   0xe   : > { %s779_s12 = smov (!%p191_p4, %s659_s12), 1 }
   0xf   : > { %s547_s22 = sshll.u32 %s779_s12, 5 }
  0x10   : > { %s724_s25 = scalar_lea.vmem %s770_s0, %s547_s22  ;;  %574 = vmatpush3.bf16.msra.mxu0 %v635_v2  ;;  %603 = vmatpush3.bf16.msra.mxu1 %v635_v2  ;;  %s208_s17 = scalar_lea.vmem %s773_s3, %s547_s22 }
  0x11   : > { %v641_v4 = vld [vmem:[%s724_s25] sm:$0xff]   ;;  %v642_v5 = vld [vmem:[%s724_s25 + $0x10] sm:$0xff]   ;;  %575 = vmatprep.subr.bf16.mxu0 %v636_v3  ;;  %596 = vmatprep.subr.bf16.mxu1 %v636_v3  ;;  %v643_v10 = vld [vmem:[%s724_s25 + $0x8] sm:$0xff]  }
  0x12   : > { %585 = vmatprep.mubr.bf16.mxu0 %v641_v4  ;;  %589 = vmatprep.mubr.bf16.mxu1 %v642_v5  ;;  %v644_v11 = vld [vmem:[%s724_s25 + $0x18] sm:$0xff]  }
  0x14   : > { %576 = vmatpush3.bf16.msra.mxu0 %v636_v3  ;;  %604 = vmatpush3.bf16.msra.mxu1 %v636_v3 }
  0x15   : > { %577 = vmatprep.subr.bf16.mxu0 %v637_v6  ;;  %597 = vmatprep.subr.bf16.mxu1 %v637_v6 }
  0x18   : > { %578 = vmatpush3.bf16.msra.mxu0 %v637_v6  ;;  %605 = vmatpush3.bf16.msra.mxu1 %v637_v6 }
  0x19   : > { %579 = vmatprep.subr.bf16.mxu0 %v638_v7  ;;  %598 = vmatprep.subr.bf16.mxu1 %v638_v7 }
  0x1c   : > { %580 = vmatpush3.bf16.msra.mxu0 %v638_v7  ;;  %606 = vmatpush3.bf16.msra.mxu1 %v638_v7 }
  0x1d   : > { %581 = vmatprep.subr.bf16.mxu0 %v639_v8  ;;  %599 = vmatprep.subr.bf16.mxu1 %v639_v8 }
  0x20   : > { %582 = vmatpush3.bf16.msra.mxu0 %v639_v8  ;;  %607 = vmatpush3.bf16.msra.mxu1 %v639_v8 }
  0x21   : > { %583 = vmatprep.subr.bf16.mxu0 %v640_v9  ;;  %600 = vmatprep.subr.bf16.mxu1 %v640_v9 }
  0x24   : > { %584 = vmatpush3.bf16.msra.mxu0 %v640_v9  ;;  %608 = vmatpush3.bf16.msra.mxu1 %v640_v9 }
  0x27   : > { %586 = vmatmul.mubr.bf16.vlgmr.msra.gmra.mrb[0].mxu0 %v643_v10  ;;  %590 = vmatmul.mubr.bf16.vlgmr.msra.gmra.mrb[0].mxu1 %v644_v11 }
  0xfa   : > { %v587_v13 = vpop.f32.mrb[0].mxu0  ;;  %v591_v14 = vpop.f32.mrb[0].mxu1 }
  0xfb   : > { %v357_v15 = vadd.f32 %v587_v13, %v524_v12  ;;  %v373_v16 = vadd.f32 %v591_v14, %v524_v12  ;;  %v348_v17 = vpop.f32.mrb[1].mxu0  ;;  %v364_v18 = vpop.f32.mrb[1].mxu1 }
  0xfc   : > { %v349_v19 = vadd.f32 %v524_v12, %v348_v17  ;;  %v365_v20 = vadd.f32 %v524_v12, %v364_v18  ;;  %v588_v21 = vpop.f32.mrb[2].mxu0  ;;  %v592_v22 = vpop.f32.mrb[2].mxu1 }
  0xfd   : > { %v381_v23 = vmax.f32 %v357_v15, 0.0  ;;  %v385_v24 = vmax.f32 %v373_v16, 0.0  ;;  %v360_v25 = vadd.f32 %v588_v21, %v524_v12  ;;  %v376_v26 = vadd.f32 %v592_v22, %v524_v12  ;;  %v351_v27 = vpop.f32.mrb[3].mxu0  ;;  %v367_v28 = vpop.f32.mrb[3].mxu1 }
  0xfe   : > { %v379_v29 = vmax.f32 %v349_v19, 0.0  ;;  %v383_v30 = vmax.f32 %v365_v20, 0.0  ;;  %v352_v31 = vadd.f32 %v524_v12, %v351_v27  ;;  %v368_v32 = vadd.f32 %v524_v12, %v367_v28 }
  0xff   : > { %v551_v33 = vpack.c.bf16 %v381_v23, %v381_v23  ;;  %v555_v34 = vpack.c.bf16 %v385_v24, %v385_v24  ;;  %v382_v35 = vmax.f32 %v360_v25, 0.0  ;;  %v386_v36 = vmax.f32 %v376_v26, 0.0 }
 0x100   : > { %v549_v37 = vpack.c.bf16 %v379_v29, %v379_v29  ;;  %v553_v38 = vpack.c.bf16 %v383_v30, %v383_v30  ;;  %v380_v39 = vmax.f32 %v352_v31, 0.0  ;;  %v384_v40 = vmax.f32 %v368_v32, 0.0 }
 0x101   : > { %422 = vst.msk [vmem:[%s208_s17 + $0x8] sm:$0xf] %vm419_vm0, %v551_v33  ;;  %426 = vst.msk [vmem:[%s208_s17 + $0x18] sm:$0xf] %vm419_vm0, %v555_v34  ;;  %v552_v41 = vpack.c.bf16 %v382_v35, %v382_v35  ;;  %v556_v42 = vpack.c.bf16 %v386_v36, %v386_v36 }
 0x102   : > { %420 = vst.msk [vmem:[%s208_s17] sm:$0xf] %vm419_vm0, %v549_v37  ;;  %424 = vst.msk [vmem:[%s208_s17 + $0x10] sm:$0xf] %vm419_vm0, %v553_v38  ;;  %v550_v43 = vpack.c.bf16 %v380_v39, %v380_v39  ;;  %v554_v44 = vpack.c.bf16 %v384_v40, %v384_v40 }
 0x103   : > { %423 = vst.msk [vmem:[%s208_s17 + $0xc] sm:$0xf] %vm419_vm0, %v552_v41  ;;  %427 = vst.msk [vmem:[%s208_s17 + $0x1c] sm:$0xf] %vm419_vm0, %v556_v42 }
 0x104   : > { %421 = vst.msk [vmem:[%s208_s17 + $0x4] sm:$0xf] %vm419_vm0, %v550_v43  ;;  %425 = vst.msk [vmem:[%s208_s17 + $0x14] sm:$0xf] %vm419_vm0, %v554_v44 }
 0x105 PF: > { %s13_s14 = sadd.s32 1, %s667_s14   ;;  %s774_s12 = smov %s663_s13 }
 0x106   : > { %p10_p5 = scmp.ge.s32.totalorder %s13_s14, 4   ;;  %s775_s13 = smov %s777_s15 }
 0x108   :  { %12 = sbr.rel (!%p10_p5) target bundleno = 2 (0x2), region = 62 }

// kernel: feature_extraction_forward.33
= control target key start
LH: loop header
LB: loop body
LE: loop exit
PB: predicated region body
PF: predicated region fallthrough
CT: control target
= control target key end

     0   :  { %s962_s12 = smov 0   ;;  %s964_s13 = smov 0   ;;  %s1092_s0 = inlined_call_operand.vmem [shape: bf16[2,64,288], index: 0, kind: input, shape index: {}]   ;;  %s1093_s1 = inlined_call_operand.vmem [shape: bf16[288,32], index: 1, kind: input, shape index: {}]   ;;  %s1094_s2 = inlined_call_operand.vmem [shape: f32[1,32], index: 2, kind: input, shape index: {}]   ;;  %s1095_s3 = inlined_call_operand.vmem [shape: bf16[2,64,32], index: 3, kind: output, shape index: {}]  }
   0x1   :  { %s966_s14 = smov 0  }
   0x2 LB: > { %s25_s15 = sadd.s32 1, %s936_s13  ;;  %p727_p0 = scmp.ge.s32.totalorder %s940_s14, 1  ;;  %s940_s14 = sphi %s966_s14, %s13_s14   ;;  %s936_s13 = sphi %s964_s13, %s1097_s13   ;;  %s932_s12 = sphi %s962_s12, %s1096_s12  }
   0x3   : > { %p27_p1 = scmp.ge.s32.totalorder %s25_s15, 2  ;;  %p159_p2 = scmp.lt.s32.totalorder %s940_s14, 3 }
   0x5   : > { %s1099_s15 = smov (%p27_p1, %s25_s15), 0  ;;  %p160_p3 = pnand %p727_p0, %p159_p2 }
   0x6   : > { %v884_v0 = vld [vmem:[%s1093_s1 + $0x40] sm:$0xff] (!%p160_p3)   ;;  %v886_v2 = vld [vmem:[%s1093_s1 + $0x48] sm:$0xff] (!%p160_p3)   ;;  %p193_p4 = scmp.lt.s32.totalorder (!%p160_p3), %s932_s12, 1  ;;  %v888_v4 = vld [vmem:[%s1093_s1 + $0x50] sm:$0xff] (!%p160_p3)   ;;  %vm441_vm0 = vcmask (!%p160_p3), 261120   ;;  %vm624_vm1 = vcmask (!%p160_p3), 257024  }
   0x7   : > { %163 = sbr.rel (%p160_p3) target bundleno = 281 (0x119), region = 32  ;;  %v885_v1 = vld [vmem:[%s1093_s1] sm:$0xff] (!%p160_p3)   ;;  %785 = vmatprep.subr.bf16.mxu0 (!%p160_p3), %v884_v0  ;;  %843 = vmatprep.subr.bf16.mxu1 (!%p160_p3), %v884_v0  ;;  %v887_v3 = vld [vmem:[%s1093_s1 + $0x8] sm:$0xff] (!%p160_p3)   ;;  %v889_v5 = vld [vmem:[%s1093_s1 + $0x10] sm:$0xff] (!%p160_p3)  }
   0x8   : > { %786 = vmatpush3.bf16.msra.mxu0 (!%p160_p3), %v885_v1  ;;  %851 = vmatpush3.bf16.msra.mxu1 (!%p160_p3), %v885_v1  ;;  %v890_v6 = vld [vmem:[%s1093_s1 + $0x58] sm:$0xff] (!%p160_p3)   ;;  %v892_v8 = vld [vmem:[%s1093_s1 + $0x60] sm:$0xff] (!%p160_p3)   ;;  %v894_v10 = vld [vmem:[%s1093_s1 + $0x68] sm:$0xff] (!%p160_p3)  }
   0x9   : > { %787 = vmatprep.subr.bf16.mxu0 (!%p160_p3), %v886_v2  ;;  %844 = vmatprep.subr.bf16.mxu1 (!%p160_p3), %v886_v2  ;;  %v891_v7 = vld [vmem:[%s1093_s1 + $0x18] sm:$0xff] (!%p160_p3)   ;;  %v893_v9 = vld [vmem:[%s1093_s1 + $0x20] sm:$0xff] (!%p160_p3)   ;;  %v895_v13 = vld [vmem:[%s1093_s1 + $0x28] sm:$0xff] (!%p160_p3)  }
   0xa   : > { %v896_v14 = vld [vmem:[%s1093_s1 + $0x70] sm:$0xff] (!%p160_p3)   ;;  %v898_v16 = vld [vmem:[%s1093_s1 + $0x78] sm:$0xff] (!%p160_p3)   ;;  %v906_v18 = vld [vmem:[%s1093_s1 + $0x80] sm:$0xff] (!%p160_p3)  }
   0xb   : > { %v897_v15 = vld [vmem:[%s1093_s1 + $0x30] sm:$0xff] (!%p160_p3)   ;;  %v899_v17 = vld [vmem:[%s1093_s1 + $0x38] sm:$0xff] (!%p160_p3)   ;;  %v907_v22 = vld [vmem:[%s1093_s1 + $0x88] sm:$0xff] (!%p160_p3)  }
   0xc   : > { %788 = vmatpush3.bf16.msra.mxu0 (!%p160_p3), %v887_v3  ;;  %852 = vmatpush3.bf16.msra.mxu1 (!%p160_p3), %v887_v3  ;;  %v731_v42 = vld [vmem:[%s1094_s2] ss:$0 sm:$0xff] (!%p160_p3) }
   0xd   : > { %789 = vmatprep.subr.bf16.mxu0 (!%p160_p3), %v888_v4  ;;  %845 = vmatprep.subr.bf16.mxu1 (!%p160_p3), %v888_v4 }
   0xe   : > { %s1101_s12 = smov (!%p193_p4, %s932_s12), 1 }
   0xf   : > { %s859_s30 = smul.u32 96, %s1101_s12  ;;  %s776_s8 = sshll.u32 %s1101_s12, 5 }
  0x10   : > { %790 = vmatpush3.bf16.msra.mxu0 %v889_v5  ;;  %853 = vmatpush3.bf16.msra.mxu1 %v889_v5  ;;  %s1065_s11 = scalar_lea.vmem %s1095_s3, %s776_s8 }
  0x11   : > { %791 = vmatprep.subr.bf16.mxu0 %v890_v6  ;;  %846 = vmatprep.subr.bf16.mxu1 %v890_v6  ;;  %s1013_s10 = scalar_lea.vmem %s1092_s0, %s859_s30 }
  0x12   : > { %v902_v11 = vld [vmem:[%s1013_s10 + $0x4] ss:$12 sps:$4 sm:$0xff]   ;;  %v905_v12 = vld [vmem:[%s1013_s10 + $0x4c] ss:$12 sps:$4 sm:$0xff]   ;;  %v903_v20 = vld [vmem:[%s1013_s10 + $0x48] ss:$12 sps:$4 sm:$0xff]  }
  0x13   : > { %486 = vmatprep.mubr.bf16.mxu0 %v902_v11  ;;  %510 = vmatprep.mubr.bf16.mxu1 %v905_v12  ;;  %v900_v19 = vld [vmem:[%s1013_s10] ss:$12 sps:$4 sm:$0xff]   ;;  %v908_v21 = vld [vmem:[%s1013_s10 + $0x1c] ss:$12 sps:$4 sm:$0xff]   ;;  %v911_v24 = vld [vmem:[%s1013_s10 + $0x18] ss:$12 sps:$4 sm:$0xff]  }
  0x14   : > { %792 = vmatpush3.bf16.msra.mxu0 %v891_v7  ;;  %854 = vmatpush3.bf16.msra.mxu1 %v891_v7  ;;  %v910_v23 = vld [vmem:[%s1013_s10 + $0x8] ss:$12 sps:$4 sm:$0xff]   ;;  %v912_v25 = vld [vmem:[%s1013_s10 + $0x20] ss:$12 sps:$4 sm:$0xff]   ;;  %v915_v27 = vld [vmem:[%s1013_s10 + $0x38] ss:$12 sps:$4 sm:$0xff]  }
  0x15   : > { %793 = vmatprep.subr.bf16.mxu0 %v892_v8  ;;  %847 = vmatprep.subr.bf16.mxu1 %v892_v8  ;;  %v913_v26 = vld [vmem:[%s1013_s10 + $0x34] ss:$12 sps:$4 sm:$0xff]   ;;  %v916_v28 = vld [vmem:[%s1013_s10 + $0x30] ss:$12 sps:$4 sm:$0xff]  }
  0x16   : > { %v917_v29 = vld [vmem:[%s1013_s10 + $0x50] ss:$12 sps:$4 sm:$0xff]  }
  0x18   : > { %794 = vmatpush3.bf16.msra.mxu0 %v893_v9  ;;  %855 = vmatpush3.bf16.msra.mxu1 %v893_v9 }
  0x19   : > { %795 = vmatprep.subr.bf16.mxu0 %v894_v10  ;;  %848 = vmatprep.subr.bf16.mxu1 %v894_v10 }
  0x1c   : > { %796 = vmatpush3.bf16.msra.mxu0 %v895_v13  ;;  %856 = vmatpush3.bf16.msra.mxu1 %v895_v13 }
  0x1d   : > { %797 = vmatprep.subr.bf16.mxu0 %v896_v14  ;;  %849 = vmatprep.subr.bf16.mxu1 %v896_v14 }
  0x20   : > { %798 = vmatpush3.bf16.msra.mxu0 %v897_v15  ;;  %857 = vmatpush3.bf16.msra.mxu1 %v897_v15 }
  0x21   : > { %799 = vmatprep.subr.bf16.mxu0 %v898_v16  ;;  %850 = vmatprep.subr.bf16.mxu1 %v898_v16 }
  0x24   : > { %800 = vmatpush3.bf16.msra.mxu0 %v899_v17  ;;  %858 = vmatpush3.bf16.msra.mxu1 %v899_v17 }
  0x25   : > { %831 = vmatprep.subr.bf16.mxu1 %v906_v18 }
  0x27   : > { %487 = vmatmul.mubr.bf16.vlgmr.msra.gmra.mrb[0].mxu0 %v900_v19  ;;  %511 = vmatmul.mubr.bf16.vlgmr.msra.gmra.mrb[0].mxu1 %v903_v20 }
  0x28   : > { %832 = vmatpush3.bf16.msra.mxu1 %v906_v18  ;;  %494 = vmatprep.mubr.bf16.mxu0 %v908_v21 }
  0x29   : > { %833 = vmatprep.subr.bf16.mxu1 %v907_v22  ;;  %835 = vmatprep.mubr.msk.bf16.mxu1 %vm441_vm0, %v910_v23 }
  0x2c   : > { %834 = vmatpush3.bf16.msra.mxu1 %v907_v22 }
  0x2f   : > { %495 = vmatmul.mubr.bf16.gmra.mrb[4].mxu0 %v911_v24  ;;  %836 = vmatmul.mubr.msk.bf16.vlgmr.msra.gmra.mrb[4].mxu1 %vm441_vm0, %v912_v25 }
  0x30   : > { %502 = vmatprep.mubr.bf16.mxu0 %v913_v26  ;;  %839 = vmatprep.mubr.msk.bf16.mxu1 %vm441_vm0, %v915_v27 }
  0x37   : > { %503 = vmatmul.mubr.bf16.gmra.mrb[8].mxu0 %v916_v28  ;;  %840 = vmatmul.mubr.msk.bf16.gmra.mrb[8].mxu1 %vm441_vm0, %v917_v29 }
  0xfa   : > { %v801_v30 = vpop.f32.mrb[0].mxu0  ;;  %v819_v31 = vpop.f32.mrb[0].mxu1 }
  0xfb   : > { %v802_v32 = vpop.f32.mrb[1].mxu0  ;;  %v820_v33 = vpop.f32.mrb[1].mxu1 }
  0xfc   : > { %v803_v34 = vadd.f32 %v802_v32, %v801_v30  ;;  %v804_v35 = vpop.f32.mrb[2].mxu0  ;;  %v821_v36 = vadd.f32 %v820_v33, %v819_v31  ;;  %v822_v37 = vpop.f32.mrb[2].mxu1 }
  0xfd   : > { %v805_v38 = vpop.f32.mrb[3].mxu0  ;;  %v823_v39 = vpop.f32.mrb[3].mxu1 }
  0xfe   : > { %v806_v40 = vadd.f32 %v805_v38, %v804_v35  ;;  %v824_v41 = vadd.f32 %v823_v39, %v822_v37  ;;  %v489_v45 = vadd.f32 %v803_v34, %v731_v42  ;;  %v513_v63 = vadd.f32 %v821_v36, %v731_v42 }
 0x100   : > { %v492_v52 = vadd.f32 %v806_v40, %v731_v42  ;;  %v516_v8 = vadd.f32 %v824_v41, %v731_v42 }
 0x102   : > { %v807_v43 = vpop.f32.mrb[4].mxu0  ;;  %v837_v44 = vpop.f32.mrb[4].mxu1 }
 0x103   : > { %v808_v46 = vpop.f32.mrb[5].mxu0  ;;  %v553_v47 = vpop.f32.mrb[5].mxu1 }
 0x104   : > { %v809_v48 = vadd.f32 %v808_v46, %v807_v43  ;;  %v554_v49 = vadd.f32 %v553_v47, %v489_v45  ;;  %v810_v50 = vpop.f32.mrb[6].mxu0  ;;  %v838_v51 = vpop.f32.mrb[6].mxu1 }
 0x105   : > { %v811_v53 = vpop.f32.mrb[7].mxu0  ;;  %v556_v54 = vpop.f32.mrb[7].mxu1 }
 0x106   : > { %v497_v55 = vadd.f32 %v809_v48, %v731_v42  ;;  %v584_v56 = vmax.f32 %v554_v49, 0.0  ;;  %v812_v57 = vadd.f32 %v811_v53, %v810_v50  ;;  %v557_v58 = vadd.f32 %v556_v54, %v492_v52 }
 0x108   : > { %v562_v59 = vadd.f32 %v837_v44, %v497_v55  ;;  %v777_v60 = vpack.c.bf16 %v584_v56, %v584_v56  ;;  %v500_v61 = vadd.f32 %v812_v57, %v731_v42  ;;  %v585_v62 = vmax.f32 %v557_v58, 0.0 }
 0x10a   : > { %v586_v0 = vmax.f32 %v562_v59, 0.0  ;;  %625 = vst.msk [vmem:[%s1065_s11] sm:$0xf] %vm624_vm1, %v777_v60  ;;  %v565_v1 = vadd.f32 %v838_v51, %v500_v61  ;;  %v778_v2 = vpack.c.bf16 %v585_v62, %v585_v62  ;;  %v813_v3 = vpop.f32.mrb[8].mxu0  ;;  %v841_v4 = vpop.f32.mrb[8].mxu1 }
 0x10b   : > { %v578_v5 = vadd.f32 %v841_v4, %v513_v63  ;;  %v814_v6 = vpop.f32.mrb[9].mxu0  ;;  %v569_v7 = vpop.f32.mrb[9].mxu1 }
 0x10c   : > { %v779_v9 = vpack.c.bf16 %v586_v0, %v586_v0  ;;  %v587_v10 = vmax.f32 %v565_v1, 0.0  ;;  %626 = vst.msk [vmem:[%s1065_s11 + $0x4] sm:$0xf] %vm624_vm1, %v778_v2  ;;  %v815_v11 = vadd.f32 %v814_v6, %v813_v3  ;;  %v816_v12 = vpop.f32.mrb[10].mxu0  ;;  %v842_v13 = vpop.f32.mrb[10].mxu1 }
 0x10d   : > { %v590_v14 = vmax.f32 %v578_v5, 0.0  ;;  %v581_v15 = vadd.f32 %v842_v13, %v516_v8  ;;  %v817_v16 = vpop.f32.mrb[11].mxu0  ;;  %v572_v17 = vpop.f32.mrb[11].mxu1 }
 0x10e   : > { %627 = vst.msk [vmem:[%s1065_s11 + $0x8] sm:$0xf] %vm624_vm1, %v779_v9  ;;  %v780_v18 = vpack.c.bf16 %v587_v10, %v587_v10  ;;  %v505_v19 = vadd.f32 %v815_v11, %v731_v42  ;;  %v818_v20 = vadd.f32 %v817_v16, %v816_v12 }
 0x10f   : > { %v783_v21 = vpack.c.bf16 %v590_v14, %v590_v14  ;;  %v591_v22 = vmax.f32 %v581_v15, 0.0 }
 0x110   : > { %628 = vst.msk [vmem:[%s1065_s11 + $0xc] sm:$0xf] %vm624_vm1, %v780_v18  ;;  %v570_v23 = vadd.f32 %v569_v7, %v505_v19  ;;  %v508_v24 = vadd.f32 %v818_v20, %v731_v42 }
 0x111   : > { %631 = vst.msk [vmem:[%s1065_s11 + $0x18] sm:$0xf] %vm624_vm1, %v783_v21  ;;  %v784_v25 = vpack.c.bf16 %v591_v22, %v591_v22 }
 0x112   : > { %v588_v26 = vmax.f32 %v570_v23, 0.0  ;;  %v573_v27 = vadd.f32 %v572_v17, %v508_v24 }
 0x113   : > { %632 = vst.msk [vmem:[%s1065_s11 + $0x1c] sm:$0xf] %vm624_vm1, %v784_v25 }
 0x114   : > { %v781_v28 = vpack.c.bf16 %v588_v26, %v588_v26  ;;  %v589_v29 = vmax.f32 %v573_v27, 0.0 }
 0x116   : > { %629 = vst.msk [vmem:[%s1065_s11 + $0x10] sm:$0xf] %vm624_vm1, %v781_v28  ;;  %v782_v30 = vpack.c.bf16 %v589_v29, %v589_v29 }
 0x118   : > { %630 = vst.msk [vmem:[%s1065_s11 + $0x14] sm:$0xf] %vm624_vm1, %v782_v30 }
 0x119 PF: > { %s13_s14 = sadd.s32 1, %s940_s14   ;;  %s1096_s12 = smov %s936_s13 }
 0x11a   : > { %p10_p5 = scmp.ge.s32.totalorder %s13_s14, 4   ;;  %s1097_s13 = smov %s1099_s15 }
 0x11c   :  { %12 = sbr.rel (!%p10_p5) target bundleno = 2 (0x2), region = 62 }

// kernel: feature_extraction_forward.34
= control target key start
LH: loop header
LB: loop body
LE: loop exit
PB: predicated region body
PF: predicated region fallthrough
CT: control target
= control target key end

     0   :  { %s1086_s15 = smov 0   ;;  %s1088_s16 = smov 0   ;;  %s1239_s0 = inlined_call_operand.vmem [shape: bf16[2,64,288], index: 0, kind: input, shape index: {}]   ;;  %s1240_s1 = inlined_call_operand.vmem [shape: bf16[288,32], index: 1, kind: input, shape index: {}]   ;;  %s1241_s2 = inlined_call_operand.vmem [shape: f32[1,32], index: 2, kind: input, shape index: {}]   ;;  %s1242_s3 = inlined_call_operand.vmem [shape: bf16[2,64,32], index: 3, kind: input, shape index: {}]   ;;  %s1243_s4 = inlined_call_operand.vmem [shape: bf16[2,64,32], index: 4, kind: output, shape index: {}]  }
   0x1   :  { %s1090_s17 = smov 0  }
   0x2 LB: > { %s26_s18 = sadd.s32 1, %s1055_s16  ;;  %p824_p0 = scmp.ge.s32.totalorder %s1059_s17, 1  ;;  %s1059_s17 = sphi %s1090_s17, %s14_s17   ;;  %s1055_s16 = sphi %s1088_s16, %s1245_s16   ;;  %s1051_s15 = sphi %s1086_s15, %s1244_s15  }
   0x3   : > { %p28_p1 = scmp.ge.s32.totalorder %s26_s18, 2  ;;  %p201_p2 = scmp.lt.s32.totalorder %s1059_s17, 3 }
   0x5   : > { %s1247_s18 = smov (%p28_p1, %s26_s18), 0  ;;  %p202_p3 = pnand %p824_p0, %p201_p2 }
   0x6   : > { %v1003_v0 = vld [vmem:[%s1240_s1 + $0x40] sm:$0xff] (!%p202_p3)   ;;  %v1005_v2 = vld [vmem:[%s1240_s1 + $0x48] sm:$0xff] (!%p202_p3)   ;;  %p246_p4 = scmp.lt.s32.totalorder (!%p202_p3), %s1051_s15, 1  ;;  %v1007_v4 = vld [vmem:[%s1240_s1 + $0x50] sm:$0xff] (!%p202_p3)   ;;  %vm504_vm0 = vcmask (!%p202_p3), 261120   ;;  %vm703_vm1 = vcmask (!%p202_p3), 257024  }
   0x7   : > { %205 = sbr.rel (%p202_p3) target bundleno = 281 (0x119), region = 36  ;;  %v1004_v1 = vld [vmem:[%s1240_s1] sm:$0xff] (!%p202_p3)   ;;  %904 = vmatprep.subr.bf16.mxu0 (!%p202_p3), %v1003_v0  ;;  %962 = vmatprep.subr.bf16.mxu1 (!%p202_p3), %v1003_v0  ;;  %v1006_v3 = vld [vmem:[%s1240_s1 + $0x8] sm:$0xff] (!%p202_p3)   ;;  %v1008_v5 = vld [vmem:[%s1240_s1 + $0x10] sm:$0xff] (!%p202_p3)  }
   0x8   : > { %905 = vmatpush3.bf16.msra.mxu0 (!%p202_p3), %v1004_v1  ;;  %970 = vmatpush3.bf16.msra.mxu1 (!%p202_p3), %v1004_v1  ;;  %v1009_v6 = vld [vmem:[%s1240_s1 + $0x58] sm:$0xff] (!%p202_p3)   ;;  %v1011_v8 = vld [vmem:[%s1240_s1 + $0x60] sm:$0xff] (!%p202_p3)   ;;  %v1013_v10 = vld [vmem:[%s1240_s1 + $0x68] sm:$0xff] (!%p202_p3)  }
   0x9   : > { %906 = vmatprep.subr.bf16.mxu0 (!%p202_p3), %v1005_v2  ;;  %963 = vmatprep.subr.bf16.mxu1 (!%p202_p3), %v1005_v2  ;;  %v1010_v7 = vld [vmem:[%s1240_s1 + $0x18] sm:$0xff] (!%p202_p3)   ;;  %v1012_v9 = vld [vmem:[%s1240_s1 + $0x20] sm:$0xff] (!%p202_p3)   ;;  %v1014_v13 = vld [vmem:[%s1240_s1 + $0x28] sm:$0xff] (!%p202_p3)  }
   0xa   : > { %v1015_v14 = vld [vmem:[%s1240_s1 + $0x70] sm:$0xff] (!%p202_p3)   ;;  %v1017_v16 = vld [vmem:[%s1240_s1 + $0x78] sm:$0xff] (!%p202_p3)   ;;  %v1025_v18 = vld [vmem:[%s1240_s1 + $0x80] sm:$0xff] (!%p202_p3)  }
   0xb   : > { %v1016_v15 = vld [vmem:[%s1240_s1 + $0x30] sm:$0xff] (!%p202_p3)   ;;  %v1018_v17 = vld [vmem:[%s1240_s1 + $0x38] sm:$0xff] (!%p202_p3)   ;;  %v1026_v22 = vld [vmem:[%s1240_s1 + $0x88] sm:$0xff] (!%p202_p3)  }
   0xc   : > { %907 = vmatpush3.bf16.msra.mxu0 (!%p202_p3), %v1006_v3  ;;  %971 = vmatpush3.bf16.msra.mxu1 (!%p202_p3), %v1006_v3  ;;  %v1193_v42 = vld [vmem:[%s1241_s2] ss:$0 sm:$0xff] (!%p202_p3) }
   0xd   : > { %908 = vmatprep.subr.bf16.mxu0 (!%p202_p3), %v1007_v4  ;;  %964 = vmatprep.subr.bf16.mxu1 (!%p202_p3), %v1007_v4 }
   0xe   : > { %s1249_s15 = smov (!%p246_p4, %s1051_s15), 1 }
   0xf   : > { %s978_s7 = smul.u32 96, %s1249_s15  ;;  %s875_s11 = sshll.u32 %s1249_s15, 5 }
  0x10   : > { %909 = vmatpush3.bf16.msra.mxu0 %v1008_v5  ;;  %972 = vmatpush3.bf16.msra.mxu1 %v1008_v5  ;;  %s1188_s19 = scalar_lea.vmem %s1242_s3, %s875_s11  ;;  %s1206_s23 = scalar_lea.vmem %s1243_s4, %s875_s11 }
  0x11   : > { %910 = vmatprep.subr.bf16.mxu0 %v1009_v6  ;;  %965 = vmatprep.subr.bf16.mxu1 %v1009_v6  ;;  %s1137_s14 = scalar_lea.vmem %s1239_s0, %s978_s7  ;;  %v886_v43 = vld [vmem:[%s1188_s19] sm:$0xff]   ;;  %v901_v46 = vld [vmem:[%s1188_s19 + $0x8] sm:$0xff]   ;;  %v903_v0 = vld [vmem:[%s1188_s19 + $0x18] sm:$0xff]  }
  0x12   : > { %v1021_v11 = vld [vmem:[%s1137_s14 + $0x4] ss:$12 sps:$4 sm:$0xff]   ;;  %v1024_v12 = vld [vmem:[%s1137_s14 + $0x4c] ss:$12 sps:$4 sm:$0xff]   ;;  %v1022_v20 = vld [vmem:[%s1137_s14 + $0x48] ss:$12 sps:$4 sm:$0xff]   ;;  %v887_v48 = vunpack.c.l.bf16 %v886_v43  ;;  %v888_v56 = vunpack.c.h.bf16 %v886_v43  ;;  %v891_v57 = vunpack.c.l.bf16 %v901_v46  ;;  %v892_v1 = vunpack.c.h.bf16 %v901_v46 }
  0x13   : > { %549 = vmatprep.mubr.bf16.mxu0 %v1021_v11  ;;  %573 = vmatprep.mubr.bf16.mxu1 %v1024_v12  ;;  %v1019_v19 = vld [vmem:[%s1137_s14] ss:$12 sps:$4 sm:$0xff]   ;;  %v1027_v21 = vld [vmem:[%s1137_s14 + $0x1c] ss:$12 sps:$4 sm:$0xff]   ;;  %v1030_v24 = vld [vmem:[%s1137_s14 + $0x18] ss:$12 sps:$4 sm:$0xff]  }
  0x14   : > { %911 = vmatpush3.bf16.msra.mxu0 %v1010_v7  ;;  %973 = vmatpush3.bf16.msra.mxu1 %v1010_v7  ;;  %v1029_v23 = vld [vmem:[%s1137_s14 + $0x8] ss:$12 sps:$4 sm:$0xff]   ;;  %v1031_v25 = vld [vmem:[%s1137_s14 + $0x20] ss:$12 sps:$4 sm:$0xff]   ;;  %v1034_v27 = vld [vmem:[%s1137_s14 + $0x38] ss:$12 sps:$4 sm:$0xff]   ;;  %v899_v7 = vunpack.c.l.bf16 %v903_v0 }
  0x15   : > { %912 = vmatprep.subr.bf16.mxu0 %v1011_v8  ;;  %966 = vmatprep.subr.bf16.mxu1 %v1011_v8  ;;  %v1032_v26 = vld [vmem:[%s1137_s14 + $0x34] ss:$12 sps:$4 sm:$0xff]   ;;  %v1035_v28 = vld [vmem:[%s1137_s14 + $0x30] ss:$12 sps:$4 sm:$0xff]  }
  0x16   : > { %v1036_v29 = vld [vmem:[%s1137_s14 + $0x50] ss:$12 sps:$4 sm:$0xff]  }
  0x18   : > { %913 = vmatpush3.bf16.msra.mxu0 %v1012_v9  ;;  %974 = vmatpush3.bf16.msra.mxu1 %v1012_v9 }
  0x19   : > { %914 = vmatprep.subr.bf16.mxu0 %v1013_v10  ;;  %967 = vmatprep.subr.bf16.mxu1 %v1013_v10 }
  0x1c   : > { %915 = vmatpush3.bf16.msra.mxu0 %v1014_v13  ;;  %975 = vmatpush3.bf16.msra.mxu1 %v1014_v13 }
  0x1d   : > { %916 = vmatprep.subr.bf16.mxu0 %v1015_v14  ;;  %968 = vmatprep.subr.bf16.mxu1 %v1015_v14 }
  0x20   : > { %917 = vmatpush3.bf16.msra.mxu0 %v1016_v15  ;;  %976 = vmatpush3.bf16.msra.mxu1 %v1016_v15 }
  0x21   : > { %918 = vmatprep.subr.bf16.mxu0 %v1017_v16  ;;  %969 = vmatprep.subr.bf16.mxu1 %v1017_v16  ;;  %v902_v16 = vld [vmem:[%s1188_s19 + $0x10] sm:$0xff]  }
  0x24   : > { %919 = vmatpush3.bf16.msra.mxu0 %v1018_v17  ;;  %977 = vmatpush3.bf16.msra.mxu1 %v1018_v17 }
  0x25   : > { %950 = vmatprep.subr.bf16.mxu1 %v1025_v18 }
  0x27   : > { %550 = vmatmul.mubr.bf16.vlgmr.msra.gmra.mrb[0].mxu0 %v1019_v19  ;;  %574 = vmatmul.mubr.bf16.vlgmr.msra.gmra.mrb[0].mxu1 %v1022_v20 }
  0x28   : > { %951 = vmatpush3.bf16.msra.mxu1 %v1025_v18  ;;  %557 = vmatprep.mubr.bf16.mxu0 %v1027_v21  ;;  %v900_v18 = vunpack.c.h.bf16 %v903_v0 }
  0x29   : > { %952 = vmatprep.subr.bf16.mxu1 %v1026_v22  ;;  %954 = vmatprep.mubr.msk.bf16.mxu1 %vm504_vm0, %v1029_v23 }
  0x2c   : > { %953 = vmatpush3.bf16.msra.mxu1 %v1026_v22 }
  0x2f   : > { %558 = vmatmul.mubr.bf16.gmra.mrb[4].mxu0 %v1030_v24  ;;  %955 = vmatmul.mubr.msk.bf16.vlgmr.msra.gmra.mrb[4].mxu1 %vm504_vm0, %v1031_v25 }
  0x30   : > { %565 = vmatprep.mubr.bf16.mxu0 %v1032_v26  ;;  %958 = vmatprep.mubr.msk.bf16.mxu1 %vm504_vm0, %v1034_v27 }
  0x37   : > { %566 = vmatmul.mubr.bf16.gmra.mrb[8].mxu0 %v1035_v28  ;;  %959 = vmatmul.mubr.msk.bf16.gmra.mrb[8].mxu1 %vm504_vm0, %v1036_v29 }
  0xfa   : > { %v920_v30 = vpop.f32.mrb[0].mxu0  ;;  %v938_v31 = vpop.f32.mrb[0].mxu1 }
  0xfb   : > { %v921_v32 = vpop.f32.mrb[1].mxu0  ;;  %v939_v33 = vpop.f32.mrb[1].mxu1 }
  0xfc   : > { %v922_v34 = vadd.f32 %v921_v32, %v920_v30  ;;  %v923_v35 = vpop.f32.mrb[2].mxu0  ;;  %v940_v36 = vadd.f32 %v939_v33, %v938_v31  ;;  %v941_v37 = vpop.f32.mrb[2].mxu1  ;;  %v895_v30 = vunpack.c.l.bf16 %v902_v16 }
  0xfd   : > { %v924_v38 = vpop.f32.mrb[3].mxu0  ;;  %v942_v39 = vpop.f32.mrb[3].mxu1 }
  0xfe   : > { %v925_v40 = vadd.f32 %v924_v38, %v923_v35  ;;  %v943_v41 = vadd.f32 %v942_v39, %v941_v37  ;;  %v552_v47 = vadd.f32 %v922_v34, %v1193_v42  ;;  %v576_v6 = vadd.f32 %v940_v36, %v1193_v42 }
  0xff   : > { %v896_v36 = vunpack.c.h.bf16 %v902_v16 }
 0x100   : > { %v555_v55 = vadd.f32 %v925_v40, %v1193_v42  ;;  %v579_v17 = vadd.f32 %v943_v41, %v1193_v42 }
 0x102   : > { %v926_v44 = vpop.f32.mrb[4].mxu0  ;;  %v956_v45 = vpop.f32.mrb[4].mxu1 }
 0x103   : > { %v927_v49 = vpop.f32.mrb[5].mxu0  ;;  %v616_v50 = vpop.f32.mrb[5].mxu1 }
 0x104   : > { %v928_v51 = vadd.f32 %v927_v49, %v926_v44  ;;  %v617_v52 = vadd.f32 %v616_v50, %v552_v47  ;;  %v929_v53 = vpop.f32.mrb[6].mxu0  ;;  %v957_v54 = vpop.f32.mrb[6].mxu1 }
 0x105   : > { %v930_v58 = vpop.f32.mrb[7].mxu0  ;;  %v619_v59 = vpop.f32.mrb[7].mxu1 }
 0x106   : > { %v560_v60 = vadd.f32 %v928_v51, %v1193_v42  ;;  %v663_v61 = vadd.f32 %v887_v48, %v617_v52  ;;  %v931_v62 = vadd.f32 %v930_v58, %v929_v53  ;;  %v620_v63 = vadd.f32 %v619_v59, %v555_v55 }
 0x108   : > { %v625_v2 = vadd.f32 %v956_v45, %v560_v60  ;;  %v877_v3 = vpack.c.bf16 %v663_v61, %v663_v61  ;;  %v563_v4 = vadd.f32 %v931_v62, %v1193_v42  ;;  %v664_v5 = vadd.f32 %v888_v56, %v620_v63 }
 0x10a   : > { %v665_v8 = vadd.f32 %v891_v57, %v625_v2  ;;  %704 = vst.msk [vmem:[%s1206_s23] sm:$0xf] %vm703_vm1, %v877_v3  ;;  %v628_v9 = vadd.f32 %v957_v54, %v563_v4  ;;  %v878_v10 = vpack.c.bf16 %v664_v5, %v664_v5  ;;  %v932_v11 = vpop.f32.mrb[8].mxu0  ;;  %v960_v12 = vpop.f32.mrb[8].mxu1 }
 0x10b   : > { %v641_v13 = vadd.f32 %v960_v12, %v576_v6  ;;  %v933_v14 = vpop.f32.mrb[9].mxu0  ;;  %v632_v15 = vpop.f32.mrb[9].mxu1 }
 0x10c   : > { %v879_v19 = vpack.c.bf16 %v665_v8, %v665_v8  ;;  %v666_v20 = vadd.f32 %v892_v1, %v628_v9  ;;  %705 = vst.msk [vmem:[%s1206_s23 + $0x4] sm:$0xf] %vm703_vm1, %v878_v10  ;;  %v934_v21 = vadd.f32 %v933_v14, %v932_v11  ;;  %v935_v22 = vpop.f32.mrb[10].mxu0  ;;  %v961_v23 = vpop.f32.mrb[10].mxu1 }
 0x10d   : > { %v669_v24 = vadd.f32 %v899_v7, %v641_v13  ;;  %v644_v25 = vadd.f32 %v961_v23, %v579_v17  ;;  %v936_v26 = vpop.f32.mrb[11].mxu0  ;;  %v635_v27 = vpop.f32.mrb[11].mxu1 }
 0x10e   : > { %706 = vst.msk [vmem:[%s1206_s23 + $0x8] sm:$0xf] %vm703_vm1, %v879_v19  ;;  %v880_v28 = vpack.c.bf16 %v666_v20, %v666_v20  ;;  %v568_v29 = vadd.f32 %v934_v21, %v1193_v42  ;;  %v937_v31 = vadd.f32 %v936_v26, %v935_v22 }
 0x10f   : > { %v883_v32 = vpack.c.bf16 %v669_v24, %v669_v24  ;;  %v670_v33 = vadd.f32 %v900_v18, %v644_v25 }
 0x110   : > { %707 = vst.msk [vmem:[%s1206_s23 + $0xc] sm:$0xf] %vm703_vm1, %v880_v28  ;;  %v633_v34 = vadd.f32 %v632_v15, %v568_v29  ;;  %v571_v35 = vadd.f32 %v937_v31, %v1193_v42 }
 0x111   : > { %710 = vst.msk [vmem:[%s1206_s23 + $0x18] sm:$0xf] %vm703_vm1, %v883_v32  ;;  %v884_v37 = vpack.c.bf16 %v670_v33, %v670_v33 }
 0x112   : > { %v667_v38 = vadd.f32 %v895_v30, %v633_v34  ;;  %v636_v39 = vadd.f32 %v635_v27, %v571_v35 }
 0x113   : > { %711 = vst.msk [vmem:[%s1206_s23 + $0x1c] sm:$0xf] %vm703_vm1, %v884_v37 }
 0x114   : > { %v881_v40 = vpack.c.bf16 %v667_v38, %v667_v38  ;;  %v668_v41 = vadd.f32 %v896_v36, %v636_v39 }
 0x116   : > { %708 = vst.msk [vmem:[%s1206_s23 + $0x10] sm:$0xf] %vm703_vm1, %v881_v40  ;;  %v882_v43 = vpack.c.bf16 %v668_v41, %v668_v41 }
 0x118   : > { %709 = vst.msk [vmem:[%s1206_s23 + $0x14] sm:$0xf] %vm703_vm1, %v882_v43 }
 0x119 PF: > { %s14_s17 = sadd.s32 1, %s1059_s17   ;;  %s1244_s15 = smov %s1055_s16 }
 0x11a   : > { %p11_p5 = scmp.ge.s32.totalorder %s14_s17, 4   ;;  %s1245_s16 = smov %s1247_s18 }
 0x11c   :  { %13 = sbr.rel (!%p11_p5) target bundleno = 2 (0x2), region = 69 }

// kernel: feature_extraction_forward.39
= control target key start
LH: loop header
LB: loop body
LE: loop exit
PB: predicated region body
PF: predicated region fallthrough
CT: control target
= control target key end

     0   :  { %s739_s12 = smov 0   ;;  %s741_s13 = smov 0   ;;  %s833_s0 = inlined_call_operand.vmem [shape: bf16[2,16,288], index: 0, kind: input, shape index: {}]   ;;  %s834_s1 = inlined_call_operand.vmem [shape: bf16[288,64], index: 1, kind: input, shape index: {}]   ;;  %s835_s2 = inlined_call_operand.vmem [shape: f32[1,64], index: 2, kind: input, shape index: {}]   ;;  %s836_s3 = inlined_call_operand.vmem [shape: bf16[2,16,64], index: 3, kind: output, shape index: {}]  }
   0x1   :  { %s743_s14 = smov 0  }
   0x2 LB: > { %s25_s15 = sadd.s32 1, %s711_s13  ;;  %p577_p0 = scmp.ge.s32.totalorder %s715_s14, 1  ;;  %s715_s14 = sphi %s743_s14, %s13_s14   ;;  %s711_s13 = sphi %s741_s13, %s838_s13   ;;  %s707_s12 = sphi %s739_s12, %s837_s12  }
   0x3   : > { %p27_p1 = scmp.ge.s32.totalorder %s25_s15, 2  ;;  %p159_p2 = scmp.lt.s32.totalorder %s715_s14, 3 }
   0x5   : > { %s840_s15 = smov (%p27_p1, %s25_s15), 0  ;;  %p160_p3 = pnand %p577_p0, %p159_p2 }
   0x6   : > { %v671_v0 = vld [vmem:[%s834_s1 + $0x40] sm:$0xff] (!%p160_p3)   ;;  %v717_v2 = vmov (!%p160_p3), 0.0   ;;  %v673_v3 = vld [vmem:[%s834_s1 + $0x48] sm:$0xff] (!%p160_p3)   ;;  %p193_p4 = scmp.lt.s32.totalorder (!%p160_p3), %s707_s12, 1  ;;  %vm718_vm0 = vmmov (!%p160_p3), 0   ;;  %v675_v5 = vld [vmem:[%s834_s1 + $0x50] sm:$0xff] (!%p160_p3)  }
   0x7   : > { %163 = sbr.rel (%p160_p3) target bundleno = 265 (0x109), region = 32  ;;  %v672_v1 = vld [vmem:[%s834_s1] sm:$0xff] (!%p160_p3)   ;;  %636 = vmatprep.subr.bf16.mxu1 (!%p160_p3), %v717_v2  ;;  %611 = vmatprep.subr.bf16.mxu0 (!%p160_p3), %v671_v0  ;;  %v674_v4 = vld [vmem:[%s834_s1 + $0x8] sm:$0xff] (!%p160_p3)   ;;  %v676_v6 = vld [vmem:[%s834_s1 + $0x10] sm:$0xff] (!%p160_p3)   ;;  %vm384_vm1 = vcmask (!%p160_p3), 261120   ;;  %vm480_vm2 = vcmask (!%p160_p3), 519168  }
   0x8   : > { %612 = vmatpush3.bf16.msra.mxu0 (!%p160_p3), %v672_v1  ;;  %640 = vmatprep.mubr.msk.bf16.mxu1 (!%p160_p3), %vm718_vm0, %v717_v2  ;;  %v677_v7 = vld [vmem:[%s834_s1 + $0x58] sm:$0xff] (!%p160_p3)   ;;  %v679_v9 = vld [vmem:[%s834_s1 + $0x60] sm:$0xff] (!%p160_p3)   ;;  %v681_v12 = vld [vmem:[%s834_s1 + $0x68] sm:$0xff] (!%p160_p3)  }
   0x9   : > { %613 = vmatprep.subr.bf16.mxu0 (!%p160_p3), %v673_v3  ;;  %v678_v8 = vld [vmem:[%s834_s1 + $0x18] sm:$0xff] (!%p160_p3)   ;;  %v685_v10 = vld [vmem:[%s834_s1 + $0x80] sm:$0xff] (!%p160_p3)   ;;  %v682_v13 = vld [vmem:[%s834_s1 + $0x28] sm:$0xff] (!%p160_p3)  }
   0xa   : > { %v680_v11 = vld [vmem:[%s834_s1 + $0x20] sm:$0xff] (!%p160_p3)   ;;  %637 = vmatpush3.bf16.msra.mxu1 (!%p160_p3), %v685_v10  ;;  %v691_v15 = vld [vmem:[%s834_s1 + $0x88] sm:$0xff] (!%p160_p3)   ;;  %v683_v16 = vld [vmem:[%s834_s1 + $0x70] sm:$0xff] (!%p160_p3)  }
   0xb   : > { %638 = vmatprep.subr.bf16.mxu1 (!%p160_p3), %v717_v2  ;;  %v684_v18 = vld [vmem:[%s834_s1 + $0x30] sm:$0xff] (!%p160_p3)   ;;  %v686_v19 = vld [vmem:[%s834_s1 + $0x78] sm:$0xff] (!%p160_p3)   ;;  %v581_v28 = vld [vmem:[%s835_s2] ss:$0 sm:$0xff] (!%p160_p3) }
   0xc   : > { %614 = vmatpush3.bf16.msra.mxu0 (!%p160_p3), %v674_v4  ;;  %v687_v20 = vld [vmem:[%s834_s1 + $0x38] sm:$0xff] (!%p160_p3)  }
   0xd   : > { %615 = vmatprep.subr.bf16.mxu0 (!%p160_p3), %v675_v5 }
   0xe   : > { %s842_s12 = smov (!%p193_p4, %s707_s12), 1  ;;  %639 = vmatpush3.bf16.msra.mxu1 %v691_v15 }
   0xf   : > { %s644_s5 = smul.u32 24, %s842_s12  ;;  %s608_s8 = sshll.u32 %s842_s12, 3 }
  0x10   : > { %616 = vmatpush3.bf16.msra.mxu0 %v676_v6  ;;  %s211_s11 = scalar_lea.vmem %s836_s3, %s608_s8 }
  0x11   : > { %617 = vmatprep.subr.bf16.mxu0 %v677_v7  ;;  %s201_s18 = scalar_lea.vmem %s833_s0, %s644_s5 }
  0x12   : > { %v690_v14 = vld [vmem:[%s201_s18 + $0x4] ss:$12 sps:$4 sm:$0xff]   ;;  %v692_v17 = vld [vmem:[%s201_s18 + $0x8] ss:$12 sps:$4 sm:$0xff]   ;;  %v688_v21 = vld [vmem:[%s201_s18] ss:$12 sps:$4 sm:$0xff]  }
  0x13   : > { %420 = vmatprep.mubr.bf16.mxu0 %v690_v14  ;;  %641 = vmatmul.mubr.msk.bf16.vlgmr.msra.gmra.mrb[0].mxu1 %vm384_vm1, %v692_v17 }
  0x14   : > { %618 = vmatpush3.bf16.msra.mxu0 %v678_v8 }
  0x15   : > { %619 = vmatprep.subr.bf16.mxu0 %v679_v9 }
  0x18   : > { %620 = vmatpush3.bf16.msra.mxu0 %v680_v11 }
  0x19   : > { %621 = vmatprep.subr.bf16.mxu0 %v681_v12 }
  0x1c   : > { %622 = vmatpush3.bf16.msra.mxu0 %v682_v13 }
  0x1d   : > { %623 = vmatprep.subr.bf16.mxu0 %v683_v16 }
  0x20   : > { %624 = vmatpush3.bf16.msra.mxu0 %v684_v18 }
  0x21   : > { %625 = vmatprep.subr.bf16.mxu0 %v686_v19 }
  0x24   : > { %626 = vmatpush3.bf16.msra.mxu0 %v687_v20 }
  0x27   : > { %421 = vmatmul.mubr.bf16.vlgmr.msra.gmra.mrb[0].mxu0 %v688_v21 }
  0xe6   : > { %v463_v22 = vpop.f32.mrb[0].mxu1 }
  0xe7   : > { %v642_v23 = vpop.f32.mrb[1].mxu1 }
  0xe8   : > { %v466_v24 = vpop.f32.mrb[2].mxu1 }
  0xe9   : > { %v643_v25 = vpop.f32.mrb[3].mxu1 }
  0xfa   : > { %v627_v26 = vpop.f32.mrb[0].mxu0 }
  0xfb   : > { %v628_v27 = vpop.f32.mrb[1].mxu0 }
  0xfc   : > { %v629_v29 = vadd.f32 %v628_v27, %v627_v26  ;;  %v630_v30 = vpop.f32.mrb[2].mxu0 }
  0xfd   : > { %v631_v31 = vpop.f32.mrb[3].mxu0 }
  0xfe   : > { %v423_v32 = vadd.f32 %v629_v29, %v581_v28  ;;  %v632_v33 = vadd.f32 %v631_v31, %v630_v30 }
 0x100   : > { %v464_v34 = vadd.f32 %v463_v22, %v423_v32  ;;  %v426_v35 = vadd.f32 %v632_v33, %v581_v28 }
 0x102   : > { %v470_v36 = vmax.f32 %v464_v34, 0.0  ;;  %v467_v37 = vadd.f32 %v466_v24, %v426_v35 }
 0x104   : > { %v609_v38 = vpack.c.bf16 %v470_v36, %v470_v36  ;;  %v471_v39 = vmax.f32 %v467_v37, 0.0 }
 0x106   : > { %481 = vst.msk [vmem:[%s211_s11] sm:$0xf] %vm480_vm2, %v609_v38  ;;  %v610_v40 = vpack.c.bf16 %v471_v39, %v471_v39 }
 0x108   : > { %482 = vst.msk [vmem:[%s211_s11 + $0x4] sm:$0xf] %vm480_vm2, %v610_v40 }
 0x109 PF: > { %s13_s14 = sadd.s32 1, %s715_s14   ;;  %s837_s12 = smov %s711_s13 }
 0x10a   : > { %p10_p5 = scmp.ge.s32.totalorder %s13_s14, 4   ;;  %s838_s13 = smov %s840_s15 }
 0x10c   :  { %12 = sbr.rel (!%p10_p5) target bundleno = 2 (0x2), region = 62 }

// kernel: feature_extraction_forward.40
= control target key start
LH: loop header
LB: loop body
LE: loop exit
PB: predicated region body
PF: predicated region fallthrough
CT: control target
= control target key end

     0   :  { %s566_s12 = smov 0   ;;  %s568_s13 = smov 0   ;;  %s629_s0 = inlined_call_operand.vmem [shape: bf16[2,16,128], index: 0, kind: input, shape index: {}]   ;;  %s630_s1 = inlined_call_operand.vmem [shape: bf16[128,64], index: 1, kind: input, shape index: {}]   ;;  %s631_s2 = inlined_call_operand.vmem [shape: f32[1,64], index: 2, kind: input, shape index: {}]   ;;  %s632_s3 = inlined_call_operand.vmem [shape: bf16[2,16,64], index: 3, kind: output, shape index: {}]  }
   0x1   :  { %s570_s14 = smov 0  }
   0x2 LB: > { %s25_s15 = sadd.s32 1, %s538_s13  ;;  %p433_p0 = scmp.ge.s32.totalorder %s542_s14, 1  ;;  %s542_s14 = sphi %s570_s14, %s13_s14   ;;  %s538_s13 = sphi %s568_s13, %s634_s13   ;;  %s534_s12 = sphi %s566_s12, %s633_s12  }
   0x3   : > { %p27_p1 = scmp.ge.s32.totalorder %s25_s15, 2  ;;  %p158_p2 = scmp.lt.s32.totalorder %s542_s14, 3 }
   0x5   : > { %s636_s15 = smov (%p27_p1, %s25_s15), 0  ;;  %p159_p3 = pnand %p433_p0, %p158_p2 }
   0x6   : > { %v511_v0 = vld [vmem:[%s630_s1] sm:$0xff] (!%p159_p3)   ;;  %v544_v1 = vmov (!%p159_p3), 0.0   ;;  %v512_v2 = vld [vmem:[%s630_s1 + $0x8] sm:$0xff] (!%p159_p3)   ;;  %vm545_vm0 = vmmov (!%p159_p3), 0   ;;  %p191_p4 = scmp.lt.s32.totalorder (!%p159_p3), %s534_s12, 1  ;;  %v513_v3 = vld [vmem:[%s630_s1 + $0x10] sm:$0xff] (!%p159_p3)  }
   0x7   : > { %162 = sbr.rel (%p159_p3) target bundleno = 258 (0x102), region = 32  ;;  %465 = vmatprep.subr.bf16.mxu0 (!%p159_p3), %v544_v1  ;;  %481 = vmatprep.mubr.msk.bf16.mxu0 (!%p159_p3), %vm545_vm0, %v544_v1  ;;  %v514_v4 = vld [vmem:[%s630_s1 + $0x18] sm:$0xff] (!%p159_p3)   ;;  %v515_v5 = vld [vmem:[%s630_s1 + $0x20] sm:$0xff] (!%p159_p3)   ;;  %v516_v6 = vld [vmem:[%s630_s1 + $0x28] sm:$0xff] (!%p159_p3)   ;;  %vm339_vm1 = vcmask (!%p159_p3), 519168  }
   0x8   : > { %466 = vmatpush3.bf16.msra.mxu0 (!%p159_p3), %v511_v0  ;;  %v517_v7 = vld [vmem:[%s630_s1 + $0x30] sm:$0xff] (!%p159_p3)   ;;  %v518_v8 = vld [vmem:[%s630_s1 + $0x38] sm:$0xff] (!%p159_p3)   ;;  %v438_v10 = vld [vmem:[%s631_s2] ss:$0 sm:$0xff] (!%p159_p3) }
   0x9   : > { %467 = vmatprep.subr.bf16.mxu0 (!%p159_p3), %v544_v1 }
   0xc   : > { %468 = vmatpush3.bf16.msra.mxu0 (!%p159_p3), %v512_v2 }
   0xd   : > { %469 = vmatprep.subr.bf16.mxu0 (!%p159_p3), %v544_v1 }
   0xe   : > { %s638_s12 = smov (!%p191_p4, %s534_s12), 1 }
   0xf   : > { %s452_s22 = sshll.u32 %s638_s12, 3 }
  0x10   : > { %s198_s25 = scalar_lea.vmem %s629_s0, %s452_s22  ;;  %470 = vmatpush3.bf16.msra.mxu0 %v513_v3  ;;  %s208_s16 = scalar_lea.vmem %s632_s3, %s452_s22 }
  0x11   : > { %471 = vmatprep.subr.bf16.mxu0 %v544_v1  ;;  %v519_v9 = vld [vmem:[%s198_s25] sm:$0xff]  }
  0x14   : > { %472 = vmatpush3.bf16.msra.mxu0 %v514_v4 }
  0x15   : > { %473 = vmatprep.subr.bf16.mxu0 %v544_v1 }
  0x18   : > { %474 = vmatpush3.bf16.msra.mxu0 %v515_v5 }
  0x19   : > { %475 = vmatprep.subr.bf16.mxu0 %v544_v1 }
  0x1c   : > { %476 = vmatpush3.bf16.msra.mxu0 %v516_v6 }
  0x1d   : > { %477 = vmatprep.subr.bf16.mxu0 %v544_v1 }
  0x20   : > { %478 = vmatpush3.bf16.msra.mxu0 %v517_v7 }
  0x21   : > { %479 = vmatprep.subr.bf16.mxu0 %v544_v1 }
  0x24   : > { %480 = vmatpush3.bf16.msra.mxu0 %v518_v8 }
  0x27   : > { %482 = vmatmul.mubr.bf16.vlgmr.msra.gmra.mrb[0].mxu0 %v519_v9 }
  0xfa   : > { %v324_v11 = vpop.f32.mrb[0].mxu0 }
  0xfb   : > { %v325_v12 = vadd.f32 %v438_v10, %v324_v11  ;;  %v483_v13 = vpop.f32.mrb[1].mxu0 }
  0xfc   : > { %v327_v14 = vpop.f32.mrb[2].mxu0 }
  0xfd   : > { %v454_v15 = vpack.c.bf16 %v325_v12, %v325_v12  ;;  %v328_v16 = vadd.f32 %v438_v10, %v327_v14  ;;  %v484_v17 = vpop.f32.mrb[3].mxu0 }
  0xff   : > { %340 = vst.msk [vmem:[%s208_s16] sm:$0xf] %vm339_vm1, %v454_v15  ;;  %v455_v18 = vpack.c.bf16 %v328_v16, %v328_v16 }
 0x101   : > { %341 = vst.msk [vmem:[%s208_s16 + $0x4] sm:$0xf] %vm339_vm1, %v455_v18 }
 0x102 PF: > { %s13_s14 = sadd.s32 1, %s542_s14   ;;  %s633_s12 = smov %s538_s13 }
 0x103   : > { %p10_p5 = scmp.ge.s32.totalorder %s13_s14, 4   ;;  %s634_s13 = smov %s636_s15 }
 0x105   :  { %12 = sbr.rel (!%p10_p5) target bundleno = 2 (0x2), region = 62 }

// kernel: feature_extraction_forward.41
= control target key start
LH: loop header
LB: loop body
LE: loop exit
PB: predicated region body
PF: predicated region fallthrough
CT: control target
= control target key end

     0   :  { %s1102_s15 = smov 0   ;;  %s1104_s16 = smov 0   ;;  %s1264_s0 = inlined_call_operand.vmem [shape: bf16[2,16,576], index: 0, kind: input, shape index: {}]   ;;  %s1265_s1 = inlined_call_operand.vmem [shape: bf16[576,64], index: 1, kind: input, shape index: {}]   ;;  %s1266_s2 = inlined_call_operand.vmem [shape: f32[1,64], index: 2, kind: input, shape index: {}]   ;;  %s1267_s3 = inlined_call_operand.vmem [shape: bf16[2,16,64], index: 3, kind: input, shape index: {}]   ;;  %s1268_s4 = inlined_call_operand.vmem [shape: bf16[2,16,64], index: 4, kind: output, shape index: {}]  }
   0x1   :  { %s1106_s17 = smov 0  }
   0x2 LB: > { %s26_s18 = sadd.s32 1, %s1069_s16  ;;  %p859_p0 = scmp.ge.s32.totalorder %s1073_s17, 1  ;;  %s1073_s17 = sphi %s1106_s17, %s14_s17   ;;  %s1069_s16 = sphi %s1104_s16, %s1270_s16   ;;  %s1065_s15 = sphi %s1102_s15, %s1269_s15  }
   0x3   : > { %p28_p1 = scmp.ge.s32.totalorder %s26_s18, 2  ;;  %p201_p2 = scmp.lt.s32.totalorder %s1073_s17, 3 }
   0x5   : > { %s1272_s18 = smov (%p28_p1, %s26_s18), 0  ;;  %p202_p3 = pnand %p859_p0, %p201_p2 }
   0x6   : > { %v1008_v0 = vld [vmem:[%s1265_s1 + $0x40] sm:$0xff] (!%p202_p3)   ;;  %v1012_v4 = vld [vmem:[%s1265_s1 + $0x48] sm:$0xff] (!%p202_p3)   ;;  %v1016_v8 = vld [vmem:[%s1265_s1 + $0x50] sm:$0xff] (!%p202_p3)   ;;  %p246_p4 = scmp.lt.s32.totalorder (!%p202_p3), %s1065_s15, 1  ;;  %v1075_v33 = vmov (!%p202_p3), 0.0   ;;  %vm1076_vm0 = vmmov (!%p202_p3), 0  }
   0x7   : > { %205 = sbr.rel (%p202_p3) target bundleno = 276 (0x114), region = 36  ;;  %v1009_v1 = vld [vmem:[%s1265_s1] sm:$0xff] (!%p202_p3)   ;;  %920 = vmatprep.subr.bf16.mxu0 (!%p202_p3), %v1008_v0  ;;  %v1013_v5 = vld [vmem:[%s1265_s1 + $0x8] sm:$0xff] (!%p202_p3)   ;;  %v1017_v9 = vld [vmem:[%s1265_s1 + $0x10] sm:$0xff] (!%p202_p3)   ;;  %vm603_vm1 = vcmask (!%p202_p3), 523264   ;;  %vm744_vm2 = vcmask (!%p202_p3), 519168  }
   0x8   : > { %v1010_v2 = vld [vmem:[%s1265_s1 + $0xc0] sm:$0xff] (!%p202_p3)   ;;  %921 = vmatpush3.bf16.msra.mxu0 (!%p202_p3), %v1009_v1  ;;  %v1014_v6 = vld [vmem:[%s1265_s1 + $0xc8] sm:$0xff] (!%p202_p3)   ;;  %v1018_v10 = vld [vmem:[%s1265_s1 + $0xd0] sm:$0xff] (!%p202_p3)  }
   0x9   : > { %v1011_v3 = vld [vmem:[%s1265_s1 + $0x80] sm:$0xff] (!%p202_p3)   ;;  %942 = vmatprep.subr.bf16.mxu1 (!%p202_p3), %v1010_v2  ;;  %922 = vmatprep.subr.bf16.mxu0 (!%p202_p3), %v1012_v4  ;;  %v1015_v7 = vld [vmem:[%s1265_s1 + $0x88] sm:$0xff] (!%p202_p3)   ;;  %v1019_v11 = vld [vmem:[%s1265_s1 + $0x90] sm:$0xff] (!%p202_p3)  }
   0xa   : > { %943 = vmatpush3.bf16.msra.mxu1 (!%p202_p3), %v1011_v3  ;;  %v1020_v12 = vld [vmem:[%s1265_s1 + $0x58] sm:$0xff] (!%p202_p3)   ;;  %v1024_v16 = vld [vmem:[%s1265_s1 + $0x60] sm:$0xff] (!%p202_p3)   ;;  %v1028_v20 = vld [vmem:[%s1265_s1 + $0x68] sm:$0xff] (!%p202_p3)  }
   0xb   : > { %944 = vmatprep.subr.bf16.mxu1 (!%p202_p3), %v1014_v6  ;;  %v1021_v13 = vld [vmem:[%s1265_s1 + $0x18] sm:$0xff] (!%p202_p3)   ;;  %v1025_v17 = vld [vmem:[%s1265_s1 + $0x20] sm:$0xff] (!%p202_p3)   ;;  %v1029_v21 = vld [vmem:[%s1265_s1 + $0x28] sm:$0xff] (!%p202_p3)  }
   0xc   : > { %923 = vmatpush3.bf16.msra.mxu0 (!%p202_p3), %v1013_v5  ;;  %v1022_v14 = vld [vmem:[%s1265_s1 + $0xd8] sm:$0xff] (!%p202_p3)   ;;  %v1026_v18 = vld [vmem:[%s1265_s1 + $0xe0] sm:$0xff] (!%p202_p3)   ;;  %v1030_v22 = vld [vmem:[%s1265_s1 + $0xe8] sm:$0xff] (!%p202_p3)  }
   0xd   : > { %924 = vmatprep.subr.bf16.mxu0 (!%p202_p3), %v1016_v8  ;;  %v1023_v15 = vld [vmem:[%s1265_s1 + $0x98] sm:$0xff] (!%p202_p3)   ;;  %v1027_v19 = vld [vmem:[%s1265_s1 + $0xa0] sm:$0xff] (!%p202_p3)   ;;  %v1031_v23 = vld [vmem:[%s1265_s1 + $0xa8] sm:$0xff] (!%p202_p3)  }
   0xe   : > { %945 = vmatpush3.bf16.msra.mxu1 %v1015_v7  ;;  %s1274_s15 = smov (!%p246_p4, %s1065_s15), 1  ;;  %v1032_v24 = vld [vmem:[%s1265_s1 + $0x70] sm:$0xff]   ;;  %v1036_v28 = vld [vmem:[%s1265_s1 + $0x78] sm:$0xff]   ;;  %v1046_v37 = vld [vmem:[%s1265_s1 + $0x100] sm:$0xff]  }
   0xf   : > { %946 = vmatprep.subr.bf16.mxu1 %v1018_v10  ;;  %s981_s25 = smul.u32 40, %s1274_s15  ;;  %v1033_v25 = vld [vmem:[%s1265_s1 + $0x30] sm:$0xff]   ;;  %v1037_v29 = vld [vmem:[%s1265_s1 + $0x38] sm:$0xff]   ;;  %v1047_v38 = vld [vmem:[%s1265_s1 + $0x108] sm:$0xff]   ;;  %s912_s5 = sshll.u32 %s1274_s15, 3 }
  0x10   : > { %925 = vmatpush3.bf16.msra.mxu0 %v1017_v9  ;;  %v1034_v26 = vld [vmem:[%s1265_s1 + $0xf0] sm:$0xff]   ;;  %v1038_v30 = vld [vmem:[%s1265_s1 + $0xf8] sm:$0xff]   ;;  %v865_v43 = vld [vmem:[%s1266_s2] ss:$0 sm:$0xff]  ;;  %s264_s8 = scalar_lea.vmem %s1267_s3, %s912_s5  ;;  %s274_s15 = scalar_lea.vmem %s1268_s4, %s912_s5 }
  0x11   : > { %926 = vmatprep.subr.bf16.mxu0 %v1020_v12  ;;  %v1035_v27 = vld [vmem:[%s1265_s1 + $0xb0] sm:$0xff]   ;;  %s1217_s10 = scalar_lea.vmem %s1264_s0, %s981_s25  ;;  %v1042_v34 = vld [vmem:[%s1265_s1 + $0xb8] sm:$0xff]   ;;  %v917_v59 = vld [vmem:[%s264_s8] sm:$0xff]  }
  0x12   : > { %947 = vmatpush3.bf16.msra.mxu1 %v1019_v11  ;;  %v1039_v31 = vld [vmem:[%s1217_s10] ss:$20 sps:$4 sm:$0xff]   ;;  %v1041_v32 = vld [vmem:[%s1217_s10 + $0x4] ss:$20 sps:$4 sm:$0xff]   ;;  %v1043_v35 = vld [vmem:[%s1217_s10 + $0x8] ss:$20 sps:$4 sm:$0xff]   ;;  %v918_v60 = vunpack.c.l.bf16 %v917_v59  ;;  %v919_v0 = vunpack.c.h.bf16 %v917_v59 }
  0x13   : > { %948 = vmatprep.subr.bf16.mxu1 %v1022_v14  ;;  %639 = vmatprep.mubr.bf16.mxu0 %v1041_v32  ;;  %v1045_v36 = vld [vmem:[%s1217_s10 + $0xc] ss:$20 sps:$4 sm:$0xff]   ;;  %v1048_v39 = vld [vmem:[%s1265_s1 + $0x110] sm:$0xff]   ;;  %v1049_v40 = vld [vmem:[%s1265_s1 + $0x118] sm:$0xff]  }
  0x14   : > { %927 = vmatpush3.bf16.msra.mxu0 %v1021_v13  ;;  %680 = vmatprep.mubr.bf16.mxu1 %v1045_v36  ;;  %v1050_v41 = vld [vmem:[%s1217_s10 + $0x10] ss:$20 sps:$4 sm:$0xff]  }
  0x15   : > { %928 = vmatprep.subr.bf16.mxu0 %v1024_v16 }
  0x16   : > { %949 = vmatpush3.bf16.msra.mxu1 %v1023_v15 }
  0x17   : > { %950 = vmatprep.subr.bf16.mxu1 %v1026_v18 }
  0x18   : > { %929 = vmatpush3.bf16.msra.mxu0 %v1025_v17 }
  0x19   : > { %930 = vmatprep.subr.bf16.mxu0 %v1028_v20 }
  0x1a   : > { %951 = vmatpush3.bf16.msra.mxu1 %v1027_v19 }
  0x1b   : > { %952 = vmatprep.subr.bf16.mxu1 %v1030_v22 }
  0x1c   : > { %931 = vmatpush3.bf16.msra.mxu0 %v1029_v21 }
  0x1d   : > { %932 = vmatprep.subr.bf16.mxu0 %v1032_v24 }
  0x1e   : > { %953 = vmatpush3.bf16.msra.mxu1 %v1031_v23 }
  0x1f   : > { %954 = vmatprep.subr.bf16.mxu1 %v1034_v26 }
  0x20   : > { %933 = vmatpush3.bf16.msra.mxu0 %v1033_v25 }
  0x21   : > { %934 = vmatprep.subr.bf16.mxu0 %v1036_v28 }
  0x22   : > { %955 = vmatpush3.bf16.msra.mxu1 %v1035_v27 }
  0x23   : > { %956 = vmatprep.subr.bf16.mxu1 %v1038_v30 }
  0x24   : > { %935 = vmatpush3.bf16.msra.mxu0 %v1037_v29 }
  0x25   : > { %969 = vmatprep.subr.bf16.mxu0 %v1075_v33 }
  0x26   : > { %957 = vmatpush3.bf16.msra.mxu1 %v1042_v34 }
  0x27   : > { %640 = vmatmul.mubr.bf16.vlgmr.msra.gmra.mrb[0].mxu0 %v1039_v31 }
  0x28   : > { %977 = vmatprep.mubr.msk.bf16.mxu0 %vm1076_vm0, %v1075_v33  ;;  %970 = vmatpush3.bf16.msra.mxu0 %v1046_v37 }
  0x29   : > { %681 = vmatmul.mubr.bf16.vlgmr.msra.gmra.mrb[0].mxu1 %v1043_v35  ;;  %971 = vmatprep.subr.bf16.mxu0 %v1075_v33 }
  0x2c   : > { %972 = vmatpush3.bf16.msra.mxu0 %v1047_v38 }
  0x2d   : > { %973 = vmatprep.subr.bf16.mxu0 %v1075_v33 }
  0x30   : > { %974 = vmatpush3.bf16.msra.mxu0 %v1048_v39 }
  0x31   : > { %975 = vmatprep.subr.bf16.mxu0 %v1075_v33 }
  0x34   : > { %976 = vmatpush3.bf16.msra.mxu0 %v1049_v40 }
  0x37   : > { %978 = vmatmul.mubr.msk.bf16.vlgmr.msra.gmra.mrb[4].mxu0 %vm603_vm1, %v1050_v41 }
  0xfa   : > { %v936_v42 = vpop.f32.mrb[0].mxu0 }
  0xfb   : > { %v937_v44 = vpop.f32.mrb[1].mxu0 }
  0xfc   : > { %v938_v45 = vadd.f32 %v937_v44, %v936_v42  ;;  %v939_v46 = vpop.f32.mrb[2].mxu0  ;;  %v958_v47 = vpop.f32.mrb[0].mxu1 }
  0xfd   : > { %v940_v48 = vpop.f32.mrb[3].mxu0  ;;  %v959_v51 = vpop.f32.mrb[1].mxu1 }
  0xfe   : > { %v642_v49 = vadd.f32 %v938_v45, %v865_v43  ;;  %v941_v50 = vadd.f32 %v940_v48, %v939_v46  ;;  %v960_v52 = vadd.f32 %v959_v51, %v958_v47  ;;  %v961_v53 = vpop.f32.mrb[2].mxu1 }
  0xff   : > { %v962_v55 = vpop.f32.mrb[3].mxu1 }
 0x100   : > { %v645_v54 = vadd.f32 %v941_v50, %v865_v43  ;;  %v963_v56 = vadd.f32 %v962_v55, %v961_v53  ;;  %v683_v57 = vadd.f32 %v960_v52, %v642_v49 }
 0x102   : > { %v686_v58 = vadd.f32 %v963_v56, %v645_v54 }
 0x10a   : > { %v723_v61 = vpop.f32.mrb[4].mxu0 }
 0x10b   : > { %v724_v62 = vadd.f32 %v723_v61, %v683_v57  ;;  %v979_v63 = vpop.f32.mrb[5].mxu0 }
 0x10c   : > { %v726_v1 = vpop.f32.mrb[6].mxu0 }
 0x10d   : > { %v734_v2 = vadd.f32 %v918_v60, %v724_v62  ;;  %v727_v3 = vadd.f32 %v726_v1, %v686_v58  ;;  %v980_v4 = vpop.f32.mrb[7].mxu0 }
 0x10f   : > { %v914_v5 = vpack.c.bf16 %v734_v2, %v734_v2  ;;  %v735_v6 = vadd.f32 %v919_v0, %v727_v3 }
 0x111   : > { %745 = vst.msk [vmem:[%s274_s15] sm:$0xf] %vm744_vm2, %v914_v5  ;;  %v915_v7 = vpack.c.bf16 %v735_v6, %v735_v6 }
 0x113   : > { %746 = vst.msk [vmem:[%s274_s15 + $0x4] sm:$0xf] %vm744_vm2, %v915_v7 }
 0x114 PF: > { %s14_s17 = sadd.s32 1, %s1073_s17   ;;  %s1269_s15 = smov %s1069_s16 }
 0x115   : > { %p11_p5 = scmp.ge.s32.totalorder %s14_s17, 4   ;;  %s1270_s16 = smov %s1272_s18 }
 0x117   :  { %13 = sbr.rel (!%p11_p5) target bundleno = 2 (0x2), region = 69 }

// kernel: feature_extraction_forward.42
= control target key start
LH: loop header
LB: loop body
LE: loop exit
PB: predicated region body
PF: predicated region fallthrough
CT: control target
= control target key end

     0   :  { %s1005_s12 = smov 0   ;;  %s1007_s13 = smov 0   ;;  %s1164_s0 = inlined_call_operand.vmem [shape: bf16[2,16,576], index: 0, kind: input, shape index: {}]   ;;  %s1165_s1 = inlined_call_operand.vmem [shape: bf16[576,64], index: 1, kind: input, shape index: {}]   ;;  %s1166_s2 = inlined_call_operand.vmem [shape: f32[1,64], index: 2, kind: input, shape index: {}]   ;;  %s1167_s3 = inlined_call_operand.vmem [shape: bf16[2,16,64], index: 3, kind: output, shape index: {}]  }
   0x1   :  { %s1009_s14 = smov 0  }
   0x2 LB: > { %s25_s15 = sadd.s32 1, %s977_s13  ;;  %p774_p0 = scmp.ge.s32.totalorder %s981_s14, 1  ;;  %s981_s14 = sphi %s1009_s14, %s13_s14   ;;  %s977_s13 = sphi %s1007_s13, %s1169_s13   ;;  %s973_s12 = sphi %s1005_s12, %s1168_s12  }
   0x3   : > { %p27_p1 = scmp.ge.s32.totalorder %s25_s15, 2  ;;  %p159_p2 = scmp.lt.s32.totalorder %s981_s14, 3 }
   0x5   : > { %s1171_s15 = smov (%p27_p1, %s25_s15), 0  ;;  %p160_p3 = pnand %p774_p0, %p159_p2 }
   0x6   : > { %v916_v0 = vld [vmem:[%s1165_s1 + $0x40] sm:$0xff] (!%p160_p3)   ;;  %v920_v4 = vld [vmem:[%s1165_s1 + $0x48] sm:$0xff] (!%p160_p3)   ;;  %v924_v8 = vld [vmem:[%s1165_s1 + $0x50] sm:$0xff] (!%p160_p3)   ;;  %p193_p4 = scmp.lt.s32.totalorder (!%p160_p3), %s973_s12, 1  ;;  %v983_v33 = vmov (!%p160_p3), 0.0   ;;  %vm984_vm0 = vmmov (!%p160_p3), 0  }
   0x7   : > { %163 = sbr.rel (%p160_p3) target bundleno = 276 (0x114), region = 32  ;;  %v917_v1 = vld [vmem:[%s1165_s1] sm:$0xff] (!%p160_p3)   ;;  %828 = vmatprep.subr.bf16.mxu0 (!%p160_p3), %v916_v0  ;;  %v921_v5 = vld [vmem:[%s1165_s1 + $0x8] sm:$0xff] (!%p160_p3)   ;;  %v925_v9 = vld [vmem:[%s1165_s1 + $0x10] sm:$0xff] (!%p160_p3)   ;;  %vm540_vm1 = vcmask (!%p160_p3), 523264   ;;  %vm677_vm2 = vcmask (!%p160_p3), 519168  }
   0x8   : > { %v918_v2 = vld [vmem:[%s1165_s1 + $0xc0] sm:$0xff] (!%p160_p3)   ;;  %829 = vmatpush3.bf16.msra.mxu0 (!%p160_p3), %v917_v1  ;;  %v922_v6 = vld [vmem:[%s1165_s1 + $0xc8] sm:$0xff] (!%p160_p3)   ;;  %v926_v10 = vld [vmem:[%s1165_s1 + $0xd0] sm:$0xff] (!%p160_p3)  }
   0x9   : > { %v919_v3 = vld [vmem:[%s1165_s1 + $0x80] sm:$0xff] (!%p160_p3)   ;;  %850 = vmatprep.subr.bf16.mxu1 (!%p160_p3), %v918_v2  ;;  %830 = vmatprep.subr.bf16.mxu0 (!%p160_p3), %v920_v4  ;;  %v923_v7 = vld [vmem:[%s1165_s1 + $0x88] sm:$0xff] (!%p160_p3)   ;;  %v927_v11 = vld [vmem:[%s1165_s1 + $0x90] sm:$0xff] (!%p160_p3)  }
   0xa   : > { %851 = vmatpush3.bf16.msra.mxu1 (!%p160_p3), %v919_v3  ;;  %v928_v12 = vld [vmem:[%s1165_s1 + $0x58] sm:$0xff] (!%p160_p3)   ;;  %v932_v16 = vld [vmem:[%s1165_s1 + $0x60] sm:$0xff] (!%p160_p3)   ;;  %v936_v20 = vld [vmem:[%s1165_s1 + $0x68] sm:$0xff] (!%p160_p3)  }
   0xb   : > { %852 = vmatprep.subr.bf16.mxu1 (!%p160_p3), %v922_v6  ;;  %v929_v13 = vld [vmem:[%s1165_s1 + $0x18] sm:$0xff] (!%p160_p3)   ;;  %v933_v17 = vld [vmem:[%s1165_s1 + $0x20] sm:$0xff] (!%p160_p3)   ;;  %v937_v21 = vld [vmem:[%s1165_s1 + $0x28] sm:$0xff] (!%p160_p3)  }
   0xc   : > { %831 = vmatpush3.bf16.msra.mxu0 (!%p160_p3), %v921_v5  ;;  %v930_v14 = vld [vmem:[%s1165_s1 + $0xd8] sm:$0xff] (!%p160_p3)   ;;  %v934_v18 = vld [vmem:[%s1165_s1 + $0xe0] sm:$0xff] (!%p160_p3)   ;;  %v938_v22 = vld [vmem:[%s1165_s1 + $0xe8] sm:$0xff] (!%p160_p3)  }
   0xd   : > { %832 = vmatprep.subr.bf16.mxu0 (!%p160_p3), %v924_v8  ;;  %v931_v15 = vld [vmem:[%s1165_s1 + $0x98] sm:$0xff] (!%p160_p3)   ;;  %v935_v19 = vld [vmem:[%s1165_s1 + $0xa0] sm:$0xff] (!%p160_p3)   ;;  %v939_v23 = vld [vmem:[%s1165_s1 + $0xa8] sm:$0xff] (!%p160_p3)  }
   0xe   : > { %853 = vmatpush3.bf16.msra.mxu1 %v923_v7  ;;  %s1173_s12 = smov (!%p193_p4, %s973_s12), 1  ;;  %v940_v24 = vld [vmem:[%s1165_s1 + $0x70] sm:$0xff]   ;;  %v944_v28 = vld [vmem:[%s1165_s1 + $0x78] sm:$0xff]   ;;  %v954_v37 = vld [vmem:[%s1165_s1 + $0x100] sm:$0xff]  }
   0xf   : > { %854 = vmatprep.subr.bf16.mxu1 %v926_v10  ;;  %s889_s20 = smul.u32 40, %s1173_s12  ;;  %v941_v25 = vld [vmem:[%s1165_s1 + $0x30] sm:$0xff]   ;;  %v945_v29 = vld [vmem:[%s1165_s1 + $0x38] sm:$0xff]   ;;  %v955_v38 = vld [vmem:[%s1165_s1 + $0x108] sm:$0xff]   ;;  %s825_s25 = sshll.u32 %s1173_s12, 3 }
  0x10   : > { %833 = vmatpush3.bf16.msra.mxu0 %v925_v9  ;;  %v942_v26 = vld [vmem:[%s1165_s1 + $0xf0] sm:$0xff]   ;;  %v946_v30 = vld [vmem:[%s1165_s1 + $0xf8] sm:$0xff]   ;;  %v778_v43 = vld [vmem:[%s1166_s2] ss:$0 sm:$0xff]  ;;  %s211_s28 = scalar_lea.vmem %s1167_s3, %s825_s25 }
  0x11   : > { %834 = vmatprep.subr.bf16.mxu0 %v928_v12  ;;  %v943_v27 = vld [vmem:[%s1165_s1 + $0xb0] sm:$0xff]   ;;  %s1120_s4 = scalar_lea.vmem %s1164_s0, %s889_s20  ;;  %v950_v34 = vld [vmem:[%s1165_s1 + $0xb8] sm:$0xff]  }
  0x12   : > { %855 = vmatpush3.bf16.msra.mxu1 %v927_v11  ;;  %v947_v31 = vld [vmem:[%s1120_s4] ss:$20 sps:$4 sm:$0xff]   ;;  %v949_v32 = vld [vmem:[%s1120_s4 + $0x4] ss:$20 sps:$4 sm:$0xff]   ;;  %v951_v35 = vld [vmem:[%s1120_s4 + $0x8] ss:$20 sps:$4 sm:$0xff]  }
  0x13   : > { %856 = vmatprep.subr.bf16.mxu1 %v930_v14  ;;  %576 = vmatprep.mubr.bf16.mxu0 %v949_v32  ;;  %v953_v36 = vld [vmem:[%s1120_s4 + $0xc] ss:$20 sps:$4 sm:$0xff]   ;;  %v956_v39 = vld [vmem:[%s1165_s1 + $0x110] sm:$0xff]   ;;  %v957_v40 = vld [vmem:[%s1165_s1 + $0x118] sm:$0xff]  }
  0x14   : > { %835 = vmatpush3.bf16.msra.mxu0 %v929_v13  ;;  %617 = vmatprep.mubr.bf16.mxu1 %v953_v36  ;;  %v958_v41 = vld [vmem:[%s1120_s4 + $0x10] ss:$20 sps:$4 sm:$0xff]  }
  0x15   : > { %836 = vmatprep.subr.bf16.mxu0 %v932_v16 }
  0x16   : > { %857 = vmatpush3.bf16.msra.mxu1 %v931_v15 }
  0x17   : > { %858 = vmatprep.subr.bf16.mxu1 %v934_v18 }
  0x18   : > { %837 = vmatpush3.bf16.msra.mxu0 %v933_v17 }
  0x19   : > { %838 = vmatprep.subr.bf16.mxu0 %v936_v20 }
  0x1a   : > { %859 = vmatpush3.bf16.msra.mxu1 %v935_v19 }
  0x1b   : > { %860 = vmatprep.subr.bf16.mxu1 %v938_v22 }
  0x1c   : > { %839 = vmatpush3.bf16.msra.mxu0 %v937_v21 }
  0x1d   : > { %840 = vmatprep.subr.bf16.mxu0 %v940_v24 }
  0x1e   : > { %861 = vmatpush3.bf16.msra.mxu1 %v939_v23 }
  0x1f   : > { %862 = vmatprep.subr.bf16.mxu1 %v942_v26 }
  0x20   : > { %841 = vmatpush3.bf16.msra.mxu0 %v941_v25 }
  0x21   : > { %842 = vmatprep.subr.bf16.mxu0 %v944_v28 }
  0x22   : > { %863 = vmatpush3.bf16.msra.mxu1 %v943_v27 }
  0x23   : > { %864 = vmatprep.subr.bf16.mxu1 %v946_v30 }
  0x24   : > { %843 = vmatpush3.bf16.msra.mxu0 %v945_v29 }
  0x25   : > { %877 = vmatprep.subr.bf16.mxu0 %v983_v33 }
  0x26   : > { %865 = vmatpush3.bf16.msra.mxu1 %v950_v34 }
  0x27   : > { %577 = vmatmul.mubr.bf16.vlgmr.msra.gmra.mrb[0].mxu0 %v947_v31 }
  0x28   : > { %885 = vmatprep.mubr.msk.bf16.mxu0 %vm984_vm0, %v983_v33  ;;  %878 = vmatpush3.bf16.msra.mxu0 %v954_v37 }
  0x29   : > { %618 = vmatmul.mubr.bf16.vlgmr.msra.gmra.mrb[0].mxu1 %v951_v35  ;;  %879 = vmatprep.subr.bf16.mxu0 %v983_v33 }
  0x2c   : > { %880 = vmatpush3.bf16.msra.mxu0 %v955_v38 }
  0x2d   : > { %881 = vmatprep.subr.bf16.mxu0 %v983_v33 }
  0x30   : > { %882 = vmatpush3.bf16.msra.mxu0 %v956_v39 }
  0x31   : > { %883 = vmatprep.subr.bf16.mxu0 %v983_v33 }
  0x34   : > { %884 = vmatpush3.bf16.msra.mxu0 %v957_v40 }
  0x37   : > { %886 = vmatmul.mubr.msk.bf16.vlgmr.msra.gmra.mrb[4].mxu0 %vm540_vm1, %v958_v41 }
  0xfa   : > { %v844_v42 = vpop.f32.mrb[0].mxu0 }
  0xfb   : > { %v845_v44 = vpop.f32.mrb[1].mxu0 }
  0xfc   : > { %v846_v45 = vadd.f32 %v845_v44, %v844_v42  ;;  %v847_v46 = vpop.f32.mrb[2].mxu0  ;;  %v866_v47 = vpop.f32.mrb[0].mxu1 }
  0xfd   : > { %v848_v48 = vpop.f32.mrb[3].mxu0  ;;  %v867_v51 = vpop.f32.mrb[1].mxu1 }
  0xfe   : > { %v579_v49 = vadd.f32 %v846_v45, %v778_v43  ;;  %v849_v50 = vadd.f32 %v848_v48, %v847_v46  ;;  %v868_v52 = vadd.f32 %v867_v51, %v866_v47  ;;  %v869_v53 = vpop.f32.mrb[2].mxu1 }
  0xff   : > { %v870_v55 = vpop.f32.mrb[3].mxu1 }
 0x100   : > { %v582_v54 = vadd.f32 %v849_v50, %v778_v43  ;;  %v871_v56 = vadd.f32 %v870_v55, %v869_v53  ;;  %v620_v57 = vadd.f32 %v868_v52, %v579_v49 }
 0x102   : > { %v623_v58 = vadd.f32 %v871_v56, %v582_v54 }
 0x10a   : > { %v660_v59 = vpop.f32.mrb[4].mxu0 }
 0x10b   : > { %v661_v60 = vadd.f32 %v660_v59, %v620_v57  ;;  %v887_v61 = vpop.f32.mrb[5].mxu0 }
 0x10c   : > { %v663_v62 = vpop.f32.mrb[6].mxu0 }
 0x10d   : > { %v667_v63 = vmax.f32 %v661_v60, 0.0  ;;  %v664_v0 = vadd.f32 %v663_v62, %v623_v58  ;;  %v888_v1 = vpop.f32.mrb[7].mxu0 }
 0x10f   : > { %v826_v2 = vpack.c.bf16 %v667_v63, %v667_v63  ;;  %v668_v3 = vmax.f32 %v664_v0, 0.0 }
 0x111   : > { %678 = vst.msk [vmem:[%s211_s28] sm:$0xf] %vm677_vm2, %v826_v2  ;;  %v827_v4 = vpack.c.bf16 %v668_v3, %v668_v3 }
 0x113   : > { %679 = vst.msk [vmem:[%s211_s28 + $0x4] sm:$0xf] %vm677_vm2, %v827_v4 }
 0x114 PF: > { %s13_s14 = sadd.s32 1, %s981_s14   ;;  %s1168_s12 = smov %s977_s13 }
 0x115   : > { %p10_p5 = scmp.ge.s32.totalorder %s13_s14, 4   ;;  %s1169_s13 = smov %s1171_s15 }
 0x117   :  { %12 = sbr.rel (!%p10_p5) target bundleno = 2 (0x2), region = 62 }

// kernel: feature_extraction_forward.56
= control target key start
LH: loop header
LB: loop body
LE: loop exit
PB: predicated region body
PF: predicated region fallthrough
CT: control target
= control target key end

     0   :  { %s1009_s12 = smov 0   ;;  %s1011_s13 = smov 0   ;;  %s1168_s0 = inlined_call_operand.vmem [shape: bf16[2,16,576], index: 0, kind: input, shape index: {}]   ;;  %s1169_s1 = inlined_call_operand.vmem [shape: bf16[576,128], index: 1, kind: input, shape index: {}]   ;;  %s1170_s2 = inlined_call_operand.vmem [shape: f32[1,128], index: 2, kind: input, shape index: {}]   ;;  %s1171_s3 = inlined_call_operand.vmem [shape: bf16[2,16,128], index: 3, kind: output, shape index: {}]  }
   0x1   :  { %s1013_s14 = smov 0  }
   0x2 LB: > { %s25_s15 = sadd.s32 1, %s981_s13  ;;  %p773_p0 = scmp.ge.s32.totalorder %s985_s14, 1  ;;  %s985_s14 = sphi %s1013_s14, %s13_s14   ;;  %s981_s13 = sphi %s1011_s13, %s1173_s13   ;;  %s977_s12 = sphi %s1009_s12, %s1172_s12  }
   0x3   : > { %p27_p1 = scmp.ge.s32.totalorder %s25_s15, 2  ;;  %p159_p2 = scmp.lt.s32.totalorder %s985_s14, 3 }
   0x5   : > { %s1175_s15 = smov (%p27_p1, %s25_s15), 0  ;;  %p160_p3 = pnand %p773_p0, %p159_p2 }
   0x6   : > { %v920_v0 = vld [vmem:[%s1169_s1 + $0x40] sm:$0xff] (!%p160_p3)   ;;  %v924_v4 = vld [vmem:[%s1169_s1 + $0x48] sm:$0xff] (!%p160_p3)   ;;  %v928_v8 = vld [vmem:[%s1169_s1 + $0x50] sm:$0xff] (!%p160_p3)   ;;  %p193_p4 = scmp.lt.s32.totalorder (!%p160_p3), %s977_s12, 1  ;;  %v987_v33 = vmov (!%p160_p3), 0.0   ;;  %vm988_vm0 = vmmov (!%p160_p3), 0  }
   0x7   : > { %163 = sbr.rel (%p160_p3) target bundleno = 276 (0x114), region = 32  ;;  %v921_v1 = vld [vmem:[%s1169_s1] sm:$0xff] (!%p160_p3)   ;;  %832 = vmatprep.subr.bf16.mxu0 (!%p160_p3), %v920_v0  ;;  %v925_v5 = vld [vmem:[%s1169_s1 + $0x8] sm:$0xff] (!%p160_p3)   ;;  %v929_v9 = vld [vmem:[%s1169_s1 + $0x10] sm:$0xff] (!%p160_p3)   ;;  %vm540_vm1 = vcmask (!%p160_p3), 523264  }
   0x8   : > { %v922_v2 = vld [vmem:[%s1169_s1 + $0xc0] sm:$0xff] (!%p160_p3)   ;;  %833 = vmatpush3.bf16.msra.mxu0 (!%p160_p3), %v921_v1  ;;  %v926_v6 = vld [vmem:[%s1169_s1 + $0xc8] sm:$0xff] (!%p160_p3)   ;;  %v930_v10 = vld [vmem:[%s1169_s1 + $0xd0] sm:$0xff] (!%p160_p3)  }
   0x9   : > { %v923_v3 = vld [vmem:[%s1169_s1 + $0x80] sm:$0xff] (!%p160_p3)   ;;  %854 = vmatprep.subr.bf16.mxu1 (!%p160_p3), %v922_v2  ;;  %834 = vmatprep.subr.bf16.mxu0 (!%p160_p3), %v924_v4  ;;  %v927_v7 = vld [vmem:[%s1169_s1 + $0x88] sm:$0xff] (!%p160_p3)   ;;  %v931_v11 = vld [vmem:[%s1169_s1 + $0x90] sm:$0xff] (!%p160_p3)  }
   0xa   : > { %855 = vmatpush3.bf16.msra.mxu1 (!%p160_p3), %v923_v3  ;;  %v932_v12 = vld [vmem:[%s1169_s1 + $0x58] sm:$0xff] (!%p160_p3)   ;;  %v936_v16 = vld [vmem:[%s1169_s1 + $0x60] sm:$0xff] (!%p160_p3)   ;;  %v940_v20 = vld [vmem:[%s1169_s1 + $0x68] sm:$0xff] (!%p160_p3)  }
   0xb   : > { %856 = vmatprep.subr.bf16.mxu1 (!%p160_p3), %v926_v6  ;;  %v933_v13 = vld [vmem:[%s1169_s1 + $0x18] sm:$0xff] (!%p160_p3)   ;;  %v937_v17 = vld [vmem:[%s1169_s1 + $0x20] sm:$0xff] (!%p160_p3)   ;;  %v941_v21 = vld [vmem:[%s1169_s1 + $0x28] sm:$0xff] (!%p160_p3)  }
   0xc   : > { %835 = vmatpush3.bf16.msra.mxu0 (!%p160_p3), %v925_v5  ;;  %v934_v14 = vld [vmem:[%s1169_s1 + $0xd8] sm:$0xff] (!%p160_p3)   ;;  %v938_v18 = vld [vmem:[%s1169_s1 + $0xe0] sm:$0xff] (!%p160_p3)   ;;  %v942_v22 = vld [vmem:[%s1169_s1 + $0xe8] sm:$0xff] (!%p160_p3)  }
   0xd   : > { %836 = vmatprep.subr.bf16.mxu0 (!%p160_p3), %v928_v8  ;;  %v935_v15 = vld [vmem:[%s1169_s1 + $0x98] sm:$0xff] (!%p160_p3)   ;;  %v939_v19 = vld [vmem:[%s1169_s1 + $0xa0] sm:$0xff] (!%p160_p3)   ;;  %v943_v23 = vld [vmem:[%s1169_s1 + $0xa8] sm:$0xff] (!%p160_p3)  }
   0xe   : > { %857 = vmatpush3.bf16.msra.mxu1 %v927_v7  ;;  %s1177_s12 = smov (!%p193_p4, %s977_s12), 1  ;;  %v944_v24 = vld [vmem:[%s1169_s1 + $0x70] sm:$0xff]   ;;  %v948_v28 = vld [vmem:[%s1169_s1 + $0x78] sm:$0xff]   ;;  %v958_v37 = vld [vmem:[%s1169_s1 + $0x100] sm:$0xff]  }
   0xf   : > { %858 = vmatprep.subr.bf16.mxu1 %v930_v10  ;;  %s893_s20 = smul.u32 40, %s1177_s12  ;;  %v945_v25 = vld [vmem:[%s1169_s1 + $0x30] sm:$0xff]   ;;  %v949_v29 = vld [vmem:[%s1169_s1 + $0x38] sm:$0xff]   ;;  %v959_v38 = vld [vmem:[%s1169_s1 + $0x108] sm:$0xff]   ;;  %s824_s25 = sshll.u32 %s1177_s12, 3 }
  0x10   : > { %837 = vmatpush3.bf16.msra.mxu0 %v929_v9  ;;  %v946_v26 = vld [vmem:[%s1169_s1 + $0xf0] sm:$0xff]   ;;  %v950_v30 = vld [vmem:[%s1169_s1 + $0xf8] sm:$0xff]   ;;  %v777_v43 = vld [vmem:[%s1170_s2] ss:$0 sm:$0xff]  ;;  %s211_s28 = scalar_lea.vmem %s1171_s3, %s824_s25 }
  0x11   : > { %838 = vmatprep.subr.bf16.mxu0 %v932_v12  ;;  %v947_v27 = vld [vmem:[%s1169_s1 + $0xb0] sm:$0xff]   ;;  %s1124_s4 = scalar_lea.vmem %s1168_s0, %s893_s20  ;;  %v954_v34 = vld [vmem:[%s1169_s1 + $0xb8] sm:$0xff]  }
  0x12   : > { %859 = vmatpush3.bf16.msra.mxu1 %v931_v11  ;;  %v951_v31 = vld [vmem:[%s1124_s4] ss:$20 sps:$4 sm:$0xff]   ;;  %v953_v32 = vld [vmem:[%s1124_s4 + $0x4] ss:$20 sps:$4 sm:$0xff]   ;;  %v955_v35 = vld [vmem:[%s1124_s4 + $0x8] ss:$20 sps:$4 sm:$0xff]  }
  0x13   : > { %860 = vmatprep.subr.bf16.mxu1 %v934_v14  ;;  %576 = vmatprep.mubr.bf16.mxu0 %v953_v32  ;;  %v957_v36 = vld [vmem:[%s1124_s4 + $0xc] ss:$20 sps:$4 sm:$0xff]   ;;  %v960_v39 = vld [vmem:[%s1169_s1 + $0x110] sm:$0xff]   ;;  %v961_v40 = vld [vmem:[%s1169_s1 + $0x118] sm:$0xff]  }
  0x14   : > { %839 = vmatpush3.bf16.msra.mxu0 %v933_v13  ;;  %617 = vmatprep.mubr.bf16.mxu1 %v957_v36  ;;  %v962_v41 = vld [vmem:[%s1124_s4 + $0x10] ss:$20 sps:$4 sm:$0xff]  }
  0x15   : > { %840 = vmatprep.subr.bf16.mxu0 %v936_v16 }
  0x16   : > { %861 = vmatpush3.bf16.msra.mxu1 %v935_v15 }
  0x17   : > { %862 = vmatprep.subr.bf16.mxu1 %v938_v18 }
  0x18   : > { %841 = vmatpush3.bf16.msra.mxu0 %v937_v17 }
  0x19   : > { %842 = vmatprep.subr.bf16.mxu0 %v940_v20 }
  0x1a   : > { %863 = vmatpush3.bf16.msra.mxu1 %v939_v19 }
  0x1b   : > { %864 = vmatprep.subr.bf16.mxu1 %v942_v22 }
  0x1c   : > { %843 = vmatpush3.bf16.msra.mxu0 %v941_v21 }
  0x1d   : > { %844 = vmatprep.subr.bf16.mxu0 %v944_v24 }
  0x1e   : > { %865 = vmatpush3.bf16.msra.mxu1 %v943_v23 }
  0x1f   : > { %866 = vmatprep.subr.bf16.mxu1 %v946_v26 }
  0x20   : > { %845 = vmatpush3.bf16.msra.mxu0 %v945_v25 }
  0x21   : > { %846 = vmatprep.subr.bf16.mxu0 %v948_v28 }
  0x22   : > { %867 = vmatpush3.bf16.msra.mxu1 %v947_v27 }
  0x23   : > { %868 = vmatprep.subr.bf16.mxu1 %v950_v30 }
  0x24   : > { %847 = vmatpush3.bf16.msra.mxu0 %v949_v29 }
  0x25   : > { %881 = vmatprep.subr.bf16.mxu0 %v987_v33 }
  0x26   : > { %869 = vmatpush3.bf16.msra.mxu1 %v954_v34 }
  0x27   : > { %577 = vmatmul.mubr.bf16.vlgmr.msra.gmra.mrb[0].mxu0 %v951_v31 }
  0x28   : > { %889 = vmatprep.mubr.msk.bf16.mxu0 %vm988_vm0, %v987_v33  ;;  %882 = vmatpush3.bf16.msra.mxu0 %v958_v37 }
  0x29   : > { %618 = vmatmul.mubr.bf16.vlgmr.msra.gmra.mrb[0].mxu1 %v955_v35  ;;  %883 = vmatprep.subr.bf16.mxu0 %v987_v33 }
  0x2c   : > { %884 = vmatpush3.bf16.msra.mxu0 %v959_v38 }
  0x2d   : > { %885 = vmatprep.subr.bf16.mxu0 %v987_v33 }
  0x30   : > { %886 = vmatpush3.bf16.msra.mxu0 %v960_v39 }
  0x31   : > { %887 = vmatprep.subr.bf16.mxu0 %v987_v33 }
  0x34   : > { %888 = vmatpush3.bf16.msra.mxu0 %v961_v40 }
  0x37   : > { %890 = vmatmul.mubr.msk.bf16.vlgmr.msra.gmra.mrb[4].mxu0 %vm540_vm1, %v962_v41 }
  0xfa   : > { %v848_v42 = vpop.f32.mrb[0].mxu0 }
  0xfb   : > { %v849_v44 = vpop.f32.mrb[1].mxu0 }
  0xfc   : > { %v850_v45 = vadd.f32 %v849_v44, %v848_v42  ;;  %v851_v46 = vpop.f32.mrb[2].mxu0  ;;  %v870_v47 = vpop.f32.mrb[0].mxu1 }
  0xfd   : > { %v852_v48 = vpop.f32.mrb[3].mxu0  ;;  %v871_v51 = vpop.f32.mrb[1].mxu1 }
  0xfe   : > { %v579_v49 = vadd.f32 %v850_v45, %v777_v43  ;;  %v853_v50 = vadd.f32 %v852_v48, %v851_v46  ;;  %v872_v52 = vadd.f32 %v871_v51, %v870_v47  ;;  %v873_v53 = vpop.f32.mrb[2].mxu1 }
  0xff   : > { %v874_v55 = vpop.f32.mrb[3].mxu1 }
 0x100   : > { %v582_v54 = vadd.f32 %v853_v50, %v777_v43  ;;  %v875_v56 = vadd.f32 %v874_v55, %v873_v53  ;;  %v620_v57 = vadd.f32 %v872_v52, %v579_v49 }
 0x102   : > { %v623_v58 = vadd.f32 %v875_v56, %v582_v54 }
 0x10a   : > { %v660_v59 = vpop.f32.mrb[4].mxu0 }
 0x10b   : > { %v661_v60 = vadd.f32 %v660_v59, %v620_v57  ;;  %v891_v61 = vpop.f32.mrb[5].mxu0 }
 0x10c   : > { %v663_v62 = vpop.f32.mrb[6].mxu0 }
 0x10d   : > { %v664_v63 = vadd.f32 %v663_v62, %v623_v58  ;;  %v892_v0 = vpop.f32.mrb[7].mxu0  ;;  %v667_v1 = vmax.f32 %v661_v60, 0.0 }
 0x10f   : > { %v668_v2 = vmax.f32 %v664_v63, 0.0 }
 0x111   : > { %v830_v3 = vpack.c.bf16 %v668_v2, %v667_v1 }
 0x113   : > { %831 = vst [vmem:[%s211_s28] sm:$0xff] %v830_v3  }
 0x114 PF: > { %s13_s14 = sadd.s32 1, %s985_s14   ;;  %s1172_s12 = smov %s981_s13 }
 0x115   : > { %p10_p5 = scmp.ge.s32.totalorder %s13_s14, 4   ;;  %s1173_s13 = smov %s1175_s15 }
 0x117   :  { %12 = sbr.rel (!%p10_p5) target bundleno = 2 (0x2), region = 62 }

// kernel: feature_extraction_forward.57
= control target key start
LH: loop header
LB: loop body
LE: loop exit
PB: predicated region body
PF: predicated region fallthrough
CT: control target
= control target key end

     0   :  { %s570_s12 = smov 0   ;;  %s572_s13 = smov 0   ;;  %s633_s0 = inlined_call_operand.vmem [shape: bf16[2,16,128], index: 0, kind: input, shape index: {}]   ;;  %s634_s1 = inlined_call_operand.vmem [shape: bf16[128,128], index: 1, kind: input, shape index: {}]   ;;  %s635_s2 = inlined_call_operand.vmem [shape: f32[1,128], index: 2, kind: input, shape index: {}]   ;;  %s636_s3 = inlined_call_operand.vmem [shape: bf16[2,16,128], index: 3, kind: output, shape index: {}]  }
   0x1   :  { %s574_s14 = smov 0  }
   0x2 LB: > { %s25_s15 = sadd.s32 1, %s542_s13  ;;  %p432_p0 = scmp.ge.s32.totalorder %s546_s14, 1  ;;  %s546_s14 = sphi %s574_s14, %s13_s14   ;;  %s542_s13 = sphi %s572_s13, %s638_s13   ;;  %s538_s12 = sphi %s570_s12, %s637_s12  }
   0x3   : > { %p27_p1 = scmp.ge.s32.totalorder %s25_s15, 2  ;;  %p158_p2 = scmp.lt.s32.totalorder %s546_s14, 3 }
   0x5   : > { %s640_s15 = smov (%p27_p1, %s25_s15), 0  ;;  %p159_p3 = pnand %p432_p0, %p158_p2 }
   0x6   : > { %v515_v0 = vld [vmem:[%s634_s1] sm:$0xff] (!%p159_p3)   ;;  %v548_v1 = vmov (!%p159_p3), 0.0   ;;  %v516_v2 = vld [vmem:[%s634_s1 + $0x8] sm:$0xff] (!%p159_p3)   ;;  %vm549_vm0 = vmmov (!%p159_p3), 0   ;;  %p191_p4 = scmp.lt.s32.totalorder (!%p159_p3), %s538_s12, 1  ;;  %v517_v3 = vld [vmem:[%s634_s1 + $0x10] sm:$0xff] (!%p159_p3)  }
   0x7   : > { %162 = sbr.rel (%p159_p3) target bundleno = 258 (0x102), region = 32  ;;  %469 = vmatprep.subr.bf16.mxu0 (!%p159_p3), %v548_v1  ;;  %485 = vmatprep.mubr.msk.bf16.mxu0 (!%p159_p3), %vm549_vm0, %v548_v1  ;;  %v518_v4 = vld [vmem:[%s634_s1 + $0x18] sm:$0xff] (!%p159_p3)   ;;  %v519_v5 = vld [vmem:[%s634_s1 + $0x20] sm:$0xff] (!%p159_p3)   ;;  %v520_v6 = vld [vmem:[%s634_s1 + $0x28] sm:$0xff] (!%p159_p3)  }
   0x8   : > { %470 = vmatpush3.bf16.msra.mxu0 (!%p159_p3), %v515_v0  ;;  %v521_v7 = vld [vmem:[%s634_s1 + $0x30] sm:$0xff] (!%p159_p3)   ;;  %v522_v8 = vld [vmem:[%s634_s1 + $0x38] sm:$0xff] (!%p159_p3)   ;;  %v437_v10 = vld [vmem:[%s635_s2] ss:$0 sm:$0xff] (!%p159_p3) }
   0x9   : > { %471 = vmatprep.subr.bf16.mxu0 (!%p159_p3), %v548_v1 }
   0xc   : > { %472 = vmatpush3.bf16.msra.mxu0 (!%p159_p3), %v516_v2 }
   0xd   : > { %473 = vmatprep.subr.bf16.mxu0 (!%p159_p3), %v548_v1 }
   0xe   : > { %s642_s12 = smov (!%p191_p4, %s538_s12), 1 }
   0xf   : > { %s451_s22 = sshll.u32 %s642_s12, 3 }
  0x10   : > { %s198_s25 = scalar_lea.vmem %s633_s0, %s451_s22  ;;  %474 = vmatpush3.bf16.msra.mxu0 %v517_v3  ;;  %s208_s16 = scalar_lea.vmem %s636_s3, %s451_s22 }
  0x11   : > { %475 = vmatprep.subr.bf16.mxu0 %v548_v1  ;;  %v523_v9 = vld [vmem:[%s198_s25] sm:$0xff]  }
  0x14   : > { %476 = vmatpush3.bf16.msra.mxu0 %v518_v4 }
  0x15   : > { %477 = vmatprep.subr.bf16.mxu0 %v548_v1 }
  0x18   : > { %478 = vmatpush3.bf16.msra.mxu0 %v519_v5 }
  0x19   : > { %479 = vmatprep.subr.bf16.mxu0 %v548_v1 }
  0x1c   : > { %480 = vmatpush3.bf16.msra.mxu0 %v520_v6 }
  0x1d   : > { %481 = vmatprep.subr.bf16.mxu0 %v548_v1 }
  0x20   : > { %482 = vmatpush3.bf16.msra.mxu0 %v521_v7 }
  0x21   : > { %483 = vmatprep.subr.bf16.mxu0 %v548_v1 }
  0x24   : > { %484 = vmatpush3.bf16.msra.mxu0 %v522_v8 }
  0x27   : > { %486 = vmatmul.mubr.bf16.vlgmr.msra.gmra.mrb[0].mxu0 %v523_v9 }
  0xfa   : > { %v324_v11 = vpop.f32.mrb[0].mxu0 }
  0xfb   : > { %v487_v12 = vpop.f32.mrb[1].mxu0  ;;  %v325_v14 = vadd.f32 %v437_v10, %v324_v11 }
  0xfc   : > { %v327_v13 = vpop.f32.mrb[2].mxu0 }
  0xfd   : > { %v328_v15 = vadd.f32 %v437_v10, %v327_v13  ;;  %v488_v16 = vpop.f32.mrb[3].mxu0 }
  0xff   : > { %v458_v17 = vpack.c.bf16 %v328_v15, %v325_v14 }
 0x101   : > { %459 = vst [vmem:[%s208_s16] sm:$0xff] %v458_v17  }
 0x102 PF: > { %s13_s14 = sadd.s32 1, %s546_s14   ;;  %s637_s12 = smov %s542_s13 }
 0x103   : > { %p10_p5 = scmp.ge.s32.totalorder %s13_s14, 4   ;;  %s638_s13 = smov %s640_s15 }
 0x105   :  { %12 = sbr.rel (!%p10_p5) target bundleno = 2 (0x2), region = 62 }

// kernel: feature_extraction_forward.58
= control target key start
LH: loop header
LB: loop body
LE: loop exit
PB: predicated region body
PF: predicated region fallthrough
CT: control target
= control target key end

     0   :  { %s1634_s15 = smov 0   ;;  %s1636_s16 = smov 0   ;;  %s1908_s0 = inlined_call_operand.vmem [shape: bf16[2,16,1152], index: 0, kind: input, shape index: {}]   ;;  %s1909_s1 = inlined_call_operand.vmem [shape: bf16[1152,128], index: 1, kind: input, shape index: {}]   ;;  %s1910_s2 = inlined_call_operand.vmem [shape: f32[1,128], index: 2, kind: input, shape index: {}]   ;;  %s1911_s3 = inlined_call_operand.vmem [shape: bf16[2,16,128], index: 3, kind: input, shape index: {}]   ;;  %s1912_s4 = inlined_call_operand.vmem [shape: bf16[2,16,128], index: 4, kind: output, shape index: {}]  }
   0x1   :  { %s1638_s17 = smov 0  }
   0x2 LB: > { %s26_s18 = sadd.s32 1, %s1601_s16  ;;  %p1249_p0 = scmp.ge.s32.totalorder %s1605_s17, 1  ;;  %s1605_s17 = sphi %s1638_s17, %s14_s17   ;;  %s1601_s16 = sphi %s1636_s16, %s1914_s16   ;;  %s1597_s15 = sphi %s1634_s15, %s1913_s15  }
   0x3   : > { %p28_p1 = scmp.ge.s32.totalorder %s26_s18, 2  ;;  %p201_p2 = scmp.lt.s32.totalorder %s1605_s17, 3 }
   0x5   : > { %s1916_s18 = smov (%p28_p1, %s26_s18), 0  ;;  %p202_p3 = pnand %p1249_p0, %p201_p2 }
   0x6   : > { %v1498_v0 = vld [vmem:[%s1909_s1 + $0x40] sm:$0xff] (!%p202_p3)   ;;  %v1502_v4 = vld [vmem:[%s1909_s1 + $0x48] sm:$0xff] (!%p202_p3)   ;;  %v1506_v8 = vld [vmem:[%s1909_s1 + $0x50] sm:$0xff] (!%p202_p3)   ;;  %p246_p4 = scmp.lt.s32.totalorder (!%p202_p3), %s1597_s15, 1  ;;  %vm1608_vm0 = vmmov (!%p202_p3), 0  }
   0x7   : > { %205 = sbr.rel (%p202_p3) target bundleno = 324 (0x144), region = 36  ;;  %v1499_v1 = vld [vmem:[%s1909_s1] sm:$0xff] (!%p202_p3)   ;;  %1354 = vmatprep.subr.bf16.mxu0 (!%p202_p3), %v1498_v0  ;;  %v1503_v5 = vld [vmem:[%s1909_s1 + $0x8] sm:$0xff] (!%p202_p3)   ;;  %v1507_v9 = vld [vmem:[%s1909_s1 + $0x10] sm:$0xff] (!%p202_p3)  }
   0x8   : > { %v1500_v2 = vld [vmem:[%s1909_s1 + $0xc0] sm:$0xff] (!%p202_p3)   ;;  %1355 = vmatpush3.bf16.msra.mxu0 (!%p202_p3), %v1499_v1  ;;  %v1504_v6 = vld [vmem:[%s1909_s1 + $0xc8] sm:$0xff] (!%p202_p3)   ;;  %v1508_v10 = vld [vmem:[%s1909_s1 + $0xd0] sm:$0xff] (!%p202_p3)  }
   0x9   : > { %v1501_v3 = vld [vmem:[%s1909_s1 + $0x80] sm:$0xff] (!%p202_p3)   ;;  %1376 = vmatprep.subr.bf16.mxu1 (!%p202_p3), %v1500_v2  ;;  %1356 = vmatprep.subr.bf16.mxu0 (!%p202_p3), %v1502_v4  ;;  %v1505_v7 = vld [vmem:[%s1909_s1 + $0x88] sm:$0xff] (!%p202_p3)   ;;  %v1509_v11 = vld [vmem:[%s1909_s1 + $0x90] sm:$0xff] (!%p202_p3)  }
   0xa   : > { %1377 = vmatpush3.bf16.msra.mxu1 (!%p202_p3), %v1501_v3  ;;  %v1510_v12 = vld [vmem:[%s1909_s1 + $0x58] sm:$0xff] (!%p202_p3)   ;;  %v1514_v16 = vld [vmem:[%s1909_s1 + $0x60] sm:$0xff] (!%p202_p3)   ;;  %v1518_v20 = vld [vmem:[%s1909_s1 + $0x68] sm:$0xff] (!%p202_p3)  }
   0xb   : > { %1378 = vmatprep.subr.bf16.mxu1 (!%p202_p3), %v1504_v6  ;;  %v1511_v13 = vld [vmem:[%s1909_s1 + $0x18] sm:$0xff] (!%p202_p3)   ;;  %v1515_v17 = vld [vmem:[%s1909_s1 + $0x20] sm:$0xff] (!%p202_p3)   ;;  %v1519_v21 = vld [vmem:[%s1909_s1 + $0x28] sm:$0xff] (!%p202_p3)   ;;  %v1607_v6 = vmov (!%p202_p3), 0.0  }
   0xc   : > { %1357 = vmatpush3.bf16.msra.mxu0 (!%p202_p3), %v1503_v5  ;;  %v1512_v14 = vld [vmem:[%s1909_s1 + $0xd8] sm:$0xff] (!%p202_p3)   ;;  %v1516_v18 = vld [vmem:[%s1909_s1 + $0xe0] sm:$0xff] (!%p202_p3)   ;;  %v1520_v22 = vld [vmem:[%s1909_s1 + $0xe8] sm:$0xff] (!%p202_p3)  }
   0xd   : > { %1358 = vmatprep.subr.bf16.mxu0 (!%p202_p3), %v1506_v8  ;;  %v1513_v15 = vld [vmem:[%s1909_s1 + $0x98] sm:$0xff] (!%p202_p3)   ;;  %v1517_v19 = vld [vmem:[%s1909_s1 + $0xa0] sm:$0xff] (!%p202_p3)   ;;  %v1521_v23 = vld [vmem:[%s1909_s1 + $0xa8] sm:$0xff] (!%p202_p3)  }
   0xe   : > { %1379 = vmatpush3.bf16.msra.mxu1 %v1505_v7  ;;  %s1918_s15 = smov (!%p246_p4, %s1597_s15), 1  ;;  %v1522_v24 = vld [vmem:[%s1909_s1 + $0x70] sm:$0xff]   ;;  %v1526_v28 = vld [vmem:[%s1909_s1 + $0x78] sm:$0xff]   ;;  %v1533_v34 = vld [vmem:[%s1909_s1 + $0x140] sm:$0xff]  }
   0xf   : > { %1380 = vmatprep.subr.bf16.mxu1 %v1508_v10  ;;  %s1471_s25 = smul.u32 72, %s1918_s15  ;;  %v1523_v25 = vld [vmem:[%s1909_s1 + $0x30] sm:$0xff]   ;;  %v1527_v29 = vld [vmem:[%s1909_s1 + $0x38] sm:$0xff]   ;;  %v1537_v37 = vld [vmem:[%s1909_s1 + $0x100] sm:$0xff]  }
  0x10   : > { %1359 = vmatpush3.bf16.msra.mxu0 %v1507_v9  ;;  %v1524_v26 = vld [vmem:[%s1909_s1 + $0xf0] sm:$0xff]   ;;  %v1528_v30 = vld [vmem:[%s1909_s1 + $0xf8] sm:$0xff]   ;;  %v1538_v38 = vld [vmem:[%s1909_s1 + $0x1c0] sm:$0xff]  }
  0x11   : > { %1360 = vmatprep.subr.bf16.mxu0 %v1510_v12  ;;  %v1525_v27 = vld [vmem:[%s1909_s1 + $0xb0] sm:$0xff]   ;;  %s1749_s10 = scalar_lea.vmem %s1908_s0, %s1471_s25  ;;  %v1532_v33 = vld [vmem:[%s1909_s1 + $0xb8] sm:$0xff]   ;;  %v1539_v39 = vld [vmem:[%s1909_s1 + $0x180] sm:$0xff]  }
  0x12   : > { %1381 = vmatpush3.bf16.msra.mxu1 %v1509_v11  ;;  %v1529_v31 = vld [vmem:[%s1749_s10] ss:$36 sps:$4 sm:$0xff]   ;;  %v1534_v35 = vld [vmem:[%s1749_s10 + $0x8] ss:$36 sps:$4 sm:$0xff]   ;;  %v1544_v44 = vld [vmem:[%s1909_s1 + $0x150] sm:$0xff]  }
  0x13   : > { %1382 = vmatprep.subr.bf16.mxu1 %v1512_v14  ;;  %v1531_v32 = vld [vmem:[%s1749_s10 + $0x4] ss:$36 sps:$4 sm:$0xff]   ;;  %v1536_v36 = vld [vmem:[%s1749_s10 + $0xc] ss:$36 sps:$4 sm:$0xff]   ;;  %v1548_v48 = vld [vmem:[%s1909_s1 + $0x158] sm:$0xff]  }
  0x14   : > { %1361 = vmatpush3.bf16.msra.mxu0 %v1511_v13  ;;  %948 = vmatprep.mubr.bf16.mxu0 %v1531_v32  ;;  %v1540_v40 = vld [vmem:[%s1909_s1 + $0x148] sm:$0xff]   ;;  %v1545_v45 = vld [vmem:[%s1909_s1 + $0x110] sm:$0xff]   ;;  %v1549_v49 = vld [vmem:[%s1909_s1 + $0x118] sm:$0xff]  }
  0x15   : > { %1362 = vmatprep.subr.bf16.mxu0 %v1514_v16  ;;  %989 = vmatprep.mubr.bf16.mxu1 %v1536_v36  ;;  %v1541_v41 = vld [vmem:[%s1909_s1 + $0x108] sm:$0xff]   ;;  %v1546_v46 = vld [vmem:[%s1909_s1 + $0x1d0] sm:$0xff]   ;;  %v1550_v50 = vld [vmem:[%s1909_s1 + $0x1d8] sm:$0xff]  }
  0x16   : > { %1383 = vmatpush3.bf16.msra.mxu1 %v1513_v15  ;;  %v1542_v42 = vld [vmem:[%s1909_s1 + $0x1c8] sm:$0xff]   ;;  %v1547_v47 = vld [vmem:[%s1909_s1 + $0x190] sm:$0xff]   ;;  %v1551_v51 = vld [vmem:[%s1909_s1 + $0x198] sm:$0xff]  }
  0x17   : > { %1384 = vmatprep.subr.bf16.mxu1 %v1516_v18  ;;  %v1543_v43 = vld [vmem:[%s1909_s1 + $0x188] sm:$0xff]   ;;  %v1552_v52 = vld [vmem:[%s1909_s1 + $0x160] sm:$0xff]   ;;  %v1560_v60 = vld [vmem:[%s1909_s1 + $0x170] sm:$0xff]  }
  0x18   : > { %1363 = vmatpush3.bf16.msra.mxu0 %v1515_v17  ;;  %v1553_v53 = vld [vmem:[%s1909_s1 + $0x120] sm:$0xff]   ;;  %v1556_v56 = vld [vmem:[%s1909_s1 + $0x168] sm:$0xff]   ;;  %v1561_v61 = vld [vmem:[%s1909_s1 + $0x130] sm:$0xff]  }
  0x19   : > { %1364 = vmatprep.subr.bf16.mxu0 %v1518_v20  ;;  %v1554_v54 = vld [vmem:[%s1909_s1 + $0x1e0] sm:$0xff]   ;;  %v1557_v57 = vld [vmem:[%s1909_s1 + $0x128] sm:$0xff]   ;;  %v1562_v62 = vld [vmem:[%s1909_s1 + $0x1f0] sm:$0xff]  }
  0x1a   : > { %1385 = vmatpush3.bf16.msra.mxu1 %v1517_v19  ;;  %v1555_v55 = vld [vmem:[%s1909_s1 + $0x1a0] sm:$0xff]   ;;  %v1558_v58 = vld [vmem:[%s1909_s1 + $0x1e8] sm:$0xff]   ;;  %v1563_v63 = vld [vmem:[%s1909_s1 + $0x1b0] sm:$0xff]  }
  0x1b   : > { %1386 = vmatprep.subr.bf16.mxu1 %v1520_v22  ;;  %v1559_v59 = vld [vmem:[%s1909_s1 + $0x1a8] sm:$0xff]   ;;  %v1564_v0 = vld [vmem:[%s1909_s1 + $0x178] sm:$0xff]   ;;  %v1567_v3 = vld [vmem:[%s1749_s10 + $0x10] ss:$36 sps:$4 sm:$0xff]  }
  0x1c   : > { %1365 = vmatpush3.bf16.msra.mxu0 %v1519_v21  ;;  %v1565_v1 = vld [vmem:[%s1909_s1 + $0x138] sm:$0xff]   ;;  %v1574_v9 = vld [vmem:[%s1909_s1 + $0x200] sm:$0xff]   ;;  %v1575_v10 = vld [vmem:[%s1909_s1 + $0x208] sm:$0xff]  }
  0x1d   : > { %1366 = vmatprep.subr.bf16.mxu0 %v1522_v24  ;;  %v1566_v2 = vld [vmem:[%s1909_s1 + $0x1f8] sm:$0xff]   ;;  %v1576_v11 = vld [vmem:[%s1909_s1 + $0x210] sm:$0xff]   ;;  %v1578_v13 = vld [vmem:[%s1909_s1 + $0x220] sm:$0xff]  }
  0x1e   : > { %1387 = vmatpush3.bf16.msra.mxu1 %v1521_v23  ;;  %v1569_v4 = vld [vmem:[%s1749_s10 + $0x14] ss:$36 sps:$4 sm:$0xff]   ;;  %v1573_v8 = vld [vmem:[%s1749_s10 + $0x1c] ss:$36 sps:$4 sm:$0xff]   ;;  %v1579_v14 = vld [vmem:[%s1909_s1 + $0x228] sm:$0xff]  }
  0x1f   : > { %1388 = vmatprep.subr.bf16.mxu1 %v1524_v26  ;;  %v1570_v5 = vld [vmem:[%s1909_s1 + $0x1b8] sm:$0xff]   ;;  %v1580_v15 = vld [vmem:[%s1909_s1 + $0x230] sm:$0xff]   ;;  %v1582_v17 = vld [vmem:[%s1749_s10 + $0x20] ss:$36 sps:$4 sm:$0xff]  }
  0x20   : > { %1367 = vmatpush3.bf16.msra.mxu0 %v1523_v25  ;;  %v1571_v7 = vld [vmem:[%s1749_s10 + $0x18] ss:$36 sps:$4 sm:$0xff]   ;;  %v1255_v19 = vld [vmem:[%s1910_s2] ss:$0 sm:$0xff]  ;;  %s1341_s10 = sshll.u32 %s1918_s15, 3 }
  0x21   : > { %1368 = vmatprep.subr.bf16.mxu0 %v1526_v28  ;;  %v1577_v12 = vld [vmem:[%s1909_s1 + $0x218] sm:$0xff]   ;;  %s264_s21 = scalar_lea.vmem %s1911_s3, %s1341_s10  ;;  %s274_s24 = scalar_lea.vmem %s1912_s4, %s1341_s10 }
  0x22   : > { %1389 = vmatpush3.bf16.msra.mxu1 %v1525_v27  ;;  %v1581_v16 = vld [vmem:[%s1909_s1 + $0x238] sm:$0xff]  }
  0x23   : > { %1390 = vmatprep.subr.bf16.mxu1 %v1528_v30 }
  0x24   : > { %1369 = vmatpush3.bf16.msra.mxu0 %v1527_v29 }
  0x25   : > { %1398 = vmatprep.subr.bf16.mxu0 %v1533_v34 }
  0x26   : > { %1391 = vmatpush3.bf16.msra.mxu1 %v1532_v33 }
  0x27   : > { %949 = vmatmul.mubr.bf16.vlgmr.msra.gmra.mrb[0].mxu0 %v1529_v31  ;;  %1420 = vmatprep.subr.bf16.mxu1 %v1538_v38 }
  0x28   : > { %1399 = vmatpush3.bf16.msra.mxu0 %v1537_v37  ;;  %1030 = vmatprep.mubr.bf16.mxu0 %v1569_v4 }
  0x29   : > { %990 = vmatmul.mubr.bf16.vlgmr.msra.gmra.mrb[0].mxu1 %v1534_v35  ;;  %1400 = vmatprep.subr.bf16.mxu0 %v1540_v40 }
  0x2a   : > { %1421 = vmatpush3.bf16.msra.mxu1 %v1539_v39  ;;  %1071 = vmatprep.mubr.bf16.mxu1 %v1573_v8 }
  0x2b   : > { %1422 = vmatprep.subr.bf16.mxu1 %v1542_v42 }
  0x2c   : > { %1401 = vmatpush3.bf16.msra.mxu0 %v1541_v41 }
  0x2d   : > { %1402 = vmatprep.subr.bf16.mxu0 %v1544_v44 }
  0x2e   : > { %1423 = vmatpush3.bf16.msra.mxu1 %v1543_v43 }
  0x2f   : > { %1424 = vmatprep.subr.bf16.mxu1 %v1546_v46 }
  0x30   : > { %1403 = vmatpush3.bf16.msra.mxu0 %v1545_v45 }
  0x31   : > { %1404 = vmatprep.subr.bf16.mxu0 %v1548_v48 }
  0x32   : > { %1425 = vmatpush3.bf16.msra.mxu1 %v1547_v47 }
  0x33   : > { %1426 = vmatprep.subr.bf16.mxu1 %v1550_v50 }
  0x34   : > { %1405 = vmatpush3.bf16.msra.mxu0 %v1549_v49 }
  0x35   : > { %1406 = vmatprep.subr.bf16.mxu0 %v1552_v52 }
  0x36   : > { %1427 = vmatpush3.bf16.msra.mxu1 %v1551_v51  ;;  %v1346_v51 = vld [vmem:[%s264_s21] sm:$0xff]  }
  0x37   : > { %1428 = vmatprep.subr.bf16.mxu1 %v1554_v54  ;;  %v1347_v54 = vunpack.c.l.bf16 %v1346_v51 }
  0x38   : > { %1407 = vmatpush3.bf16.msra.mxu0 %v1553_v53 }
  0x39   : > { %1408 = vmatprep.subr.bf16.mxu0 %v1556_v56  ;;  %v1348_v56 = vunpack.c.h.bf16 %v1346_v51 }
  0x3a   : > { %1429 = vmatpush3.bf16.msra.mxu1 %v1555_v55 }
  0x3b   : > { %1430 = vmatprep.subr.bf16.mxu1 %v1558_v58 }
  0x3c   : > { %1409 = vmatpush3.bf16.msra.mxu0 %v1557_v57 }
  0x3d   : > { %1410 = vmatprep.subr.bf16.mxu0 %v1560_v60 }
  0x3e   : > { %1431 = vmatpush3.bf16.msra.mxu1 %v1559_v59 }
  0x3f   : > { %1432 = vmatprep.subr.bf16.mxu1 %v1562_v62 }
  0x40   : > { %1411 = vmatpush3.bf16.msra.mxu0 %v1561_v61 }
  0x41   : > { %1412 = vmatprep.subr.bf16.mxu0 %v1564_v0 }
  0x42   : > { %1433 = vmatpush3.bf16.msra.mxu1 %v1563_v63 }
  0x43   : > { %1434 = vmatprep.subr.bf16.mxu1 %v1566_v2 }
  0x44   : > { %1413 = vmatpush3.bf16.msra.mxu0 %v1565_v1 }
  0x45   : > { %1451 = vmatprep.subr.bf16.mxu0 %v1607_v6 }
  0x46   : > { %1435 = vmatpush3.bf16.msra.mxu1 %v1570_v5 }
  0x47   : > { %1031 = vmatmul.mubr.bf16.vlgmr.msra.gmra.mrb[4].mxu0 %v1567_v3 }
  0x48   : > { %1467 = vmatprep.mubr.msk.bf16.mxu0 %vm1608_vm0, %v1607_v6  ;;  %1452 = vmatpush3.bf16.msra.mxu0 %v1574_v9 }
  0x49   : > { %1072 = vmatmul.mubr.bf16.vlgmr.msra.gmra.mrb[4].mxu1 %v1571_v7  ;;  %1453 = vmatprep.subr.bf16.mxu0 %v1607_v6 }
  0x4c   : > { %1454 = vmatpush3.bf16.msra.mxu0 %v1575_v10 }
  0x4d   : > { %1455 = vmatprep.subr.bf16.mxu0 %v1607_v6 }
  0x50   : > { %1456 = vmatpush3.bf16.msra.mxu0 %v1576_v11 }
  0x51   : > { %1457 = vmatprep.subr.bf16.mxu0 %v1607_v6 }
  0x54   : > { %1458 = vmatpush3.bf16.msra.mxu0 %v1577_v12 }
  0x55   : > { %1459 = vmatprep.subr.bf16.mxu0 %v1607_v6 }
  0x58   : > { %1460 = vmatpush3.bf16.msra.mxu0 %v1578_v13 }
  0x59   : > { %1461 = vmatprep.subr.bf16.mxu0 %v1607_v6 }
  0x5c   : > { %1462 = vmatpush3.bf16.msra.mxu0 %v1579_v14 }
  0x5d   : > { %1463 = vmatprep.subr.bf16.mxu0 %v1607_v6 }
  0x60   : > { %1464 = vmatpush3.bf16.msra.mxu0 %v1580_v15 }
  0x61   : > { %1465 = vmatprep.subr.bf16.mxu0 %v1607_v6 }
  0x64   : > { %1466 = vmatpush3.bf16.msra.mxu0 %v1581_v16 }
  0x67   : > { %1468 = vmatmul.mubr.bf16.vlgmr.msra.gmra.mrb[8].mxu0 %v1582_v17 }
  0xfa   : > { %v1370_v18 = vpop.f32.mrb[0].mxu0 }
  0xfb   : > { %v1371_v20 = vpop.f32.mrb[1].mxu0 }
  0xfc   : > { %v1372_v21 = vadd.f32 %v1371_v20, %v1370_v18  ;;  %v1373_v22 = vpop.f32.mrb[2].mxu0  ;;  %v1392_v23 = vpop.f32.mrb[0].mxu1 }
  0xfd   : > { %v1374_v24 = vpop.f32.mrb[3].mxu0  ;;  %v1393_v27 = vpop.f32.mrb[1].mxu1 }
  0xfe   : > { %v951_v25 = vadd.f32 %v1372_v21, %v1255_v19  ;;  %v1375_v26 = vadd.f32 %v1374_v24, %v1373_v22  ;;  %v1394_v28 = vadd.f32 %v1393_v27, %v1392_v23  ;;  %v1395_v29 = vpop.f32.mrb[2].mxu1 }
  0xff   : > { %v1396_v31 = vpop.f32.mrb[3].mxu1 }
 0x100   : > { %v954_v30 = vadd.f32 %v1375_v26, %v1255_v19  ;;  %v992_v32 = vadd.f32 %v1394_v28, %v951_v25  ;;  %v1397_v33 = vadd.f32 %v1396_v31, %v1395_v29 }
 0x102   : > { %v995_v34 = vadd.f32 %v1397_v33, %v954_v30 }
 0x11a   : > { %v1414_v35 = vpop.f32.mrb[4].mxu0 }
 0x11b   : > { %v1415_v36 = vpop.f32.mrb[5].mxu0 }
 0x11c   : > { %v1416_v37 = vadd.f32 %v1415_v36, %v1414_v35  ;;  %v1417_v38 = vpop.f32.mrb[6].mxu0  ;;  %v1436_v39 = vpop.f32.mrb[4].mxu1 }
 0x11d   : > { %v1418_v40 = vpop.f32.mrb[7].mxu0  ;;  %v1437_v43 = vpop.f32.mrb[5].mxu1 }
 0x11e   : > { %v1033_v41 = vadd.f32 %v1416_v37, %v992_v32  ;;  %v1419_v42 = vadd.f32 %v1418_v40, %v1417_v38  ;;  %v1438_v44 = vadd.f32 %v1437_v43, %v1436_v39  ;;  %v1439_v45 = vpop.f32.mrb[6].mxu1 }
 0x11f   : > { %v1440_v47 = vpop.f32.mrb[7].mxu1 }
 0x120   : > { %v1036_v46 = vadd.f32 %v1419_v42, %v995_v34  ;;  %v1441_v48 = vadd.f32 %v1440_v47, %v1439_v45  ;;  %v1074_v49 = vadd.f32 %v1438_v44, %v1033_v41 }
 0x122   : > { %v1077_v50 = vadd.f32 %v1441_v48, %v1036_v46 }
 0x13a   : > { %v1114_v52 = vpop.f32.mrb[8].mxu0 }
 0x13b   : > { %v1115_v53 = vadd.f32 %v1114_v52, %v1074_v49  ;;  %v1469_v55 = vpop.f32.mrb[9].mxu0 }
 0x13c   : > { %v1117_v57 = vpop.f32.mrb[10].mxu0 }
 0x13d   : > { %v1118_v58 = vadd.f32 %v1117_v57, %v1077_v50  ;;  %v1470_v59 = vpop.f32.mrb[11].mxu0  ;;  %v1125_v60 = vadd.f32 %v1347_v54, %v1115_v53 }
 0x13f   : > { %v1126_v61 = vadd.f32 %v1348_v56, %v1118_v58 }
 0x141   : > { %v1352_v62 = vpack.c.bf16 %v1126_v61, %v1125_v60 }
 0x143   : > { %1353 = vst [vmem:[%s274_s24] sm:$0xff] %v1352_v62  }
 0x144 PF: > { %s14_s17 = sadd.s32 1, %s1605_s17   ;;  %s1913_s15 = smov %s1601_s16 }
 0x145   : > { %p11_p5 = scmp.ge.s32.totalorder %s14_s17, 4   ;;  %s1914_s16 = smov %s1916_s18 }
 0x147   :  { %13 = sbr.rel (!%p11_p5) target bundleno = 2 (0x2), region = 69 }

// kernel: feature_extraction_forward.59
= control target key start
LH: loop header
LB: loop body
LE: loop exit
PB: predicated region body
PF: predicated region fallthrough
CT: control target
= control target key end

     0   :  { %s1537_s12 = smov 0   ;;  %s1539_s13 = smov 0   ;;  %s1808_s0 = inlined_call_operand.vmem [shape: bf16[2,16,1152], index: 0, kind: input, shape index: {}]   ;;  %s1809_s1 = inlined_call_operand.vmem [shape: bf16[1152,128], index: 1, kind: input, shape index: {}]   ;;  %s1810_s2 = inlined_call_operand.vmem [shape: f32[1,128], index: 2, kind: input, shape index: {}]   ;;  %s1811_s3 = inlined_call_operand.vmem [shape: bf16[2,16,128], index: 3, kind: output, shape index: {}]  }
   0x1   :  { %s1541_s14 = smov 0  }
   0x2 LB: > { %s25_s15 = sadd.s32 1, %s1509_s13  ;;  %p1164_p0 = scmp.ge.s32.totalorder %s1513_s14, 1  ;;  %s1513_s14 = sphi %s1541_s14, %s13_s14   ;;  %s1509_s13 = sphi %s1539_s13, %s1813_s13   ;;  %s1505_s12 = sphi %s1537_s12, %s1812_s12  }
   0x3   : > { %p27_p1 = scmp.ge.s32.totalorder %s25_s15, 2  ;;  %p159_p2 = scmp.lt.s32.totalorder %s1513_s14, 3 }
   0x5   : > { %s1815_s15 = smov (%p27_p1, %s25_s15), 0  ;;  %p160_p3 = pnand %p1164_p0, %p159_p2 }
   0x6   : > { %v1406_v0 = vld [vmem:[%s1809_s1 + $0x40] sm:$0xff] (!%p160_p3)   ;;  %v1410_v4 = vld [vmem:[%s1809_s1 + $0x48] sm:$0xff] (!%p160_p3)   ;;  %v1414_v8 = vld [vmem:[%s1809_s1 + $0x50] sm:$0xff] (!%p160_p3)   ;;  %p193_p4 = scmp.lt.s32.totalorder (!%p160_p3), %s1505_s12, 1  ;;  %vm1516_vm0 = vmmov (!%p160_p3), 0  }
   0x7   : > { %163 = sbr.rel (%p160_p3) target bundleno = 324 (0x144), region = 32  ;;  %v1407_v1 = vld [vmem:[%s1809_s1] sm:$0xff] (!%p160_p3)   ;;  %1262 = vmatprep.subr.bf16.mxu0 (!%p160_p3), %v1406_v0  ;;  %v1411_v5 = vld [vmem:[%s1809_s1 + $0x8] sm:$0xff] (!%p160_p3)   ;;  %v1415_v9 = vld [vmem:[%s1809_s1 + $0x10] sm:$0xff] (!%p160_p3)  }
   0x8   : > { %v1408_v2 = vld [vmem:[%s1809_s1 + $0xc0] sm:$0xff] (!%p160_p3)   ;;  %1263 = vmatpush3.bf16.msra.mxu0 (!%p160_p3), %v1407_v1  ;;  %v1412_v6 = vld [vmem:[%s1809_s1 + $0xc8] sm:$0xff] (!%p160_p3)   ;;  %v1416_v10 = vld [vmem:[%s1809_s1 + $0xd0] sm:$0xff] (!%p160_p3)  }
   0x9   : > { %v1409_v3 = vld [vmem:[%s1809_s1 + $0x80] sm:$0xff] (!%p160_p3)   ;;  %1284 = vmatprep.subr.bf16.mxu1 (!%p160_p3), %v1408_v2  ;;  %1264 = vmatprep.subr.bf16.mxu0 (!%p160_p3), %v1410_v4  ;;  %v1413_v7 = vld [vmem:[%s1809_s1 + $0x88] sm:$0xff] (!%p160_p3)   ;;  %v1417_v11 = vld [vmem:[%s1809_s1 + $0x90] sm:$0xff] (!%p160_p3)  }
   0xa   : > { %1285 = vmatpush3.bf16.msra.mxu1 (!%p160_p3), %v1409_v3  ;;  %v1418_v12 = vld [vmem:[%s1809_s1 + $0x58] sm:$0xff] (!%p160_p3)   ;;  %v1422_v16 = vld [vmem:[%s1809_s1 + $0x60] sm:$0xff] (!%p160_p3)   ;;  %v1426_v20 = vld [vmem:[%s1809_s1 + $0x68] sm:$0xff] (!%p160_p3)  }
   0xb   : > { %1286 = vmatprep.subr.bf16.mxu1 (!%p160_p3), %v1412_v6  ;;  %v1419_v13 = vld [vmem:[%s1809_s1 + $0x18] sm:$0xff] (!%p160_p3)   ;;  %v1423_v17 = vld [vmem:[%s1809_s1 + $0x20] sm:$0xff] (!%p160_p3)   ;;  %v1427_v21 = vld [vmem:[%s1809_s1 + $0x28] sm:$0xff] (!%p160_p3)   ;;  %v1515_v6 = vmov (!%p160_p3), 0.0  }
   0xc   : > { %1265 = vmatpush3.bf16.msra.mxu0 (!%p160_p3), %v1411_v5  ;;  %v1420_v14 = vld [vmem:[%s1809_s1 + $0xd8] sm:$0xff] (!%p160_p3)   ;;  %v1424_v18 = vld [vmem:[%s1809_s1 + $0xe0] sm:$0xff] (!%p160_p3)   ;;  %v1428_v22 = vld [vmem:[%s1809_s1 + $0xe8] sm:$0xff] (!%p160_p3)  }
   0xd   : > { %1266 = vmatprep.subr.bf16.mxu0 (!%p160_p3), %v1414_v8  ;;  %v1421_v15 = vld [vmem:[%s1809_s1 + $0x98] sm:$0xff] (!%p160_p3)   ;;  %v1425_v19 = vld [vmem:[%s1809_s1 + $0xa0] sm:$0xff] (!%p160_p3)   ;;  %v1429_v23 = vld [vmem:[%s1809_s1 + $0xa8] sm:$0xff] (!%p160_p3)  }
   0xe   : > { %1287 = vmatpush3.bf16.msra.mxu1 %v1413_v7  ;;  %s1817_s12 = smov (!%p193_p4, %s1505_s12), 1  ;;  %v1430_v24 = vld [vmem:[%s1809_s1 + $0x70] sm:$0xff]   ;;  %v1434_v28 = vld [vmem:[%s1809_s1 + $0x78] sm:$0xff]   ;;  %v1441_v34 = vld [vmem:[%s1809_s1 + $0x140] sm:$0xff]  }
   0xf   : > { %1288 = vmatprep.subr.bf16.mxu1 %v1416_v10  ;;  %s1379_s20 = smul.u32 72, %s1817_s12  ;;  %v1431_v25 = vld [vmem:[%s1809_s1 + $0x30] sm:$0xff]   ;;  %v1435_v29 = vld [vmem:[%s1809_s1 + $0x38] sm:$0xff]   ;;  %v1445_v37 = vld [vmem:[%s1809_s1 + $0x100] sm:$0xff]  }
  0x10   : > { %1267 = vmatpush3.bf16.msra.mxu0 %v1415_v9  ;;  %v1432_v26 = vld [vmem:[%s1809_s1 + $0xf0] sm:$0xff]   ;;  %v1436_v30 = vld [vmem:[%s1809_s1 + $0xf8] sm:$0xff]   ;;  %v1446_v38 = vld [vmem:[%s1809_s1 + $0x1c0] sm:$0xff]  }
  0x11   : > { %1268 = vmatprep.subr.bf16.mxu0 %v1418_v12  ;;  %v1433_v27 = vld [vmem:[%s1809_s1 + $0xb0] sm:$0xff]   ;;  %s1652_s4 = scalar_lea.vmem %s1808_s0, %s1379_s20  ;;  %v1440_v33 = vld [vmem:[%s1809_s1 + $0xb8] sm:$0xff]   ;;  %v1447_v39 = vld [vmem:[%s1809_s1 + $0x180] sm:$0xff]  }
  0x12   : > { %1289 = vmatpush3.bf16.msra.mxu1 %v1417_v11  ;;  %v1437_v31 = vld [vmem:[%s1652_s4] ss:$36 sps:$4 sm:$0xff]   ;;  %v1442_v35 = vld [vmem:[%s1652_s4 + $0x8] ss:$36 sps:$4 sm:$0xff]   ;;  %v1452_v44 = vld [vmem:[%s1809_s1 + $0x150] sm:$0xff]  }
  0x13   : > { %1290 = vmatprep.subr.bf16.mxu1 %v1420_v14  ;;  %v1439_v32 = vld [vmem:[%s1652_s4 + $0x4] ss:$36 sps:$4 sm:$0xff]   ;;  %v1444_v36 = vld [vmem:[%s1652_s4 + $0xc] ss:$36 sps:$4 sm:$0xff]   ;;  %v1456_v48 = vld [vmem:[%s1809_s1 + $0x158] sm:$0xff]  }
  0x14   : > { %1269 = vmatpush3.bf16.msra.mxu0 %v1419_v13  ;;  %885 = vmatprep.mubr.bf16.mxu0 %v1439_v32  ;;  %v1448_v40 = vld [vmem:[%s1809_s1 + $0x148] sm:$0xff]   ;;  %v1453_v45 = vld [vmem:[%s1809_s1 + $0x110] sm:$0xff]   ;;  %v1457_v49 = vld [vmem:[%s1809_s1 + $0x118] sm:$0xff]  }
  0x15   : > { %1270 = vmatprep.subr.bf16.mxu0 %v1422_v16  ;;  %926 = vmatprep.mubr.bf16.mxu1 %v1444_v36  ;;  %v1449_v41 = vld [vmem:[%s1809_s1 + $0x108] sm:$0xff]   ;;  %v1454_v46 = vld [vmem:[%s1809_s1 + $0x1d0] sm:$0xff]   ;;  %v1458_v50 = vld [vmem:[%s1809_s1 + $0x1d8] sm:$0xff]  }
  0x16   : > { %1291 = vmatpush3.bf16.msra.mxu1 %v1421_v15  ;;  %v1450_v42 = vld [vmem:[%s1809_s1 + $0x1c8] sm:$0xff]   ;;  %v1455_v47 = vld [vmem:[%s1809_s1 + $0x190] sm:$0xff]   ;;  %v1459_v51 = vld [vmem:[%s1809_s1 + $0x198] sm:$0xff]  }
  0x17   : > { %1292 = vmatprep.subr.bf16.mxu1 %v1424_v18  ;;  %v1451_v43 = vld [vmem:[%s1809_s1 + $0x188] sm:$0xff]   ;;  %v1460_v52 = vld [vmem:[%s1809_s1 + $0x160] sm:$0xff]   ;;  %v1468_v60 = vld [vmem:[%s1809_s1 + $0x170] sm:$0xff]  }
  0x18   : > { %1271 = vmatpush3.bf16.msra.mxu0 %v1423_v17  ;;  %v1461_v53 = vld [vmem:[%s1809_s1 + $0x120] sm:$0xff]   ;;  %v1464_v56 = vld [vmem:[%s1809_s1 + $0x168] sm:$0xff]   ;;  %v1469_v61 = vld [vmem:[%s1809_s1 + $0x130] sm:$0xff]  }
  0x19   : > { %1272 = vmatprep.subr.bf16.mxu0 %v1426_v20  ;;  %v1462_v54 = vld [vmem:[%s1809_s1 + $0x1e0] sm:$0xff]   ;;  %v1465_v57 = vld [vmem:[%s1809_s1 + $0x128] sm:$0xff]   ;;  %v1470_v62 = vld [vmem:[%s1809_s1 + $0x1f0] sm:$0xff]  }
  0x1a   : > { %1293 = vmatpush3.bf16.msra.mxu1 %v1425_v19  ;;  %v1463_v55 = vld [vmem:[%s1809_s1 + $0x1a0] sm:$0xff]   ;;  %v1466_v58 = vld [vmem:[%s1809_s1 + $0x1e8] sm:$0xff]   ;;  %v1471_v63 = vld [vmem:[%s1809_s1 + $0x1b0] sm:$0xff]  }
  0x1b   : > { %1294 = vmatprep.subr.bf16.mxu1 %v1428_v22  ;;  %v1467_v59 = vld [vmem:[%s1809_s1 + $0x1a8] sm:$0xff]   ;;  %v1472_v0 = vld [vmem:[%s1809_s1 + $0x178] sm:$0xff]   ;;  %v1475_v3 = vld [vmem:[%s1652_s4 + $0x10] ss:$36 sps:$4 sm:$0xff]  }
  0x1c   : > { %1273 = vmatpush3.bf16.msra.mxu0 %v1427_v21  ;;  %v1473_v1 = vld [vmem:[%s1809_s1 + $0x138] sm:$0xff]   ;;  %v1482_v9 = vld [vmem:[%s1809_s1 + $0x200] sm:$0xff]   ;;  %v1483_v10 = vld [vmem:[%s1809_s1 + $0x208] sm:$0xff]  }
  0x1d   : > { %1274 = vmatprep.subr.bf16.mxu0 %v1430_v24  ;;  %v1474_v2 = vld [vmem:[%s1809_s1 + $0x1f8] sm:$0xff]   ;;  %v1484_v11 = vld [vmem:[%s1809_s1 + $0x210] sm:$0xff]   ;;  %v1486_v13 = vld [vmem:[%s1809_s1 + $0x220] sm:$0xff]  }
  0x1e   : > { %1295 = vmatpush3.bf16.msra.mxu1 %v1429_v23  ;;  %v1477_v4 = vld [vmem:[%s1652_s4 + $0x14] ss:$36 sps:$4 sm:$0xff]   ;;  %v1481_v8 = vld [vmem:[%s1652_s4 + $0x1c] ss:$36 sps:$4 sm:$0xff]   ;;  %v1487_v14 = vld [vmem:[%s1809_s1 + $0x228] sm:$0xff]  }
  0x1f   : > { %1296 = vmatprep.subr.bf16.mxu1 %v1432_v26  ;;  %v1478_v5 = vld [vmem:[%s1809_s1 + $0x1b8] sm:$0xff]   ;;  %v1488_v15 = vld [vmem:[%s1809_s1 + $0x230] sm:$0xff]   ;;  %v1490_v17 = vld [vmem:[%s1652_s4 + $0x20] ss:$36 sps:$4 sm:$0xff]  }
  0x20   : > { %1275 = vmatpush3.bf16.msra.mxu0 %v1431_v25  ;;  %v1479_v7 = vld [vmem:[%s1652_s4 + $0x18] ss:$36 sps:$4 sm:$0xff]   ;;  %v1168_v19 = vld [vmem:[%s1810_s2] ss:$0 sm:$0xff]  ;;  %s1254_s4 = sshll.u32 %s1817_s12, 3 }
  0x21   : > { %1276 = vmatprep.subr.bf16.mxu0 %v1434_v28  ;;  %v1485_v12 = vld [vmem:[%s1809_s1 + $0x218] sm:$0xff]   ;;  %s211_s7 = scalar_lea.vmem %s1811_s3, %s1254_s4 }
  0x22   : > { %1297 = vmatpush3.bf16.msra.mxu1 %v1433_v27  ;;  %v1489_v16 = vld [vmem:[%s1809_s1 + $0x238] sm:$0xff]  }
  0x23   : > { %1298 = vmatprep.subr.bf16.mxu1 %v1436_v30 }
  0x24   : > { %1277 = vmatpush3.bf16.msra.mxu0 %v1435_v29 }
  0x25   : > { %1306 = vmatprep.subr.bf16.mxu0 %v1441_v34 }
  0x26   : > { %1299 = vmatpush3.bf16.msra.mxu1 %v1440_v33 }
  0x27   : > { %886 = vmatmul.mubr.bf16.vlgmr.msra.gmra.mrb[0].mxu0 %v1437_v31  ;;  %1328 = vmatprep.subr.bf16.mxu1 %v1446_v38 }
  0x28   : > { %1307 = vmatpush3.bf16.msra.mxu0 %v1445_v37  ;;  %967 = vmatprep.mubr.bf16.mxu0 %v1477_v4 }
  0x29   : > { %927 = vmatmul.mubr.bf16.vlgmr.msra.gmra.mrb[0].mxu1 %v1442_v35  ;;  %1308 = vmatprep.subr.bf16.mxu0 %v1448_v40 }
  0x2a   : > { %1329 = vmatpush3.bf16.msra.mxu1 %v1447_v39  ;;  %1008 = vmatprep.mubr.bf16.mxu1 %v1481_v8 }
  0x2b   : > { %1330 = vmatprep.subr.bf16.mxu1 %v1450_v42 }
  0x2c   : > { %1309 = vmatpush3.bf16.msra.mxu0 %v1449_v41 }
  0x2d   : > { %1310 = vmatprep.subr.bf16.mxu0 %v1452_v44 }
  0x2e   : > { %1331 = vmatpush3.bf16.msra.mxu1 %v1451_v43 }
  0x2f   : > { %1332 = vmatprep.subr.bf16.mxu1 %v1454_v46 }
  0x30   : > { %1311 = vmatpush3.bf16.msra.mxu0 %v1453_v45 }
  0x31   : > { %1312 = vmatprep.subr.bf16.mxu0 %v1456_v48 }
  0x32   : > { %1333 = vmatpush3.bf16.msra.mxu1 %v1455_v47 }
  0x33   : > { %1334 = vmatprep.subr.bf16.mxu1 %v1458_v50 }
  0x34   : > { %1313 = vmatpush3.bf16.msra.mxu0 %v1457_v49 }
  0x35   : > { %1314 = vmatprep.subr.bf16.mxu0 %v1460_v52 }
  0x36   : > { %1335 = vmatpush3.bf16.msra.mxu1 %v1459_v51 }
  0x37   : > { %1336 = vmatprep.subr.bf16.mxu1 %v1462_v54 }
  0x38   : > { %1315 = vmatpush3.bf16.msra.mxu0 %v1461_v53 }
  0x39   : > { %1316 = vmatprep.subr.bf16.mxu0 %v1464_v56 }
  0x3a   : > { %1337 = vmatpush3.bf16.msra.mxu1 %v1463_v55 }
  0x3b   : > { %1338 = vmatprep.subr.bf16.mxu1 %v1466_v58 }
  0x3c   : > { %1317 = vmatpush3.bf16.msra.mxu0 %v1465_v57 }
  0x3d   : > { %1318 = vmatprep.subr.bf16.mxu0 %v1468_v60 }
  0x3e   : > { %1339 = vmatpush3.bf16.msra.mxu1 %v1467_v59 }
  0x3f   : > { %1340 = vmatprep.subr.bf16.mxu1 %v1470_v62 }
  0x40   : > { %1319 = vmatpush3.bf16.msra.mxu0 %v1469_v61 }
  0x41   : > { %1320 = vmatprep.subr.bf16.mxu0 %v1472_v0 }
  0x42   : > { %1341 = vmatpush3.bf16.msra.mxu1 %v1471_v63 }
  0x43   : > { %1342 = vmatprep.subr.bf16.mxu1 %v1474_v2 }
  0x44   : > { %1321 = vmatpush3.bf16.msra.mxu0 %v1473_v1 }
  0x45   : > { %1359 = vmatprep.subr.bf16.mxu0 %v1515_v6 }
  0x46   : > { %1343 = vmatpush3.bf16.msra.mxu1 %v1478_v5 }
  0x47   : > { %968 = vmatmul.mubr.bf16.vlgmr.msra.gmra.mrb[4].mxu0 %v1475_v3 }
  0x48   : > { %1375 = vmatprep.mubr.msk.bf16.mxu0 %vm1516_vm0, %v1515_v6  ;;  %1360 = vmatpush3.bf16.msra.mxu0 %v1482_v9 }
  0x49   : > { %1009 = vmatmul.mubr.bf16.vlgmr.msra.gmra.mrb[4].mxu1 %v1479_v7  ;;  %1361 = vmatprep.subr.bf16.mxu0 %v1515_v6 }
  0x4c   : > { %1362 = vmatpush3.bf16.msra.mxu0 %v1483_v10 }
  0x4d   : > { %1363 = vmatprep.subr.bf16.mxu0 %v1515_v6 }
  0x50   : > { %1364 = vmatpush3.bf16.msra.mxu0 %v1484_v11 }
  0x51   : > { %1365 = vmatprep.subr.bf16.mxu0 %v1515_v6 }
  0x54   : > { %1366 = vmatpush3.bf16.msra.mxu0 %v1485_v12 }
  0x55   : > { %1367 = vmatprep.subr.bf16.mxu0 %v1515_v6 }
  0x58   : > { %1368 = vmatpush3.bf16.msra.mxu0 %v1486_v13 }
  0x59   : > { %1369 = vmatprep.subr.bf16.mxu0 %v1515_v6 }
  0x5c   : > { %1370 = vmatpush3.bf16.msra.mxu0 %v1487_v14 }
  0x5d   : > { %1371 = vmatprep.subr.bf16.mxu0 %v1515_v6 }
  0x60   : > { %1372 = vmatpush3.bf16.msra.mxu0 %v1488_v15 }
  0x61   : > { %1373 = vmatprep.subr.bf16.mxu0 %v1515_v6 }
  0x64   : > { %1374 = vmatpush3.bf16.msra.mxu0 %v1489_v16 }
  0x67   : > { %1376 = vmatmul.mubr.bf16.vlgmr.msra.gmra.mrb[8].mxu0 %v1490_v17 }
  0xfa   : > { %v1278_v18 = vpop.f32.mrb[0].mxu0 }
  0xfb   : > { %v1279_v20 = vpop.f32.mrb[1].mxu0 }
  0xfc   : > { %v1280_v21 = vadd.f32 %v1279_v20, %v1278_v18  ;;  %v1281_v22 = vpop.f32.mrb[2].mxu0  ;;  %v1300_v23 = vpop.f32.mrb[0].mxu1 }
  0xfd   : > { %v1282_v24 = vpop.f32.mrb[3].mxu0  ;;  %v1301_v27 = vpop.f32.mrb[1].mxu1 }
  0xfe   : > { %v888_v25 = vadd.f32 %v1280_v21, %v1168_v19  ;;  %v1283_v26 = vadd.f32 %v1282_v24, %v1281_v22  ;;  %v1302_v28 = vadd.f32 %v1301_v27, %v1300_v23  ;;  %v1303_v29 = vpop.f32.mrb[2].mxu1 }
  0xff   : > { %v1304_v31 = vpop.f32.mrb[3].mxu1 }
 0x100   : > { %v891_v30 = vadd.f32 %v1283_v26, %v1168_v19  ;;  %v929_v32 = vadd.f32 %v1302_v28, %v888_v25  ;;  %v1305_v33 = vadd.f32 %v1304_v31, %v1303_v29 }
 0x102   : > { %v932_v34 = vadd.f32 %v1305_v33, %v891_v30 }
 0x11a   : > { %v1322_v35 = vpop.f32.mrb[4].mxu0 }
 0x11b   : > { %v1323_v36 = vpop.f32.mrb[5].mxu0 }
 0x11c   : > { %v1324_v37 = vadd.f32 %v1323_v36, %v1322_v35  ;;  %v1325_v38 = vpop.f32.mrb[6].mxu0  ;;  %v1344_v39 = vpop.f32.mrb[4].mxu1 }
 0x11d   : > { %v1326_v40 = vpop.f32.mrb[7].mxu0  ;;  %v1345_v43 = vpop.f32.mrb[5].mxu1 }
 0x11e   : > { %v970_v41 = vadd.f32 %v1324_v37, %v929_v32  ;;  %v1327_v42 = vadd.f32 %v1326_v40, %v1325_v38  ;;  %v1346_v44 = vadd.f32 %v1345_v43, %v1344_v39  ;;  %v1347_v45 = vpop.f32.mrb[6].mxu1 }
 0x11f   : > { %v1348_v47 = vpop.f32.mrb[7].mxu1 }
 0x120   : > { %v973_v46 = vadd.f32 %v1327_v42, %v932_v34  ;;  %v1349_v48 = vadd.f32 %v1348_v47, %v1347_v45  ;;  %v1011_v49 = vadd.f32 %v1346_v44, %v970_v41 }
 0x122   : > { %v1014_v50 = vadd.f32 %v1349_v48, %v973_v46 }
 0x13a   : > { %v1051_v51 = vpop.f32.mrb[8].mxu0 }
 0x13b   : > { %v1052_v52 = vadd.f32 %v1051_v51, %v1011_v49  ;;  %v1377_v53 = vpop.f32.mrb[9].mxu0 }
 0x13c   : > { %v1054_v54 = vpop.f32.mrb[10].mxu0 }
 0x13d   : > { %v1055_v55 = vadd.f32 %v1054_v54, %v1014_v50  ;;  %v1378_v56 = vpop.f32.mrb[11].mxu0  ;;  %v1058_v57 = vmax.f32 %v1052_v52, 0.0 }
 0x13f   : > { %v1059_v58 = vmax.f32 %v1055_v55, 0.0 }
 0x141   : > { %v1260_v59 = vpack.c.bf16 %v1059_v58, %v1058_v57 }
 0x143   : > { %1261 = vst [vmem:[%s211_s7] sm:$0xff] %v1260_v59  }
 0x144 PF: > { %s13_s14 = sadd.s32 1, %s1513_s14   ;;  %s1812_s12 = smov %s1509_s13 }
 0x145   : > { %p10_p5 = scmp.ge.s32.totalorder %s13_s14, 4   ;;  %s1813_s13 = smov %s1815_s15 }
 0x147   :  { %12 = sbr.rel (!%p10_p5) target bundleno = 2 (0x2), region = 62 }

// kernel: feature_extraction_forward.63
= control target key start
LH: loop header
LB: loop body
LE: loop exit
PB: predicated region body
PF: predicated region fallthrough
CT: control target
= control target key end

     0   :  { %8 = vsyncpa [#allocation3], 0  ;;  %s1956_s0 = inlined_call_operand.vmem [shape: bf16[2,16,1152], index: 0, kind: input, shape index: {}]   ;;  %s1957_s1 = inlined_call_operand.vmem [shape: bf16[1152,32], index: 1, kind: input, shape index: {}]   ;;  %s1958_s2 = inlined_call_operand.vmem [shape: f32[1,32], index: 2, kind: input, shape index: {}]   ;;  %s1959_s3 = inlined_call_operand.hbm [shape: f32[2,16,32], index: 3, kind: output, shape index: {}]  }
   0x1   :  { %10 = vsyncpa [#allocation3 + $0x1], 0  ;;  %s1611_s12 = smov 0   ;;  %s1613_s13 = smov 0  }
   0x2   :  { %s1615_s14 = smov 0   ;;  %s1617_s15 = smov 0  }
   0x3   :  { %s1619_s16 = smov 0   ;;  %s1621_s17 = smov 0  }
   0x4 LB: > { %s1149_s18 = sadd.s32 4294967295, %s1584_s17   ;;  %s1150_s19 = sadd.s32 4294967294, %s1584_s17   ;;  %s1584_s17 = sphi %s1621_s17, %s16_s17   ;;  %s1580_s16 = sphi %s1619_s16, %s1966_s16   ;;  %s1576_s15 = sphi %s1617_s15, %s1965_s15   ;;  %s1572_s14 = sphi %s1615_s14, %s1964_s14   ;;  %s1568_s13 = sphi %s1613_s13, %s1963_s13   ;;  %s1564_s12 = sphi %s1611_s12, %s1962_s12  }
   0x5   : > { %s28_s20 = sadd.s32 1, %s1580_s16  ;;  %s107_s21 = sadd.s32 1, %s1572_s14 }
   0x6   : > { %p30_p0 = scmp.ge.s32.totalorder %s28_s20, 2  ;;  %p117_p1 = scmp.ne.s32.totalorder %s1572_s14, %s1568_s13 }
   0x7   : > { %p118_p2 = scmp.eq.s32.totalorder %s1149_s18, 1  ;;  %p123_p3 = scmp.ne.s32.totalorder %s1568_s13, %s1564_s12 }
   0x8   : > { %s1968_s20 = smov (%p30_p0, %s28_s20), 0  ;;  %p124_p5 = scmp.eq.s32.totalorder %s1150_s19, 1 }
   0x9   : > { %p1651_p4 = por %p118_p2, %p117_p1  ;;  %s102_s23 = ssub.s32 %s1580_s16, %s1968_s20 }
   0xa   : > { %p1153_p6 = scmp.ge.s32.totalorder %s1584_s17, 1  ;;  %p105_p7 = scmp.eq.s32.totalorder %s102_s23, 0 }
   0xb   : > { %p1658_p8 = por %p124_p5, %p123_p3  ;;  %p162_p9 = scmp.lt.s32.totalorder %s1584_s17, 3 }
   0xc   : > { %s1664_s25 = scalar_select %p105_p7, %s1572_s14, %s107_s21  }
   0xd   : > { %p163_p10 = pnand %p1153_p6, %p162_p9 }
   0xe   : > { %v1421_v0 = vld [vmem:[%s1957_s1 + $0x40] sm:$0xff] (!%p163_p10)   ;;  %v1425_v4 = vld [vmem:[%s1957_s1 + $0x48] sm:$0xff] (!%p163_p10)   ;;  %v1429_v8 = vld [vmem:[%s1957_s1 + $0x50] sm:$0xff] (!%p163_p10)   ;;  %p192_p11 = scmp.lt.s32.totalorder (!%p163_p10), %s1576_s15, 1  ;;  %vm1587_vm0 = vmmov (!%p163_p10), 0   ;;  %s1243_s5 = sshll.u32 (!%p163_p10), %s1576_s15, 8 }
   0xf   : > { %166 = sbr.rel (%p163_p10) target bundleno = 342 (0x156), region = 32  ;;  %v1422_v1 = vld [vmem:[%s1957_s1] sm:$0xff] (!%p163_p10)   ;;  %1244 = vmatprep.subr.bf16.mxu0 (!%p163_p10), %v1421_v0  ;;  %v1426_v5 = vld [vmem:[%s1957_s1 + $0x8] sm:$0xff] (!%p163_p10)   ;;  %v1430_v9 = vld [vmem:[%s1957_s1 + $0x10] sm:$0xff] (!%p163_p10)   ;;  %vm1048_vm1 = vcmask (!%p163_p10), 261120   ;;  %s1588_s11 = smov (!%p163_p10), [#allocation2]  }
  0x10   : > { %v1423_v2 = vld [vmem:[%s1957_s1 + $0xc0] sm:$0xff] (!%p163_p10)   ;;  %1245 = vmatpush3.bf16.msra.mxu0 (!%p163_p10), %v1422_v1  ;;  %v1427_v6 = vld [vmem:[%s1957_s1 + $0xc8] sm:$0xff] (!%p163_p10)   ;;  %v1431_v10 = vld [vmem:[%s1957_s1 + $0xd0] sm:$0xff] (!%p163_p10)   ;;  %s1510_s18 = sshll.u32 (!%p163_p10), %s1588_s11, 4  ;;  %s1511_s18 = int_to_ptr.vmem [resolvable:$false] %s1510_s18 }
  0x11   : > { %v1424_v3 = vld [vmem:[%s1957_s1 + $0x80] sm:$0xff] (!%p163_p10)   ;;  %1266 = vmatprep.subr.bf16.mxu1 (!%p163_p10), %v1423_v2  ;;  %1246 = vmatprep.subr.bf16.mxu0 (!%p163_p10), %v1425_v4  ;;  %v1428_v7 = vld [vmem:[%s1957_s1 + $0x88] sm:$0xff] (!%p163_p10)   ;;  %v1432_v11 = vld [vmem:[%s1957_s1 + $0x90] sm:$0xff] (!%p163_p10)   ;;  %s1512_s19 = scalar_lea.vmem (!%p163_p10), %s1511_s18, 512 }
  0x12   : > { %1267 = vmatpush3.bf16.msra.mxu1 (!%p163_p10), %v1424_v3  ;;  %v1433_v12 = vld [vmem:[%s1957_s1 + $0x58] sm:$0xff] (!%p163_p10)   ;;  %v1437_v16 = vld [vmem:[%s1957_s1 + $0x60] sm:$0xff] (!%p163_p10)   ;;  %v1441_v20 = vld [vmem:[%s1957_s1 + $0x68] sm:$0xff] (!%p163_p10)  }
  0x13   : > { %1268 = vmatprep.subr.bf16.mxu1 (!%p163_p10), %v1427_v6  ;;  %v1434_v13 = vld [vmem:[%s1957_s1 + $0x18] sm:$0xff] (!%p163_p10)   ;;  %v1438_v17 = vld [vmem:[%s1957_s1 + $0x20] sm:$0xff] (!%p163_p10)   ;;  %v1442_v21 = vld [vmem:[%s1957_s1 + $0x28] sm:$0xff] (!%p163_p10)   ;;  %v1586_v6 = vmov (!%p163_p10), 0.0  }
  0x14   : > { %1247 = vmatpush3.bf16.msra.mxu0 (!%p163_p10), %v1426_v5  ;;  %v1435_v14 = vld [vmem:[%s1957_s1 + $0xd8] sm:$0xff] (!%p163_p10)   ;;  %v1439_v18 = vld [vmem:[%s1957_s1 + $0xe0] sm:$0xff] (!%p163_p10)   ;;  %v1443_v22 = vld [vmem:[%s1957_s1 + $0xe8] sm:$0xff] (!%p163_p10)  }
  0x15   : > { %1248 = vmatprep.subr.bf16.mxu0 (!%p163_p10), %v1429_v8  ;;  %v1436_v15 = vld [vmem:[%s1957_s1 + $0x98] sm:$0xff] (!%p163_p10)   ;;  %v1440_v19 = vld [vmem:[%s1957_s1 + $0xa0] sm:$0xff] (!%p163_p10)   ;;  %v1444_v23 = vld [vmem:[%s1957_s1 + $0xa8] sm:$0xff] (!%p163_p10)  }
  0x16   : > { %1269 = vmatpush3.bf16.msra.mxu1 %v1428_v7  ;;  %s193_s7 = scalar_select %p192_p11, %s1576_s15, 1  ;;  %v1445_v24 = vld [vmem:[%s1957_s1 + $0x70] sm:$0xff]   ;;  %v1449_v28 = vld [vmem:[%s1957_s1 + $0x78] sm:$0xff]   ;;  %v1456_v34 = vld [vmem:[%s1957_s1 + $0x140] sm:$0xff]  }
  0x17   : > { %1270 = vmatprep.subr.bf16.mxu1 %v1431_v10  ;;  %v1446_v25 = vld [vmem:[%s1957_s1 + $0x30] sm:$0xff]   ;;  %v1450_v29 = vld [vmem:[%s1957_s1 + $0x38] sm:$0xff]   ;;  %v1460_v37 = vld [vmem:[%s1957_s1 + $0x100] sm:$0xff]  }
  0x18   : > { %1249 = vmatpush3.bf16.msra.mxu0 %v1430_v9  ;;  %s1361_s26 = smul.u32 72, %s193_s7  ;;  %v1447_v26 = vld [vmem:[%s1957_s1 + $0xf0] sm:$0xff]   ;;  %v1451_v30 = vld [vmem:[%s1957_s1 + $0xf8] sm:$0xff]   ;;  %v1461_v38 = vld [vmem:[%s1957_s1 + $0x1c0] sm:$0xff]   ;;  %s1908_s7 = scalar_lea.hbm %s1959_s3, %s1243_s5 }
  0x19   : > { %1250 = vmatprep.subr.bf16.mxu0 %v1433_v12  ;;  %v1448_v27 = vld [vmem:[%s1957_s1 + $0xb0] sm:$0xff]   ;;  %v1455_v33 = vld [vmem:[%s1957_s1 + $0xb8] sm:$0xff]   ;;  %v1462_v39 = vld [vmem:[%s1957_s1 + $0x180] sm:$0xff]  }
  0x1a   : > { %1271 = vmatpush3.bf16.msra.mxu1 %v1432_v11  ;;  %s1758_s10 = scalar_lea.vmem %s1956_s0, %s1361_s26  ;;  %v1463_v40 = vld [vmem:[%s1957_s1 + $0x148] sm:$0xff]   ;;  %v1467_v44 = vld [vmem:[%s1957_s1 + $0x150] sm:$0xff]   ;;  %v1471_v48 = vld [vmem:[%s1957_s1 + $0x158] sm:$0xff]  }
  0x1b   : > { %1272 = vmatprep.subr.bf16.mxu1 %v1435_v14  ;;  %v1452_v31 = vld [vmem:[%s1758_s10] ss:$36 sps:$4 sm:$0xff]   ;;  %v1457_v35 = vld [vmem:[%s1758_s10 + $0x8] ss:$36 sps:$4 sm:$0xff]   ;;  %v1468_v45 = vld [vmem:[%s1957_s1 + $0x110] sm:$0xff]  }
  0x1c   : > { %1251 = vmatpush3.bf16.msra.mxu0 %v1434_v13  ;;  %v1454_v32 = vld [vmem:[%s1758_s10 + $0x4] ss:$36 sps:$4 sm:$0xff]   ;;  %v1459_v36 = vld [vmem:[%s1758_s10 + $0xc] ss:$36 sps:$4 sm:$0xff]   ;;  %v1472_v49 = vld [vmem:[%s1957_s1 + $0x118] sm:$0xff]  }
  0x1d   : > { %1252 = vmatprep.subr.bf16.mxu0 %v1437_v16  ;;  %875 = vmatprep.mubr.bf16.mxu0 %v1454_v32  ;;  %v1464_v41 = vld [vmem:[%s1957_s1 + $0x108] sm:$0xff]   ;;  %v1469_v46 = vld [vmem:[%s1957_s1 + $0x1d0] sm:$0xff]   ;;  %v1473_v50 = vld [vmem:[%s1957_s1 + $0x1d8] sm:$0xff]  }
  0x1e   : > { %1273 = vmatpush3.bf16.msra.mxu1 %v1436_v15  ;;  %916 = vmatprep.mubr.bf16.mxu1 %v1459_v36  ;;  %v1465_v42 = vld [vmem:[%s1957_s1 + $0x1c8] sm:$0xff]   ;;  %v1470_v47 = vld [vmem:[%s1957_s1 + $0x190] sm:$0xff]   ;;  %v1474_v51 = vld [vmem:[%s1957_s1 + $0x198] sm:$0xff]  }
  0x1f   : > { %1274 = vmatprep.subr.bf16.mxu1 %v1439_v18  ;;  %v1466_v43 = vld [vmem:[%s1957_s1 + $0x188] sm:$0xff]   ;;  %v1475_v52 = vld [vmem:[%s1957_s1 + $0x160] sm:$0xff]   ;;  %v1483_v60 = vld [vmem:[%s1957_s1 + $0x170] sm:$0xff]  }
  0x20   : > { %1253 = vmatpush3.bf16.msra.mxu0 %v1438_v17  ;;  %v1476_v53 = vld [vmem:[%s1957_s1 + $0x120] sm:$0xff]   ;;  %v1479_v56 = vld [vmem:[%s1957_s1 + $0x168] sm:$0xff]   ;;  %v1484_v61 = vld [vmem:[%s1957_s1 + $0x130] sm:$0xff]  }
  0x21   : > { %1254 = vmatprep.subr.bf16.mxu0 %v1441_v20  ;;  %v1477_v54 = vld [vmem:[%s1957_s1 + $0x1e0] sm:$0xff]   ;;  %v1480_v57 = vld [vmem:[%s1957_s1 + $0x128] sm:$0xff]   ;;  %v1485_v62 = vld [vmem:[%s1957_s1 + $0x1f0] sm:$0xff]  }
  0x22   : > { %1275 = vmatpush3.bf16.msra.mxu1 %v1440_v19  ;;  %v1478_v55 = vld [vmem:[%s1957_s1 + $0x1a0] sm:$0xff]   ;;  %v1481_v58 = vld [vmem:[%s1957_s1 + $0x1e8] sm:$0xff]   ;;  %v1486_v63 = vld [vmem:[%s1957_s1 + $0x1b0] sm:$0xff]  }
  0x23   : > { %1276 = vmatprep.subr.bf16.mxu1 %v1443_v22  ;;  %v1482_v59 = vld [vmem:[%s1957_s1 + $0x1a8] sm:$0xff]   ;;  %v1487_v0 = vld [vmem:[%s1957_s1 + $0x178] sm:$0xff]   ;;  %v1490_v3 = vld [vmem:[%s1758_s10 + $0x10] ss:$36 sps:$4 sm:$0xff]  }
  0x24   : > { %1255 = vmatpush3.bf16.msra.mxu0 %v1442_v21  ;;  %v1488_v1 = vld [vmem:[%s1957_s1 + $0x138] sm:$0xff]   ;;  %v1497_v9 = vld [vmem:[%s1957_s1 + $0x200] sm:$0xff]   ;;  %v1498_v10 = vld [vmem:[%s1957_s1 + $0x208] sm:$0xff]  }
  0x25   : > { %1256 = vmatprep.subr.bf16.mxu0 %v1445_v24  ;;  %v1489_v2 = vld [vmem:[%s1957_s1 + $0x1f8] sm:$0xff]   ;;  %v1499_v11 = vld [vmem:[%s1957_s1 + $0x210] sm:$0xff]   ;;  %v1501_v13 = vld [vmem:[%s1957_s1 + $0x220] sm:$0xff]  }
  0x26   : > { %1277 = vmatpush3.bf16.msra.mxu1 %v1444_v23  ;;  %v1492_v4 = vld [vmem:[%s1758_s10 + $0x14] ss:$36 sps:$4 sm:$0xff]   ;;  %v1496_v8 = vld [vmem:[%s1758_s10 + $0x1c] ss:$36 sps:$4 sm:$0xff]   ;;  %v1502_v14 = vld [vmem:[%s1957_s1 + $0x228] sm:$0xff]  }
  0x27   : > { %1278 = vmatprep.subr.bf16.mxu1 %v1447_v26  ;;  %v1493_v5 = vld [vmem:[%s1957_s1 + $0x1b8] sm:$0xff]   ;;  %v1503_v15 = vld [vmem:[%s1957_s1 + $0x230] sm:$0xff]   ;;  %v1505_v17 = vld [vmem:[%s1758_s10 + $0x20] ss:$36 sps:$4 sm:$0xff]  }
  0x28   : > { %1257 = vmatpush3.bf16.msra.mxu0 %v1446_v25  ;;  %v1494_v7 = vld [vmem:[%s1758_s10 + $0x18] ss:$36 sps:$4 sm:$0xff]   ;;  %v1156_v19 = vld [vmem:[%s1958_s2] ss:$0 sm:$0xff]  ;;  %s188_s10 = sand.u32 1, %s1568_s13  }
  0x29   : > { %1258 = vmatprep.subr.bf16.mxu0 %v1449_v28  ;;  %v1500_v12 = vld [vmem:[%s1957_s1 + $0x218] sm:$0xff]   ;;  %s1154_s29 = sshll.u32 %s188_s10, 4  ;;  %s1910_s15 = scalar_lea.sflag [#allocation3], %s188_s10 }
  0x2a   : > { %1279 = vmatpush3.bf16.msra.mxu1 %v1448_v27  ;;  %v1504_v16 = vld [vmem:[%s1957_s1 + $0x238] sm:$0xff]   ;;  %s190_s30 = scalar_lea.vmem [#allocation2], %s1154_s29 }
  0x2b   : > { %1280 = vmatprep.subr.bf16.mxu1 %v1451_v30  ;;  %s1067_s4 = sshll.u32 %s190_s30, 4  ;;  %s1903_s4 = int_to_ptr.vmem [resolvable:$true] %s1067_s4 }
  0x2c   : > { %1259 = vmatpush3.bf16.msra.mxu0 %v1450_v29  ;;  %s1506_s9 = scalar_lea.vmem %s1903_s4, 256  ;;  %p1513_p1 = scmp.lt.s32.totalorder %s1903_s4, %s1511_s18 }
  0x2d   : > { %1288 = vmatprep.subr.bf16.mxu0 %v1456_v34  ;;  %p1507_p12 = scmp.ne.s32.totalorder %s1903_s4, %s1506_s9  ;;  %p1514_p2 = scmp.lt.s32.totalorder %s1512_s19, %s1506_s9 }
  0x2e   : > { %1281 = vmatpush3.bf16.msra.mxu1 %v1455_v33 }
  0x2f   : > { %876 = vmatmul.mubr.bf16.vlgmr.msra.gmra.mrb[0].mxu0 %v1452_v31  ;;  %1310 = vmatprep.subr.bf16.mxu1 %v1461_v38  ;;  %p1508_p13 = pnand %p1507_p12, %p1651_p4  ;;  %p1515_p3 = por %p1514_p2, %p1513_p1 }
  0x30   : > { %1289 = vmatpush3.bf16.msra.mxu0 %v1460_v37  ;;  %957 = vmatprep.mubr.bf16.mxu0 %v1492_v4 }
  0x31   : > { %917 = vmatmul.mubr.bf16.vlgmr.msra.gmra.mrb[0].mxu1 %v1457_v35  ;;  %1290 = vmatprep.subr.bf16.mxu0 %v1463_v40  ;;  %p1509_p0 = pneg %p1508_p13 }
  0x32   : > { %1311 = vmatpush3.bf16.msra.mxu1 %v1462_v39  ;;  %998 = vmatprep.mubr.bf16.mxu1 %v1496_v8 }
  0x33   : > { %1312 = vmatprep.subr.bf16.mxu1 %v1465_v42  ;;  %p1516_p5 = pnand %p1515_p3, %p1509_p0 }
  0x34   : > { %1291 = vmatpush3.bf16.msra.mxu0 %v1464_v41 }
  0x35   : > { %1292 = vmatprep.subr.bf16.mxu0 %v1467_v44 }
  0x36   : > { %1313 = vmatpush3.bf16.msra.mxu1 %v1466_v43 }
  0x37   : > { %1314 = vmatprep.subr.bf16.mxu1 %v1469_v46 }
  0x38   : > { %1293 = vmatpush3.bf16.msra.mxu0 %v1468_v45 }
  0x39   : > { %1294 = vmatprep.subr.bf16.mxu0 %v1471_v48 }
  0x3a   : > { %1315 = vmatpush3.bf16.msra.mxu1 %v1470_v47 }
  0x3b   : > { %1316 = vmatprep.subr.bf16.mxu1 %v1473_v50 }
  0x3c   : > { %1295 = vmatpush3.bf16.msra.mxu0 %v1472_v49 }
  0x3d   : > { %1296 = vmatprep.subr.bf16.mxu0 %v1475_v52 }
  0x3e   : > { %1317 = vmatpush3.bf16.msra.mxu1 %v1474_v51 }
  0x3f   : > { %1318 = vmatprep.subr.bf16.mxu1 %v1477_v54 }
  0x40   : > { %1297 = vmatpush3.bf16.msra.mxu0 %v1476_v53 }
  0x41   : > { %1298 = vmatprep.subr.bf16.mxu0 %v1479_v56 }
  0x42   : > { %1319 = vmatpush3.bf16.msra.mxu1 %v1478_v55 }
  0x43   : > { %1320 = vmatprep.subr.bf16.mxu1 %v1481_v58 }
  0x44   : > { %1299 = vmatpush3.bf16.msra.mxu0 %v1480_v57 }
  0x45   : > { %1300 = vmatprep.subr.bf16.mxu0 %v1483_v60 }
  0x46   : > { %1321 = vmatpush3.bf16.msra.mxu1 %v1482_v59 }
  0x47   : > { %1322 = vmatprep.subr.bf16.mxu1 %v1485_v62 }
  0x48   : > { %1301 = vmatpush3.bf16.msra.mxu0 %v1484_v61 }
  0x49   : > { %1302 = vmatprep.subr.bf16.mxu0 %v1487_v0 }
  0x4a   : > { %1323 = vmatpush3.bf16.msra.mxu1 %v1486_v63 }
  0x4b   : > { %1324 = vmatprep.subr.bf16.mxu1 %v1489_v2 }
  0x4c   : > { %1303 = vmatpush3.bf16.msra.mxu0 %v1488_v1 }
  0x4d   : > { %1341 = vmatprep.subr.bf16.mxu0 %v1586_v6 }
  0x4e   : > { %1325 = vmatpush3.bf16.msra.mxu1 %v1493_v5 }
  0x4f   : > { %958 = vmatmul.mubr.bf16.vlgmr.msra.gmra.mrb[4].mxu0 %v1490_v3 }
  0x50   : > { %1357 = vmatprep.mubr.msk.bf16.mxu0 %vm1587_vm0, %v1586_v6  ;;  %1342 = vmatpush3.bf16.msra.mxu0 %v1497_v9 }
  0x51   : > { %999 = vmatmul.mubr.bf16.vlgmr.msra.gmra.mrb[4].mxu1 %v1494_v7  ;;  %1343 = vmatprep.subr.bf16.mxu0 %v1586_v6 }
  0x54   : > { %1344 = vmatpush3.bf16.msra.mxu0 %v1498_v10 }
  0x55   : > { %1345 = vmatprep.subr.bf16.mxu0 %v1586_v6 }
  0x58   : > { %1346 = vmatpush3.bf16.msra.mxu0 %v1499_v11 }
  0x59   : > { %1347 = vmatprep.subr.bf16.mxu0 %v1586_v6 }
  0x5c   : > { %1348 = vmatpush3.bf16.msra.mxu0 %v1500_v12 }
  0x5d   : > { %1349 = vmatprep.subr.bf16.mxu0 %v1586_v6 }
  0x60   : > { %1350 = vmatpush3.bf16.msra.mxu0 %v1501_v13 }
  0x61   : > { %1351 = vmatprep.subr.bf16.mxu0 %v1586_v6 }
  0x64   : > { %1352 = vmatpush3.bf16.msra.mxu0 %v1502_v14 }
  0x65   : > { %1353 = vmatprep.subr.bf16.mxu0 %v1586_v6 }
  0x68   : > { %1354 = vmatpush3.bf16.msra.mxu0 %v1503_v15 }
  0x69   : > { %1355 = vmatprep.subr.bf16.mxu0 %v1586_v6 }
  0x6c   : > { %1356 = vmatpush3.bf16.msra.mxu0 %v1504_v16 }
  0x6f   : > { %1358 = vmatmul.mubr.bf16.vlgmr.msra.gmra.mrb[8].mxu0 %v1505_v17 }
 0x102   : > { %v1260_v18 = vpop.f32.mrb[0].mxu0 }
 0x103   : > { %v1261_v20 = vpop.f32.mrb[1].mxu0 }
 0x104   : > { %v1262_v21 = vadd.f32 %v1261_v20, %v1260_v18  ;;  %v1263_v22 = vpop.f32.mrb[2].mxu0  ;;  %v1282_v23 = vpop.f32.mrb[0].mxu1 }
 0x105   : > { %v1264_v24 = vpop.f32.mrb[3].mxu0  ;;  %v1283_v27 = vpop.f32.mrb[1].mxu1 }
 0x106   : > { %v878_v25 = vadd.f32 %v1262_v21, %v1156_v19  ;;  %v1265_v26 = vadd.f32 %v1264_v24, %v1263_v22  ;;  %v1284_v28 = vadd.f32 %v1283_v27, %v1282_v23  ;;  %v1285_v29 = vpop.f32.mrb[2].mxu1 }
 0x107   : > { %v1286_v31 = vpop.f32.mrb[3].mxu1 }
 0x108   : > { %v881_v30 = vadd.f32 %v1265_v26, %v1156_v19  ;;  %v919_v32 = vadd.f32 %v1284_v28, %v878_v25  ;;  %v1287_v33 = vadd.f32 %v1286_v31, %v1285_v29 }
 0x10a   : > { %v922_v34 = vadd.f32 %v1287_v33, %v881_v30 }
 0x122   : > { %v1304_v35 = vpop.f32.mrb[4].mxu0 }
 0x123   : > { %v1305_v36 = vpop.f32.mrb[5].mxu0 }
 0x124   : > { %v1306_v37 = vadd.f32 %v1305_v36, %v1304_v35  ;;  %v1307_v38 = vpop.f32.mrb[6].mxu0  ;;  %v1326_v39 = vpop.f32.mrb[4].mxu1 }
 0x125   : > { %v1308_v40 = vpop.f32.mrb[7].mxu0  ;;  %v1327_v43 = vpop.f32.mrb[5].mxu1 }
 0x126   : > { %v960_v41 = vadd.f32 %v1306_v37, %v919_v32  ;;  %v1309_v42 = vadd.f32 %v1308_v40, %v1307_v38  ;;  %v1328_v44 = vadd.f32 %v1327_v43, %v1326_v39  ;;  %v1329_v45 = vpop.f32.mrb[6].mxu1 }
 0x127   : > { %v1330_v47 = vpop.f32.mrb[7].mxu1 }
 0x128   : > { %v963_v46 = vadd.f32 %v1309_v42, %v922_v34  ;;  %v1331_v48 = vadd.f32 %v1330_v47, %v1329_v45  ;;  %v1001_v49 = vadd.f32 %v1328_v44, %v960_v41 }
 0x12a   : > { %v1004_v50 = vadd.f32 %v1331_v48, %v963_v46 }
 0x142   : > { %v1041_v51 = vpop.f32.mrb[8].mxu0 }
 0x143   : > { %v1042_v52 = vadd.f32 %v1041_v51, %v1001_v49  ;;  %v1359_v53 = vpop.f32.mrb[9].mxu0 }
 0x144   : > { %v1044_v54 = vpop.f32.mrb[10].mxu0 }
 0x145   : > { %1049 = vst.msk [vmem:[%s190_s30] sm:$0xff] %vm1048_vm1, %v1042_v52  ;;  %v1045_v55 = vadd.f32 %v1044_v54, %v1004_v50  ;;  %v1360_v56 = vpop.f32.mrb[11].mxu0 }
 0x147   : > { %1050 = vst.msk [vmem:[%s190_s30 + $0x8] sm:$0xff] %vm1048_vm1, %v1045_v55 }
 0x148   : > { %1519 = shalt.err (!%p1516_p5)
}
 0x149   : > { %s1520_s21 = scalar_lea.hbm %s1908_s7, 256  ;;  %s1524_s27 = scalar_lea.hbm %s1959_s3, 512 }
 0x14a   : > { %p1521_p6 = scmp.ne.s32.totalorder %s1908_s7, %s1520_s21  ;;  %p1525_p10 = scmp.lt.u32.totalorder %s1908_s7, %s1959_s3 }
 0x14b   : > { %p1526_p11 = scmp.lt.u32.totalorder %s1524_s27, %s1520_s21  ;;  %p1528_p13 = scmp.lt.u32.totalorder %s1520_s21, %s1908_s7 }
 0x14c   : > { %p1522_p7 = pnand %p1521_p6, %p1651_p4 }
 0x14d   : > { %p1527_p12 = por %p1526_p11, %p1525_p10 }
 0x14e   : > { %p1523_p9 = pneg %p1522_p7 }
 0x14f   : > { %p1529_p0 = por %p1528_p13, %p1527_p12 }
 0x151   : > { %p1530_p1 = pnand %p1529_p0, %p1523_p9 }
 0x153   : > { %1533 = shalt.err (!%p1530_p1)
}
 0x154   : > { %s1589_s29 = smov 128   ;;  %s1590_s30 = smov 8  }
 0x155   : > { %1362 = dma.vmem_to_hbm [thread:$0]  (%p1651_p4), %s1903_s4, 256, %s1908_s7, %s1910_s15, %s1589_s29, %s1589_s29, %s1590_s30  }
 0x156 PF: > { %p1368_p2 = scmp.ge.s32.totalorder %s1584_s17, 2  ;;  %s1082_s5 = sand.u32 1, %s1564_s12  }
 0x157   : > { %s1083_s6 = scalar_lea.sflag [#allocation3], %s1082_s5 }
 0x158   : > { %p1365_p3 = pnand %p1368_p2, %p1658_p8 }
 0x15a   : > { %1559 = dma.done.wait (!%p1365_p3), %s1083_s6, 256  }
 0x15b   : > { %1561 = vsyncadd (!%p1365_p3), %s1083_s6, 4294967040  ;;  %s16_s17 = sadd.s32 1, %s1584_s17   ;;  %s1962_s12 = smov %s1568_s13 }
 0x15c   : > { %p13_p5 = scmp.ge.s32.totalorder %s16_s17, 4   ;;  %s1963_s13 = smov %s1572_s14 }
 0x15d   : > { %s1964_s14 = smov %s1664_s25  ;;  %s1965_s15 = smov %s1580_s16 }
 0x15e   : > { %s1966_s16 = smov %s1968_s20  ;;  %15 = sbr.rel (!%p13_p5) target bundleno = 4 (0x4), region = 67 }
 0x165   :  { %1088 = vsyncpa [#allocation3], 1 }
 0x166   :  { %1090 = vsyncpa [#allocation3 + $0x1], 1 }

</bundles_post_ra>
